<compile_context>
chip_gen: v6e
topology: v6e:2x2x1
jax: 0.10.0
libtpu: 0.0.40
codegen_flags: <defaults>
</compile_context>

<pallas_src>
import functools

import jax
import jax.numpy as jnp
from jax.experimental import pallas as pl
from jax.experimental.pallas import tpu as pltpu


def _round_up(n: int, m: int) -> int:
    return (n + m - 1) // m * m


def _sae_kernel(x_ref, w_enc_ref, b_enc_ref, w_dec_ref, b_dec_ref,
                z_ref, recon_ref):
    # In-kernel cast of the f32 input tile to the MXU compute dtype (VPU has slack).
    x = x_ref[...].astype(w_enc_ref.dtype)
    # Encoder matmul on the MXU with f32 accumulation.
    z = jnp.dot(x, w_enc_ref[...], preferred_element_type=jnp.float32)
    # Bias + ReLU in f32 on the VPU (v5e VPU has no bf16 path).
    z = jnp.maximum(z + b_enc_ref[...], 0.0)
    z_ref[...] = z.astype(z_ref.dtype)
    # Decoder matmul; cast activations to the weight dtype for the MXU.
    recon = jnp.dot(z.astype(w_dec_ref.dtype), w_dec_ref[...],
                    preferred_element_type=jnp.float32)
    recon_ref[...] = (recon + b_dec_ref[...]).astype(recon_ref.dtype)


def prepare_params(w_enc, b_enc, w_dec, b_dec, compute_dtype=jnp.bfloat16):
    """One-time weight prep (hoisted out of the per-call path, per review).

    Weights are stored pre-transposed for `x @ W` and cast to the compute dtype;
    biases stay f32 for the VPU bias-add.
    """
    d_in, d_lat = w_enc.shape
    assert w_dec.shape == (d_lat, d_in)
    return (w_enc.astype(compute_dtype),
            jnp.reshape(b_enc, (1, d_lat)).astype(jnp.float32),
            w_dec.astype(compute_dtype),
            jnp.reshape(b_dec, (1, d_in)).astype(jnp.float32))


def _choose_batch_tile(batch: int, max_tile: int) -> int:
    b8 = _round_up(batch, 8)
    bt = min(_round_up(max_tile, 8), b8)
    # v7x megacore: aim for >= 8 grid steps (>= 4 per TensorCore) when batch allows,
    # while keeping tiles >= 64 rows so per-step overhead stays amortized.
    while bt > 64 and b8 // bt < 8:
        bt = max(64, _round_up(bt // 2, 8))
    # Avoid large batch over-padding for ragged batch sizes (only pad a few rows).
    while bt > 8 and (_round_up(batch, bt) - batch) * 8 > batch:
        bt = max(8, _round_up(bt // 2, 8))
    return bt


@functools.partial(jax.jit, static_argnames=("batch_tile",))
def sparse_autoencoder_forward(x, w_enc_c, b_enc_c, w_dec_c, b_dec_c, *,
                               batch_tile=512):
    """Fused SAE forward. Expects params from prepare_params(); x is f32 [B, D_in]."""
    B, d_in = x.shape
    d_in_w, d_lat = w_enc_c.shape
    assert d_in_w == d_in, "w_enc must be [D_in, D_lat] (pre-transposed for x @ W)"
    out_dtype = w_enc_c.dtype  # bf16 by default -> halves HBM writeback bytes

    bt = _choose_batch_tile(B, batch_tile)
    B_p = _round_up(B, bt)
    x_in = x if B_p == B else jnp.pad(x, ((0, B_p - B), (0, 0)))
    grid = (B_p // bt,)

    xbytes = jnp.dtype(x.dtype).itemsize
    wbytes = jnp.dtype(w_enc_c.dtype).itemsize
    obytes = jnp.dtype(out_dtype).itemsize
    cost = pl.CostEstimate(
        flops=4 * B_p * d_in * d_lat,                 # two matmuls
        transcendentals=0,
        bytes_accessed=(B_p * d_in * xbytes           # x in
                        + 2 * d_in * d_lat * wbytes   # weights (resident, read once)
                        + (d_lat + d_in) * 4          # biases
                        + B_p * (d_lat + d_in) * obytes),  # z, recon out
    )

    z, recon = pl.pallas_call(
        _sae_kernel,
        out_shape=(
            jax.ShapeDtypeStruct((B_p, d_lat), out_dtype),
            jax.ShapeDtypeStruct((B_p, d_in), out_dtype),
        ),
        grid_spec=pltpu.PrefetchScalarGridSpec(
            num_scalar_prefetch=0,
            grid=grid,
            in_specs=[
                # x: tiled over batch, full feature dim (== array dim, so legal).
                pl.BlockSpec((bt, d_in), lambda i: (i, 0)),
                # Weights / biases: constant index_map -> kept resident in VMEM,
                # not re-DMA'd per grid step.
                pl.BlockSpec((d_in, d_lat), lambda i: (0, 0)),
                pl.BlockSpec((1, d_lat), lambda i: (0, 0)),
                pl.BlockSpec((d_lat, d_in), lambda i: (0, 0)),
                pl.BlockSpec((1, d_in), lambda i: (0, 0)),
            ],
            out_specs=[
                pl.BlockSpec((bt, d_lat), lambda i: (i, 0)),
                pl.BlockSpec((bt, d_in), lambda i: (i, 0)),
            ],
        ),
        compiler_params=pltpu.CompilerParams(
            # Batch axis is embarrassingly parallel -> shards across TCs on v7x.
            dimension_semantics=("parallel",),
        ),
        cost_estimate=cost,
    )(x_in, w_enc_c, b_enc_c, w_dec_c, b_dec_c)

    if B_p != B:
        z, recon = z[:B], recon[:B]
    return z, recon


def init_params(key, input_dim, latent_dim):
    """Deterministic init mirroring torch.nn.Linear's U(-1/sqrt(fan_in), 1/sqrt(fan_in))."""
    k1, k2, k3, k4 = jax.random.split(key, 4)
    bound_enc = 1.0 / jnp.sqrt(jnp.float32(input_dim))
    bound_dec = 1.0 / jnp.sqrt(jnp.float32(latent_dim))
    # Stored already transposed for x @ W.
    w_enc = jax.random.uniform(k1, (input_dim, latent_dim), jnp.float32,
                               -bound_enc, bound_enc)
    b_enc = jax.random.uniform(k2, (1, latent_dim), jnp.float32,
                               -bound_enc, bound_enc)
    w_dec = jax.random.uniform(k3, (latent_dim, input_dim), jnp.float32,
                               -bound_dec, bound_dec)
    b_dec = jax.random.uniform(k4, (1, input_dim), jnp.float32,
                               -bound_dec, bound_dec)
    return w_enc, b_enc, w_dec, b_dec


if __name__ == "__main__":
    INPUT_DIM = 784
    LATENT_DIM = 64
    BATCH = 2048        # grid of 8 batch tiles -> >= 4 pipelined steps per v7x TC
    BATCH_TILE = 512    # cap; heuristic picks 256 here so the grid has 8 steps

    key = jax.random.PRNGKey(0)
    kx, kp = jax.random.split(key)
    x = jax.random.normal(kx, (BATCH, INPUT_DIM), jnp.float32)
    w_enc, b_enc, w_dec, b_dec = init_params(kp, INPUT_DIM, LATENT_DIM)

    # One-time param prep (cast to bf16 compute dtype), reused across calls.
    params = prepare_params(w_enc, b_enc, w_dec, b_dec, compute_dtype=jnp.bfloat16)

    z, recon = sparse_autoencoder_forward(x, *params, batch_tile=BATCH_TILE)
    jax.block_until_ready((z, recon))

    # Pure-JAX f32 reference check (tolerance covers bf16 MXU operands/outputs).
    z_ref = jnp.maximum(x @ w_enc + b_enc, 0.0)
    recon_ref = z_ref @ w_dec + b_dec
    assert z.shape == (BATCH, LATENT_DIM) and recon.shape == (BATCH, INPUT_DIM)
    z_f32 = z.astype(jnp.float32)
    recon_f32 = recon.astype(jnp.float32)
    assert jnp.all(z_f32 >= 0.0)
    assert jnp.allclose(z_f32, z_ref, atol=2e-2, rtol=2e-2)
    assert jnp.allclose(recon_f32, recon_ref, atol=2e-2, rtol=2e-2)

    print("KERNEL_OK")
</pallas_src>

<mosaic_0001>
module attributes {stable_mosaic.version = 11 : i64} {
  func.func @_sae_kernel(%arg0: i32, %arg1: memref<256x784xf32, #tpu.memory_space<vmem>>, %arg2: memref<784x64xbf16, #tpu.memory_space<vmem>>, %arg3: memref<1x64xf32, #tpu.memory_space<vmem>>, %arg4: memref<64x784xbf16, #tpu.memory_space<vmem>>, %arg5: memref<1x784xf32, #tpu.memory_space<vmem>>, %arg6: memref<256x64xbf16, #tpu.memory_space<vmem>>, %arg7: memref<256x784xbf16, #tpu.memory_space<vmem>>) attributes {dimension_semantics = [#tpu.dimension_semantics<parallel>], iteration_bounds = array<i64: 8>, scalar_prefetch = 0 : i64, scratch_operands = 0 : i64, tpu.core_type = #tpu.core_type<tc>, window_params = [{transform_indices = @transform_0, window_bounds = array<i64: 256, 784>}, {pipeline_mode = #tpu.pipeline_mode<synchronous>, transform_indices = @transform_1, window_bounds = array<i64: 784, 64>}, {pipeline_mode = #tpu.pipeline_mode<synchronous>, transform_indices = @transform_2, window_bounds = array<i64: 1, 64>}, {pipeline_mode = #tpu.pipeline_mode<synchronous>, transform_indices = @transform_3, window_bounds = array<i64: 64, 784>}, {pipeline_mode = #tpu.pipeline_mode<synchronous>, transform_indices = @transform_4, window_bounds = array<i64: 1, 784>}, {transform_indices = @transform_5, window_bounds = array<i64: 256, 64>}, {transform_indices = @transform_6, window_bounds = array<i64: 256, 784>}]} {
    %c0 = arith.constant 0 : index
    %c0_0 = arith.constant 0 : index
    %0 = vector.load %arg1[%c0, %c0_0] : memref<256x784xf32, #tpu.memory_space<vmem>>, vector<256x784xf32>
    %1 = arith.truncf %0 : vector<256x784xf32> to vector<256x784xbf16>
    %c0_1 = arith.constant 0 : index
    %c0_2 = arith.constant 0 : index
    %2 = vector.load %arg2[%c0_1, %c0_2] : memref<784x64xbf16, #tpu.memory_space<vmem>>, vector<784x64xbf16>
    %cst = arith.constant dense<0.000000e+00> : vector<256x64xf32>
    %3 = tpu.matmul %1, %2, %cst {dimension_numbers = #tpu.dot_dimension_numbers<[1], [0], [0], [1], [0, 0, 1, 1], [], []>} : vector<256x784xbf16>, vector<784x64xbf16>, vector<256x64xf32> -> vector<256x64xf32>
    %c0_3 = arith.constant 0 : index
    %c0_4 = arith.constant 0 : index
    %4 = vector.load %arg3[%c0_3, %c0_4] : memref<1x64xf32, #tpu.memory_space<vmem>>, vector<1x64xf32>
    %5 = vector.broadcast %4 : vector<1x64xf32> to vector<256x64xf32>
    %6 = arith.addf %3, %5 : vector<256x64xf32>
    %cst_5 = arith.constant 0.000000e+00 : f32
    %7 = vector.broadcast %cst_5 : f32 to vector<256x64xf32>
    %8 = arith.maximumf %6, %7 : vector<256x64xf32>
    %9 = arith.truncf %8 : vector<256x64xf32> to vector<256x64xbf16>
    %c0_6 = arith.constant 0 : index
    %c0_7 = arith.constant 0 : index
    %10 = vector.load %arg6[%c0_6, %c0_7] : memref<256x64xbf16, #tpu.memory_space<vmem>>, vector<256x64xbf16>
    tpu.vector_store %arg6[%c0_6, %c0_7], %9 {strides = array<i32>} : memref<256x64xbf16, #tpu.memory_space<vmem>>, vector<256x64xbf16>,
    %11 = arith.truncf %8 : vector<256x64xf32> to vector<256x64xbf16>
    %c0_8 = arith.constant 0 : index
    %c0_9 = arith.constant 0 : index
    %12 = vector.load %arg4[%c0_8, %c0_9] : memref<64x784xbf16, #tpu.memory_space<vmem>>, vector<64x784xbf16>
    %cst_10 = arith.constant dense<0.000000e+00> : vector<256x784xf32>
    %13 = tpu.matmul %11, %12, %cst_10 {dimension_numbers = #tpu.dot_dimension_numbers<[1], [0], [0], [1], [0, 0, 1, 1], [], []>} : vector<256x64xbf16>, vector<64x784xbf16>, vector<256x784xf32> -> vector<256x784xf32>
    %c0_11 = arith.constant 0 : index
    %c0_12 = arith.constant 0 : index
    %14 = vector.load %arg5[%c0_11, %c0_12] : memref<1x784xf32, #tpu.memory_space<vmem>>, vector<1x784xf32>
    %15 = vector.broadcast %14 : vector<1x784xf32> to vector<256x784xf32>
    %16 = arith.addf %13, %15 : vector<256x784xf32>
    %17 = arith.truncf %16 : vector<256x784xf32> to vector<256x784xbf16>
    %c0_13 = arith.constant 0 : index
    %c0_14 = arith.constant 0 : index
    %18 = vector.load %arg7[%c0_13, %c0_14] : memref<256x784xbf16, #tpu.memory_space<vmem>>, vector<256x784xbf16>
    tpu.vector_store %arg7[%c0_13, %c0_14], %17 {strides = array<i32>} : memref<256x784xbf16, #tpu.memory_space<vmem>>, vector<256x784xbf16>,
    return
  }
  func.func @transform_0(%arg0: i32) -> (i32, i32) {
    %c0_i32 = arith.constant 0 : i32
    %c0_i32_0 = arith.constant 0 : i32
    return %arg0, %c0_i32 : i32, i32
  }
  func.func @transform_1(%arg0: i32) -> (i32, i32) {
    %c0_i32 = arith.constant 0 : i32
    %c0_i32_0 = arith.constant 0 : i32
    %c0_i32_1 = arith.constant 0 : i32
    return %c0_i32, %c0_i32_0 : i32, i32
  }
  func.func @transform_2(%arg0: i32) -> (i32, i32) {
    %c0_i32 = arith.constant 0 : i32
    %c0_i32_0 = arith.constant 0 : i32
    %c0_i32_1 = arith.constant 0 : i32
    return %c0_i32, %c0_i32_0 : i32, i32
  }
  func.func @transform_3(%arg0: i32) -> (i32, i32) {
    %c0_i32 = arith.constant 0 : i32
    %c0_i32_0 = arith.constant 0 : i32
    %c0_i32_1 = arith.constant 0 : i32
    return %c0_i32, %c0_i32_0 : i32, i32
  }
  func.func @transform_4(%arg0: i32) -> (i32, i32) {
    %c0_i32 = arith.constant 0 : i32
    %c0_i32_0 = arith.constant 0 : i32
    %c0_i32_1 = arith.constant 0 : i32
    return %c0_i32, %c0_i32_0 : i32, i32
  }
  func.func @transform_5(%arg0: i32) -> (i32, i32) {
    %c0_i32 = arith.constant 0 : i32
    %c0_i32_0 = arith.constant 0 : i32
    return %arg0, %c0_i32 : i32, i32
  }
  func.func @transform_6(%arg0: i32) -> (i32, i32) {
    %c0_i32 = arith.constant 0 : i32
    %c0_i32_0 = arith.constant 0 : i32
    return %arg0, %c0_i32 : i32, i32
  }
}

</mosaic_0001>

<bundles_post_ra>
// kernel: sparse_autoencoder_forward.1
= control target key start
LH: loop header
LB: loop body
LE: loop exit
PB: predicated region body
PF: predicated region fallthrough
CT: control target
= control target key end

     0   :  { %s4905_s21 = smov 0   ;;  %s6240_s0 = inlined_call_operand.vmem [shape: f32[2048,784], index: 0, kind: input, shape index: {}]   ;;  %s6241_s1 = inlined_call_operand.vmem [shape: bf16[784,64], index: 1, kind: input, shape index: {}]   ;;  %s6242_s2 = inlined_call_operand.vmem [shape: f32[1,64], index: 2, kind: input, shape index: {}]   ;;  %s6243_s3 = inlined_call_operand.vmem [shape: bf16[64,784], index: 3, kind: input, shape index: {}]   ;;  %s6244_s4 = inlined_call_operand.vmem [shape: f32[1,784], index: 4, kind: input, shape index: {}]   ;;  %s6245_s5 = inlined_call_operand.vmem [shape: bf16[2048,64], index: 5, kind: output, shape index: {0}]   ;;  %s6246_s6 = inlined_call_operand.vmem [shape: bf16[2048,784], index: 6, kind: output, shape index: {1}]  }
   0x1 LB: > { %s3823_s22 = sadd.s32 4294967295, %s4867_s21   ;;  %p3827_p0 = scmp.ge.s32.totalorder %s4867_s21, 1  ;;  %s4867_s21 = sphi %s4905_s21, %s17_s21  }
   0x2   : > { %p217_p1 = scmp.lt.s32.totalorder %s4867_s21, 9 }
   0x4   : > { %p218_p2 = pnand %p3827_p0, %p217_p1 }
   0x5   : > { %s3828_s7 = sshll.u32 (!%p218_p2), %s3823_s22, 5 }
   0x6   : > { %221 = sbr.rel (%p218_p2) target bundleno = 834 (0x342), region = 40  ;;  %p255_p3 = scmp.lt.s32.totalorder (!%p218_p2), %s3828_s7, 255 }
   0xb   : > { %v4772_v0 = vld [vmem:[%s6241_s1 + $0x78] sm:$0xff]   ;;  %v4776_v4 = vld [vmem:[%s6241_s1 + $0x70] sm:$0xff]   ;;  %v4780_v8 = vld [vmem:[%s6241_s1 + $0x68] sm:$0xff]   ;;  %s6248_s7 = smov (!%p255_p3, %s3828_s7), 255  ;;  %vm1010_vm0 = vcmask 130048   ;;  %vm1863_vm1 = vcmask 519168  }
   0xc   : > { %v4773_v1 = vld [vmem:[%s6241_s1 + $0xf8] sm:$0xff]   ;;  %4314 = vmatprep.subr.bf16.mxu0 %v4772_v0  ;;  %v4777_v5 = vld [vmem:[%s6241_s1 + $0xf0] sm:$0xff]   ;;  %v4781_v9 = vld [vmem:[%s6241_s1 + $0xe8] sm:$0xff]   ;;  %s4761_s8 = smul.u32 56, %s6248_s7  ;;  %s3831_s10 = sshll.u32 %s6248_s7, 2  ;;  %vm2109_vm2 = vcmask 523264  }
   0xd   : > { %v4774_v2 = vld [vmem:[%s6241_s1 + $0x38] sm:$0xff]   ;;  %4426 = vmatprep.subr.bf16.mxu1 %v4773_v1  ;;  %v4778_v6 = vld [vmem:[%s6241_s1 + $0x30] sm:$0xff]   ;;  %v4782_v10 = vld [vmem:[%s6241_s1 + $0x28] sm:$0xff]   ;;  %s5476_s13 = scalar_lea.vmem %s6245_s5, %s3831_s10  ;;  %s4762_s14 = smul.u32 28, %s6248_s7  ;;  %vm3605_vm3 = vcmask 125952  }
   0xe   : > { %v4775_v3 = vld [vmem:[%s6241_s1 + $0xb8] sm:$0xff]   ;;  %4315 = vmatpush3.bf16.msra.mxu0 %v4774_v2  ;;  %v4779_v7 = vld [vmem:[%s6241_s1 + $0xb0] sm:$0xff]   ;;  %v4783_v11 = vld [vmem:[%s6241_s1 + $0xa8] sm:$0xff]   ;;  %s5011_s18 = scalar_lea.vmem %s6240_s0, %s4761_s8 }
   0xf   : > { %4427 = vmatpush3.bf16.msra.mxu1 %v4775_v3  ;;  %4316 = vmatprep.subr.bf16.mxu0 %v4776_v4  ;;  %v4784_v12 = vld [vmem:[%s6241_s1 + $0x60] sm:$0xff]   ;;  %v4788_v16 = vld [vmem:[%s6241_s1 + $0x58] sm:$0xff]   ;;  %v4792_v20 = vld [vmem:[%s6241_s1 + $0x50] sm:$0xff]   ;;  %s5823_s16 = scalar_lea.vmem %s6246_s6, %s4762_s14 }
  0x10   : > { %4428 = vmatprep.subr.bf16.mxu1 %v4777_v5  ;;  %v4785_v13 = vld [vmem:[%s6241_s1 + $0xe0] sm:$0xff]   ;;  %v4789_v17 = vld [vmem:[%s6241_s1 + $0xd8] sm:$0xff]   ;;  %v4793_v21 = vld [vmem:[%s6241_s1 + $0xd0] sm:$0xff]  }
  0x11   : > { %v4786_v14 = vld [vmem:[%s6241_s1 + $0x20] sm:$0xff]   ;;  %v4790_v18 = vld [vmem:[%s6241_s1 + $0x18] sm:$0xff]   ;;  %v4794_v22 = vld [vmem:[%s6241_s1 + $0x10] sm:$0xff]  }
  0x12   : > { %4317 = vmatpush3.bf16.msra.mxu0 %v4778_v6  ;;  %v4787_v15 = vld [vmem:[%s6241_s1 + $0xa0] sm:$0xff]   ;;  %v4791_v19 = vld [vmem:[%s6241_s1 + $0x98] sm:$0xff]   ;;  %v4795_v23 = vld [vmem:[%s6241_s1 + $0x90] sm:$0xff]  }
  0x13   : > { %4429 = vmatpush3.bf16.msra.mxu1 %v4779_v7  ;;  %4318 = vmatprep.subr.bf16.mxu0 %v4780_v8  ;;  %v4796_v24 = vld [vmem:[%s6241_s1 + $0x48] sm:$0xff]   ;;  %v4800_v28 = vld [vmem:[%s6241_s1 + $0x40] sm:$0xff]   ;;  %v278_v34 = vld [vmem:[%s5011_s18 + $0x18] sm:$0xff] }
  0x14   : > { %4430 = vmatprep.subr.bf16.mxu1 %v4781_v9  ;;  %v4797_v25 = vld [vmem:[%s6241_s1 + $0xc8] sm:$0xff]   ;;  %v4801_v29 = vld [vmem:[%s6241_s1 + $0xc0] sm:$0xff]   ;;  %v285_v36 = vld [vmem:[%s5011_s18 + $0x50] sm:$0xff] }
  0x15   : > { %v4798_v26 = vld [vmem:[%s6241_s1 + $0x8] sm:$0xff]   ;;  %v4802_v30 = vld [vmem:[%s6241_s1] sm:$0xff]   ;;  %v282_v38 = vld [vmem:[%s5011_s18 + $0x38] sm:$0xff]  ;;  %v502_v39 = vpack.c.bf16 %v285_v36, %v278_v34 }
  0x16   : > { %4319 = vmatpush3.bf16.msra.mxu0 %v4782_v10  ;;  %v4799_v27 = vld [vmem:[%s6241_s1 + $0x88] sm:$0xff]   ;;  %v4803_v31 = vld [vmem:[%s6241_s1 + $0x80] sm:$0xff]   ;;  %v277_v41 = vld [vmem:[%s5011_s18 + $0x10] sm:$0xff] }
  0x17   : > { %4431 = vmatpush3.bf16.msra.mxu1 %v4783_v11  ;;  %4320 = vmatprep.subr.bf16.mxu0 %v4784_v12  ;;  %v276_v32 = vld [vmem:[%s5011_s18 + $0x8] sm:$0xff]  ;;  %v283_v33 = vld [vmem:[%s5011_s18 + $0x40] sm:$0xff]  ;;  %v4804_v44 = vld [vmem:[%s6241_s1 + $0x178] sm:$0xff]  }
  0x18   : > { %4432 = vmatprep.subr.bf16.mxu1 %v4785_v13  ;;  %v500_v35 = vpack.c.bf16 %v283_v33, %v276_v32  ;;  %v275_v37 = vld [vmem:[%s5011_s18] sm:$0xff]  ;;  %v284_v42 = vld [vmem:[%s5011_s18 + $0x48] sm:$0xff]  ;;  %1252 = vmatprep.mubr.bf16.mxu1 %v502_v39  ;;  %v4805_v45 = vld [vmem:[%s6241_s1 + $0x138] sm:$0xff]  }
  0x19   : > { %v499_v40 = vpack.c.bf16 %v282_v38, %v275_v37  ;;  %v501_v43 = vpack.c.bf16 %v284_v42, %v277_v41  ;;  %v4806_v46 = vld [vmem:[%s6241_s1 + $0x180] sm:$0xff]   ;;  %v290_v47 = vld [vmem:[%s5011_s18 + $0x78] sm:$0xff]  ;;  %v297_v48 = vld [vmem:[%s5011_s18 + $0xb0] sm:$0xff] }
  0x1a   : > { %4321 = vmatpush3.bf16.msra.mxu0 %v4786_v14  ;;  %1091 = vmatprep.mubr.bf16.mxu0 %v500_v35  ;;  %v292_v49 = vld [vmem:[%s5011_s18 + $0x88] sm:$0xff]  ;;  %v299_v50 = vld [vmem:[%s5011_s18 + $0xc0] sm:$0xff]  ;;  %v507_v51 = vpack.c.bf16 %v297_v48, %v290_v47  ;;  %v289_v53 = vld [vmem:[%s5011_s18 + $0x70] sm:$0xff] }
  0x1b   : > { %4433 = vmatpush3.bf16.msra.mxu1 %v4787_v15  ;;  %4322 = vmatprep.subr.bf16.mxu0 %v4788_v16  ;;  %v509_v52 = vpack.c.bf16 %v299_v50, %v292_v49  ;;  %v296_v54 = vld [vmem:[%s5011_s18 + $0xa8] sm:$0xff]  ;;  %v291_v55 = vld [vmem:[%s5011_s18 + $0x80] sm:$0xff]  ;;  %v298_v57 = vld [vmem:[%s5011_s18 + $0xb8] sm:$0xff] }
  0x1c   : > { %4434 = vmatprep.subr.bf16.mxu1 %v4789_v17  ;;  %v506_v56 = vpack.c.bf16 %v296_v54, %v289_v53  ;;  %v304_v58 = vld [vmem:[%s5011_s18 + $0xe8] sm:$0xff]  ;;  %v311_v59 = vld [vmem:[%s5011_s18 + $0x120] sm:$0xff]  ;;  %v508_v60 = vpack.c.bf16 %v298_v57, %v291_v55  ;;  %v306_v62 = vld [vmem:[%s5011_s18 + $0xf8] sm:$0xff] }
  0x1d   : > { %v514_v61 = vpack.c.bf16 %v311_v59, %v304_v58  ;;  %v313_v63 = vld [vmem:[%s5011_s18 + $0x130] sm:$0xff]  ;;  %v303_v3 = vld [vmem:[%s5011_s18 + $0xe0] sm:$0xff]  ;;  %v310_v4 = vld [vmem:[%s5011_s18 + $0x118] sm:$0xff] }
  0x1e   : > { %4323 = vmatpush3.bf16.msra.mxu0 %v4790_v18  ;;  %v516_v0 = vpack.c.bf16 %v313_v63, %v306_v62  ;;  %v4807_v1 = vld [vmem:[%s6241_s1 + $0x170] sm:$0xff]   ;;  %v312_v6 = vld [vmem:[%s5011_s18 + $0x128] sm:$0xff]  ;;  %v318_v7 = vld [vmem:[%s5011_s18 + $0x158] sm:$0xff]  ;;  %v513_v11 = vpack.c.bf16 %v310_v4, %v303_v3 }
  0x1f   : > { %4435 = vmatpush3.bf16.msra.mxu1 %v4791_v19  ;;  %4324 = vmatprep.subr.bf16.mxu0 %v4792_v20  ;;  %v4808_v2 = vld [vmem:[%s6241_s1 + $0x130] sm:$0xff]   ;;  %v320_v9 = vld [vmem:[%s5011_s18 + $0x168] sm:$0xff]  ;;  %v327_v10 = vld [vmem:[%s5011_s18 + $0x1a0] sm:$0xff] }
  0x20   : > { %4436 = vmatprep.subr.bf16.mxu1 %v4793_v21  ;;  %v305_v5 = vld [vmem:[%s5011_s18 + $0xf0] sm:$0xff]  ;;  %v523_v14 = vpack.c.bf16 %v327_v10, %v320_v9  ;;  %v4809_v15 = vld [vmem:[%s6241_s1 + $0x168] sm:$0xff]   ;;  %v319_v19 = vld [vmem:[%s5011_s18 + $0x160] sm:$0xff] }
  0x21   : > { %v325_v8 = vld [vmem:[%s5011_s18 + $0x190] sm:$0xff]  ;;  %v515_v12 = vpack.c.bf16 %v312_v6, %v305_v5  ;;  %v4810_v16 = vld [vmem:[%s6241_s1 + $0x128] sm:$0xff]   ;;  %v326_v20 = vld [vmem:[%s5011_s18 + $0x198] sm:$0xff] }
  0x22   : > { %4325 = vmatpush3.bf16.msra.mxu0 %v4794_v22  ;;  %v521_v13 = vpack.c.bf16 %v325_v8, %v318_v7  ;;  %v317_v17 = vld [vmem:[%s5011_s18 + $0x150] sm:$0xff]  ;;  %v324_v18 = vld [vmem:[%s5011_s18 + $0x188] sm:$0xff]  ;;  %v339_v22 = vld [vmem:[%s5011_s18 + $0x200] sm:$0xff] }
  0x23   : > { %4437 = vmatpush3.bf16.msra.mxu1 %v4795_v23  ;;  %4326 = vmatprep.subr.bf16.mxu0 %v4796_v24  ;;  %v332_v21 = vld [vmem:[%s5011_s18 + $0x1c8] sm:$0xff]  ;;  %v334_v23 = vld [vmem:[%s5011_s18 + $0x1d8] sm:$0xff]  ;;  %v341_v24 = vld [vmem:[%s5011_s18 + $0x210] sm:$0xff] }
  0x24   : > { %4438 = vmatprep.subr.bf16.mxu1 %v4797_v25  ;;  %v520_v25 = vpack.c.bf16 %v324_v18, %v317_v17  ;;  %v338_v32 = vld [vmem:[%s5011_s18 + $0x1f8] sm:$0xff]  ;;  %v333_v33 = vld [vmem:[%s5011_s18 + $0x1d0] sm:$0xff]  ;;  %v340_v34 = vld [vmem:[%s5011_s18 + $0x208] sm:$0xff] }
  0x25   : > { %v346_v35 = vld [vmem:[%s5011_s18 + $0x238] sm:$0xff]  ;;  %v353_v36 = vld [vmem:[%s5011_s18 + $0x270] sm:$0xff]  ;;  %v348_v37 = vld [vmem:[%s5011_s18 + $0x248] sm:$0xff] }
  0x26   : > { %4327 = vmatpush3.bf16.msra.mxu0 %v4798_v26  ;;  %v522_v26 = vpack.c.bf16 %v326_v20, %v319_v19  ;;  %v355_v38 = vld [vmem:[%s5011_s18 + $0x280] sm:$0xff]  ;;  %v535_v41 = vpack.c.bf16 %v353_v36, %v346_v35  ;;  %v4813_v42 = vld [vmem:[%s6241_s1 + $0x158] sm:$0xff]   ;;  %v360_v49 = vld [vmem:[%s5011_s18 + $0x2a8] sm:$0xff] }
  0x27   : > { %4439 = vmatpush3.bf16.msra.mxu1 %v4799_v27  ;;  %4328 = vmatprep.subr.bf16.mxu0 %v4800_v28  ;;  %v528_v27 = vpack.c.bf16 %v339_v22, %v332_v21  ;;  %v530_v28 = vpack.c.bf16 %v341_v24, %v334_v23  ;;  %v347_v47 = vld [vmem:[%s5011_s18 + $0x240] sm:$0xff]  ;;  %v354_v48 = vld [vmem:[%s5011_s18 + $0x278] sm:$0xff]  ;;  %v4816_v58 = vld [vmem:[%s6241_s1 + $0x110] sm:$0xff]  }
  0x28   : > { %4440 = vmatprep.subr.bf16.mxu1 %v4801_v29  ;;  %v4811_v29 = vld [vmem:[%s6241_s1 + $0x160] sm:$0xff]   ;;  %v536_v54 = vpack.c.bf16 %v354_v48, %v347_v47  ;;  %v368_v62 = vld [vmem:[%s5011_s18 + $0x2e8] sm:$0xff]  ;;  %v374_v63 = vld [vmem:[%s5011_s18 + $0x318] sm:$0xff] }
  0x29   : > { %v367_v50 = vld [vmem:[%s5011_s18 + $0x2e0] sm:$0xff]  ;;  %v4817_v4 = vld [vmem:[%s6241_s1 + $0x148] sm:$0xff]   ;;  %v373_v9 = vld [vmem:[%s5011_s18 + $0x310] sm:$0xff] }
  0x2a   : > { %4329 = vmatpush3.bf16.msra.mxu0 %v4802_v30  ;;  %v4812_v30 = vld [vmem:[%s6241_s1 + $0x120] sm:$0xff]   ;;  %v542_v55 = vpack.c.bf16 %v367_v50, %v360_v49  ;;  %v4818_v7 = vld [vmem:[%s6241_s1 + $0x108] sm:$0xff]   ;;  %v394_v24 = vld [vmem:[%s5011_s18 + $0x3b8] sm:$0xff] }
  0x2b   : > { %4441 = vmatpush3.bf16.msra.mxu1 %v4803_v31  ;;  %4538 = vmatprep.subr.bf16.mxu0 %v4804_v44  ;;  %v331_v31 = vld [vmem:[%s5011_s18 + $0x1c0] sm:$0xff]  ;;  %v4814_v44 = vld [vmem:[%s6241_s1 + $0x118] sm:$0xff]   ;;  %v380_v10 = vld [vmem:[%s5011_s18 + $0x348] sm:$0xff] }
  0x2c   : > { %4687 = vmatprep.subr.bf16.mxu1 %v4806_v46  ;;  %v527_v39 = vpack.c.bf16 %v338_v32, %v331_v31  ;;  %v359_v59 = vld [vmem:[%s5011_s18 + $0x2a0] sm:$0xff]  ;;  %v548_v18 = vpack.c.bf16 %v380_v10, %v373_v9  ;;  %v401_v35 = vld [vmem:[%s5011_s18 + $0x3f0] sm:$0xff]  ;;  %v408_v36 = vld [vmem:[%s5011_s18 + $0x428] sm:$0xff] }
  0x2d   : > { %1092 = vmatmul.mubr.bf16.vlgmr.msra.gmra.mxu0 %v499_v40  ;;  %v529_v40 = vpack.c.bf16 %v340_v34, %v333_v33  ;;  %v4819_v17 = vld [vmem:[%s6241_s1 + $0x140] sm:$0xff]   ;;  %v422_v48 = vld [vmem:[%s5011_s18 + $0x498] sm:$0xff]  ;;  %v417_v49 = vld [vmem:[%s5011_s18 + $0x470] sm:$0xff] }
  0x2e   : > { %1253 = vmatmul.mubr.bf16.vlgmr.msra.gmra.mxu1 %v501_v43  ;;  %4539 = vmatpush3.bf16.msra.mxu0 %v4805_v45  ;;  %v537_v43 = vpack.c.bf16 %v355_v38, %v348_v37  ;;  %v345_v45 = vld [vmem:[%s5011_s18 + $0x230] sm:$0xff]  ;;  %v4820_v19 = vld [vmem:[%s6241_s1 + $0x100] sm:$0xff]   ;;  %v410_v38 = vld [vmem:[%s5011_s18 + $0x438] sm:$0xff] }
  0x2f   : > { %4688 = vmatpush3.bf16.msra.mxu1 %v4806_v46  ;;  %1099 = vmatprep.mubr.bf16.mxu0 %v507_v51  ;;  %v352_v46 = vld [vmem:[%s5011_s18 + $0x268] sm:$0xff]  ;;  %v362_v51 = vld [vmem:[%s5011_s18 + $0x2b8] sm:$0xff]  ;;  %v387_v23 = vld [vmem:[%s5011_s18 + $0x380] sm:$0xff] }
  0x30   : > { %1260 = vmatprep.mubr.bf16.mxu1 %v509_v52  ;;  %4540 = vmatprep.subr.bf16.mxu0 %v4807_v1  ;;  %v369_v52 = vld [vmem:[%s5011_s18 + $0x2f0] sm:$0xff]  ;;  %v534_v53 = vpack.c.bf16 %v352_v46, %v345_v45  ;;  %v376_v1 = vld [vmem:[%s5011_s18 + $0x328] sm:$0xff]  ;;  %v555_v31 = vpack.c.bf16 %v394_v24, %v387_v23  ;;  %v403_v37 = vld [vmem:[%s5011_s18 + $0x400] sm:$0xff] }
  0x31   : > { %v544_v57 = vpack.c.bf16 %v369_v52, %v362_v51  ;;  %v415_v47 = vld [vmem:[%s5011_s18 + $0x460] sm:$0xff]  ;;  %v424_v50 = vld [vmem:[%s5011_s18 + $0x4a8] sm:$0xff]  ;;  %v430_v51 = vld [vmem:[%s5011_s18 + $0x4d8] sm:$0xff] }
  0x32   : > { %4541 = vmatpush3.bf16.msra.mxu0 %v4808_v2  ;;  %v383_v2 = vld [vmem:[%s5011_s18 + $0x360] sm:$0xff]  ;;  %v437_v52 = vld [vmem:[%s5011_s18 + $0x510] sm:$0xff]  ;;  %v452_v10 = vld [vmem:[%s5011_s18 + $0x588] sm:$0xff] }
  0x33   : > { %4542 = vmatprep.subr.bf16.mxu0 %v4809_v15  ;;  %v551_v8 = vpack.c.bf16 %v383_v2, %v376_v1  ;;  %v390_v15 = vld [vmem:[%s5011_s18 + $0x398] sm:$0xff]  ;;  %v453_v2 = vld [vmem:[%s5011_s18 + $0x590] sm:$0xff]  ;;  %v472_v23 = vld [vmem:[%s5011_s18 + $0x628] sm:$0xff] }
  0x34   : > { %v446_v1 = vld [vmem:[%s5011_s18 + $0x558] sm:$0xff]  ;;  %v445_v9 = vld [vmem:[%s5011_s18 + $0x550] sm:$0xff]  ;;  %v479_v24 = vld [vmem:[%s5011_s18 + $0x660] sm:$0xff] }
  0x35   : > { %1100 = vmatmul.mubr.bf16.gmra.mxu0 %v506_v56  ;;  %v4815_v56 = vld [vmem:[%s6241_s1 + $0x150] sm:$0xff]  }
  0x36   : > { %1261 = vmatmul.mubr.bf16.gmra.mxu1 %v508_v60  ;;  %1107 = vmatprep.mubr.bf16.mxu0 %v514_v61  ;;  %v366_v60 = vld [vmem:[%s5011_s18 + $0x2d8] sm:$0xff]  ;;  %v361_v61 = vld [vmem:[%s5011_s18 + $0x2b0] sm:$0xff] }
  0x37   : > { %1268 = vmatprep.mubr.bf16.mxu1 %v516_v0  ;;  %4543 = vmatpush3.bf16.msra.mxu0 %v4810_v16  ;;  %v381_v0 = vld [vmem:[%s5011_s18 + $0x350] sm:$0xff]  ;;  %v541_v3 = vpack.c.bf16 %v366_v60, %v359_v59  ;;  %v543_v5 = vpack.c.bf16 %v368_v62, %v361_v61  ;;  %v436_v60 = vld [vmem:[%s5011_s18 + $0x508] sm:$0xff]  ;;  %v431_v61 = vld [vmem:[%s5011_s18 + $0x4e0] sm:$0xff] }
  0x38   : > { %4544 = vmatprep.subr.bf16.mxu0 %v4811_v29  ;;  %v549_v6 = vpack.c.bf16 %v381_v0, %v374_v63  ;;  %v397_v16 = vld [vmem:[%s5011_s18 + $0x3d0] sm:$0xff]  ;;  %v404_v29 = vld [vmem:[%s5011_s18 + $0x408] sm:$0xff]  ;;  %v438_v62 = vld [vmem:[%s5011_s18 + $0x518] sm:$0xff] }
  0x39   : > { %v558_v22 = vpack.c.bf16 %v397_v16, %v390_v15  ;;  %v429_v59 = vld [vmem:[%s5011_s18 + $0x4d0] sm:$0xff]  ;;  %v444_v63 = vld [vmem:[%s5011_s18 + $0x548] sm:$0xff]  ;;  %v451_v0 = vld [vmem:[%s5011_s18 + $0x580] sm:$0xff]  ;;  %v585_v16 = vpack.c.bf16 %v452_v10, %v445_v9 }
  0x3a   : > { %v337_v9 = vld [vmem:[%s5011_s18 + $0x1f0] sm:$0xff]  ;;  %v344_v10 = vld [vmem:[%s5011_s18 + $0x228] sm:$0xff] }
  0x3b   : > { %4545 = vmatpush3.bf16.msra.mxu0 %v4812_v30  ;;  %v411_v30 = vld [vmem:[%s5011_s18 + $0x440] sm:$0xff] }
  0x3c   : > { %4546 = vmatprep.subr.bf16.mxu0 %v4813_v42  ;;  %v565_v34 = vpack.c.bf16 %v411_v30, %v404_v29  ;;  %v425_v42 = vld [vmem:[%s5011_s18 + $0x4b0] sm:$0xff]  ;;  %v598_v29 = vpack.c.bf16 %v479_v24, %v472_v23 }
  0x3d   : > { %1108 = vmatmul.mubr.bf16.gmra.mxu0 %v513_v11  ;;  %v375_v11 = vld [vmem:[%s5011_s18 + $0x320] sm:$0xff] }
  0x3e   : > { %1269 = vmatmul.mubr.bf16.gmra.mxu1 %v515_v12  ;;  %1115 = vmatprep.mubr.bf16.mxu0 %v521_v13  ;;  %v382_v12 = vld [vmem:[%s5011_s18 + $0x358] sm:$0xff]  ;;  %v388_v13 = vld [vmem:[%s5011_s18 + $0x388] sm:$0xff] }
  0x3f   : > { %1276 = vmatprep.mubr.bf16.mxu1 %v523_v14  ;;  %4547 = vmatpush3.bf16.msra.mxu0 %v4814_v44  ;;  %v395_v14 = vld [vmem:[%s5011_s18 + $0x3c0] sm:$0xff]  ;;  %v550_v20 = vpack.c.bf16 %v382_v12, %v375_v11  ;;  %v564_v44 = vpack.c.bf16 %v410_v38, %v403_v37  ;;  %v458_v11 = vld [vmem:[%s5011_s18 + $0x5b8] sm:$0xff]  ;;  %v465_v12 = vld [vmem:[%s5011_s18 + $0x5f0] sm:$0xff] }
  0x40   : > { %4548 = vmatprep.subr.bf16.mxu0 %v4815_v56  ;;  %v556_v21 = vpack.c.bf16 %v395_v14, %v388_v13  ;;  %v571_v56 = vpack.c.bf16 %v424_v50, %v417_v49  ;;  %v460_v13 = vld [vmem:[%s5011_s18 + $0x5c8] sm:$0xff]  ;;  %v467_v14 = vld [vmem:[%s5011_s18 + $0x600] sm:$0xff]  ;;  %v281_v49 = vld [vmem:[%s5011_s18 + $0x30] sm:$0xff] }
  0x41   : > { %v488_v37 = vld [vmem:[%s5011_s18 + $0x6a8] sm:$0xff]  ;;  %v495_v38 = vld [vmem:[%s5011_s18 + $0x6e0] sm:$0xff] }
  0x42   : > { %v288_v50 = vld [vmem:[%s5011_s18 + $0x68] sm:$0xff] }
  0x43   : > { %4549 = vmatpush3.bf16.msra.mxu0 %v4816_v58 }
  0x44   : > { %4550 = vmatprep.subr.bf16.mxu0 %v4817_v4  ;;  %v578_v4 = vpack.c.bf16 %v438_v62, %v431_v61  ;;  %v309_v61 = vld [vmem:[%s5011_s18 + $0x110] sm:$0xff]  ;;  %v316_v62 = vld [vmem:[%s5011_s18 + $0x148] sm:$0xff] }
  0x45   : > { %1116 = vmatmul.mubr.bf16.gmra.mxu0 %v520_v25  ;;  %v389_v25 = vld [vmem:[%s5011_s18 + $0x390] sm:$0xff] }
  0x46   : > { %1277 = vmatmul.mubr.bf16.gmra.mxu1 %v522_v26  ;;  %1123 = vmatprep.mubr.bf16.mxu0 %v528_v27  ;;  %v396_v26 = vld [vmem:[%s5011_s18 + $0x3c8] sm:$0xff]  ;;  %v402_v27 = vld [vmem:[%s5011_s18 + $0x3f8] sm:$0xff] }
  0x47   : > { %1284 = vmatprep.mubr.bf16.mxu1 %v530_v28  ;;  %4551 = vmatpush3.bf16.msra.mxu0 %v4818_v7  ;;  %v409_v28 = vld [vmem:[%s5011_s18 + $0x430] sm:$0xff]  ;;  %v557_v32 = vpack.c.bf16 %v396_v26, %v389_v25  ;;  %v443_v7 = vld [vmem:[%s5011_s18 + $0x540] sm:$0xff]  ;;  %v474_v25 = vld [vmem:[%s5011_s18 + $0x638] sm:$0xff] }
  0x48   : > { %4552 = vmatprep.subr.bf16.mxu0 %v4819_v17  ;;  %v563_v33 = vpack.c.bf16 %v409_v28, %v402_v27  ;;  %v591_v17 = vpack.c.bf16 %v465_v12, %v458_v11  ;;  %v481_v26 = vld [vmem:[%s5011_s18 + $0x670] sm:$0xff] }
  0x49   : > { %v600_v30 = vpack.c.bf16 %v481_v26, %v474_v25 }
  0x4b   : > { %4553 = vmatpush3.bf16.msra.mxu0 %v4820_v19  ;;  %v457_v19 = vld [vmem:[%s5011_s18 + $0x5b0] sm:$0xff] }
  0x4d   : > { %1124 = vmatmul.mubr.bf16.gmra.mxu0 %v527_v39  ;;  %v416_v39 = vld [vmem:[%s5011_s18 + $0x468] sm:$0xff] }
  0x4e   : > { %1285 = vmatmul.mubr.bf16.gmra.mxu1 %v529_v40  ;;  %1131 = vmatprep.mubr.bf16.mxu0 %v535_v41  ;;  %v423_v40 = vld [vmem:[%s5011_s18 + $0x4a0] sm:$0xff]  ;;  %v418_v41 = vld [vmem:[%s5011_s18 + $0x478] sm:$0xff] }
  0x4f   : > { %1292 = vmatprep.mubr.bf16.mxu1 %v537_v43  ;;  %v562_v43 = vpack.c.bf16 %v408_v36, %v401_v35  ;;  %v570_v45 = vpack.c.bf16 %v423_v40, %v416_v39  ;;  %v572_v46 = vpack.c.bf16 %v425_v42, %v418_v41  ;;  %v486_v35 = vld [vmem:[%s5011_s18 + $0x698] sm:$0xff]  ;;  %v493_v36 = vld [vmem:[%s5011_s18 + $0x6d0] sm:$0xff]  ;;  %v607_v42 = vpack.c.bf16 %v495_v38, %v488_v37 }
  0x50   : > { %v605_v41 = vpack.c.bf16 %v493_v36, %v486_v35  ;;  %v4821_v35 = vld [vmem:[%s6243_s3 + $0xa8] ss:$28 sps:$4 sm:$0xff]   ;;  %v4824_v37 = vld [vmem:[%s6243_s3 + $0xb0] ss:$28 sps:$4 sm:$0xff]  }
  0x51   : > { %v4823_v36 = vld [vmem:[%s6243_s3 + $0xac] ss:$28 sps:$4 sm:$0xff]  }
  0x52   : > { %2166 = vmatprep.subr.bf16.mxu1 %v4823_v36 }
  0x55   : > { %1132 = vmatmul.mubr.bf16.gmra.mxu0 %v534_v53  ;;  %v432_v53 = vld [vmem:[%s5011_s18 + $0x4e8] sm:$0xff] }
  0x56   : > { %1293 = vmatmul.mubr.bf16.gmra.mxu1 %v536_v54  ;;  %1139 = vmatprep.mubr.bf16.mxu0 %v542_v55  ;;  %v439_v54 = vld [vmem:[%s5011_s18 + $0x520] sm:$0xff]  ;;  %v569_v55 = vpack.c.bf16 %v422_v48, %v415_v47  ;;  %v280_v47 = vld [vmem:[%s5011_s18 + $0x28] sm:$0xff] }
  0x57   : > { %1300 = vmatprep.mubr.bf16.mxu1 %v544_v57  ;;  %v577_v57 = vpack.c.bf16 %v437_v52, %v430_v51  ;;  %v579_v58 = vpack.c.bf16 %v439_v54, %v432_v53  ;;  %v287_v48 = vld [vmem:[%s5011_s18 + $0x60] sm:$0xff]  ;;  %v505_v54 = vpack.c.bf16 %v288_v50, %v281_v49  ;;  %v421_v49 = vld [vmem:[%s5011_s18 + $0x490] sm:$0xff]  ;;  %v428_v50 = vld [vmem:[%s5011_s18 + $0x4c8] sm:$0xff] }
  0x58   : > { %v504_v53 = vpack.c.bf16 %v287_v48, %v280_v47  ;;  %v407_v47 = vld [vmem:[%s5011_s18 + $0x420] sm:$0xff]  ;;  %v414_v48 = vld [vmem:[%s5011_s18 + $0x458] sm:$0xff] }
  0x5d   : > { %1140 = vmatmul.mubr.bf16.gmra.mxu0 %v541_v3  ;;  %v576_v3 = vpack.c.bf16 %v436_v60, %v429_v59  ;;  %v294_v59 = vld [vmem:[%s5011_s18 + $0x98] sm:$0xff]  ;;  %v301_v60 = vld [vmem:[%s5011_s18 + $0xd0] sm:$0xff] }
  0x5e   : > { %1301 = vmatmul.mubr.bf16.gmra.mxu1 %v543_v5  ;;  %1147 = vmatprep.mubr.bf16.mxu0 %v549_v6  ;;  %v584_v5 = vpack.c.bf16 %v451_v0, %v444_v63  ;;  %v586_v6 = vpack.c.bf16 %v453_v2, %v446_v1  ;;  %v511_v1 = vpack.c.bf16 %v301_v60, %v294_v59  ;;  %v435_v59 = vld [vmem:[%s5011_s18 + $0x500] sm:$0xff]  ;;  %v442_v60 = vld [vmem:[%s5011_s18 + $0x538] sm:$0xff] }
  0x5f   : > { %1308 = vmatprep.mubr.bf16.mxu1 %v551_v8  ;;  %v450_v8 = vld [vmem:[%s5011_s18 + $0x578] sm:$0xff]  ;;  %v519_v2 = vpack.c.bf16 %v316_v62, %v309_v61  ;;  %v449_v61 = vld [vmem:[%s5011_s18 + $0x570] sm:$0xff]  ;;  %v456_v62 = vld [vmem:[%s5011_s18 + $0x5a8] sm:$0xff] }
  0x60   : > { %v583_v15 = vpack.c.bf16 %v450_v8, %v443_v7  ;;  %v323_v7 = vld [vmem:[%s5011_s18 + $0x180] sm:$0xff]  ;;  %v330_v8 = vld [vmem:[%s5011_s18 + $0x1b8] sm:$0xff] }
  0x65   : > { %1148 = vmatmul.mubr.bf16.gmra.mxu0 %v548_v18  ;;  %v593_v18 = vpack.c.bf16 %v467_v14, %v460_v13  ;;  %v526_v13 = vpack.c.bf16 %v330_v8, %v323_v7  ;;  %v533_v14 = vpack.c.bf16 %v344_v10, %v337_v9  ;;  %v378_v7 = vld [vmem:[%s5011_s18 + $0x338] sm:$0xff]  ;;  %v385_v8 = vld [vmem:[%s5011_s18 + $0x370] sm:$0xff]  ;;  %v463_v9 = vld [vmem:[%s5011_s18 + $0x5e0] sm:$0xff] }
  0x66   : > { %1309 = vmatmul.mubr.bf16.gmra.mxu1 %v550_v20  ;;  %1155 = vmatprep.mubr.bf16.mxu0 %v556_v21  ;;  %v464_v20 = vld [vmem:[%s5011_s18 + $0x5e8] sm:$0xff]  ;;  %v459_v21 = vld [vmem:[%s5011_s18 + $0x5c0] sm:$0xff]  ;;  %v470_v10 = vld [vmem:[%s5011_s18 + $0x618] sm:$0xff] }
  0x67   : > { %1316 = vmatprep.mubr.bf16.mxu1 %v558_v22  ;;  %v466_v22 = vld [vmem:[%s5011_s18 + $0x5f8] sm:$0xff]  ;;  %v590_v27 = vpack.c.bf16 %v464_v20, %v457_v19  ;;  %v351_v19 = vld [vmem:[%s5011_s18 + $0x260] sm:$0xff] }
  0x68   : > { %v592_v28 = vpack.c.bf16 %v466_v22, %v459_v21  ;;  %v358_v20 = vld [vmem:[%s5011_s18 + $0x298] sm:$0xff]  ;;  %v365_v21 = vld [vmem:[%s5011_s18 + $0x2d0] sm:$0xff]  ;;  %v372_v22 = vld [vmem:[%s5011_s18 + $0x308] sm:$0xff] }
  0x69   : > { %v540_v25 = vpack.c.bf16 %v358_v20, %v351_v19  ;;  %v547_v26 = vpack.c.bf16 %v372_v22, %v365_v21  ;;  %v392_v19 = vld [vmem:[%s5011_s18 + $0x3a8] sm:$0xff]  ;;  %v399_v20 = vld [vmem:[%s5011_s18 + $0x3e0] sm:$0xff]  ;;  %v498_v22 = vld [vmem:[%s5011_s18 + $0x6f8] sm:$0xff] }
  0x6a   : > { %v491_v21 = vld [vmem:[%s5011_s18 + $0x6c0] sm:$0xff] }
  0x6d   : > { %1156 = vmatmul.mubr.bf16.gmra.mxu0 %v555_v31  ;;  %v471_v31 = vld [vmem:[%s5011_s18 + $0x620] sm:$0xff] }
  0x6e   : > { %1317 = vmatmul.mubr.bf16.gmra.mxu1 %v557_v32  ;;  %1163 = vmatprep.mubr.bf16.mxu0 %v563_v33  ;;  %v478_v32 = vld [vmem:[%s5011_s18 + $0x658] sm:$0xff]  ;;  %v473_v33 = vld [vmem:[%s5011_s18 + $0x630] sm:$0xff] }
  0x6f   : > { %1324 = vmatprep.mubr.bf16.mxu1 %v565_v34  ;;  %v480_v34 = vld [vmem:[%s5011_s18 + $0x668] sm:$0xff]  ;;  %v597_v39 = vpack.c.bf16 %v478_v32, %v471_v31  ;;  %v379_v31 = vld [vmem:[%s5011_s18 + $0x340] sm:$0xff]  ;;  %v386_v32 = vld [vmem:[%s5011_s18 + $0x378] sm:$0xff] }
  0x70   : > { %v599_v40 = vpack.c.bf16 %v480_v34, %v473_v33  ;;  %v393_v33 = vld [vmem:[%s5011_s18 + $0x3b0] sm:$0xff]  ;;  %v400_v34 = vld [vmem:[%s5011_s18 + $0x3e8] sm:$0xff] }
  0x75   : > { %1164 = vmatmul.mubr.bf16.gmra.mxu0 %v562_v43  ;;  %v485_v43 = vld [vmem:[%s5011_s18 + $0x690] sm:$0xff] }
  0x76   : > { %1325 = vmatmul.mubr.bf16.gmra.mxu1 %v564_v44  ;;  %1171 = vmatprep.mubr.bf16.mxu0 %v570_v45  ;;  %v492_v44 = vld [vmem:[%s5011_s18 + $0x6c8] sm:$0xff]  ;;  %v487_v45 = vld [vmem:[%s5011_s18 + $0x6a0] sm:$0xff] }
  0x77   : > { %1332 = vmatprep.mubr.bf16.mxu1 %v572_v46  ;;  %v494_v46 = vld [vmem:[%s5011_s18 + $0x6d8] sm:$0xff]  ;;  %v604_v51 = vpack.c.bf16 %v492_v44, %v485_v43  ;;  %v335_v43 = vld [vmem:[%s5011_s18 + $0x1e0] sm:$0xff] }
  0x78   : > { %v606_v52 = vpack.c.bf16 %v494_v46, %v487_v45  ;;  %v342_v44 = vld [vmem:[%s5011_s18 + $0x218] sm:$0xff]  ;;  %v357_v46 = vld [vmem:[%s5011_s18 + $0x290] sm:$0xff] }
  0x79   : > { %v350_v45 = vld [vmem:[%s5011_s18 + $0x258] sm:$0xff] }
  0x7d   : > { %1172 = vmatmul.mubr.bf16.gmra.mxu0 %v569_v55  ;;  %v279_v55 = vld [vmem:[%s5011_s18 + $0x20] sm:$0xff] }
  0x7e   : > { %1333 = vmatmul.mubr.bf16.gmra.mxu1 %v571_v56  ;;  %1179 = vmatprep.mubr.bf16.mxu0 %v577_v57  ;;  %v286_v56 = vld [vmem:[%s5011_s18 + $0x58] sm:$0xff]  ;;  %v295_v57 = vld [vmem:[%s5011_s18 + $0xa0] sm:$0xff] }
  0x7f   : > { %1340 = vmatprep.mubr.bf16.mxu1 %v579_v58  ;;  %v302_v58 = vld [vmem:[%s5011_s18 + $0xd8] sm:$0xff]  ;;  %v503_v63 = vpack.c.bf16 %v286_v56, %v279_v55  ;;  %v349_v55 = vld [vmem:[%s5011_s18 + $0x250] sm:$0xff]  ;;  %v356_v56 = vld [vmem:[%s5011_s18 + $0x288] sm:$0xff] }
  0x80   : > { %v512_v0 = vpack.c.bf16 %v302_v58, %v295_v57  ;;  %v364_v57 = vld [vmem:[%s5011_s18 + $0x2c8] sm:$0xff]  ;;  %v371_v58 = vld [vmem:[%s5011_s18 + $0x300] sm:$0xff] }
  0x85   : > { %1180 = vmatmul.mubr.bf16.gmra.mxu0 %v576_v3  ;;  %v293_v3 = vld [vmem:[%s5011_s18 + $0x90] sm:$0xff] }
  0x86   : > { %1341 = vmatmul.mubr.bf16.gmra.mxu1 %v578_v4  ;;  %1187 = vmatprep.mubr.bf16.mxu0 %v584_v5  ;;  %v300_v4 = vld [vmem:[%s5011_s18 + $0xc8] sm:$0xff] }
  0x87   : > { %1348 = vmatprep.mubr.bf16.mxu1 %v586_v6  ;;  %v308_v5 = vld [vmem:[%s5011_s18 + $0x108] sm:$0xff]  ;;  %v315_v6 = vld [vmem:[%s5011_s18 + $0x140] sm:$0xff]  ;;  %v510_v11 = vpack.c.bf16 %v300_v4, %v293_v3  ;;  %v582_v3 = vpack.c.bf16 %v442_v60, %v435_v59  ;;  %v589_v4 = vpack.c.bf16 %v456_v62, %v449_v61 }
  0x88   : > { %v518_v12 = vpack.c.bf16 %v315_v6, %v308_v5  ;;  %v363_v5 = vld [vmem:[%s5011_s18 + $0x2c0] sm:$0xff]  ;;  %v370_v6 = vld [vmem:[%s5011_s18 + $0x2f8] sm:$0xff] }
  0x89   : > { %v4841_v59 = vld [vmem:[%s6243_s3 + $0x44] ss:$28 sps:$4 sm:$0xff]  }
  0x8d   : > { %1188 = vmatmul.mubr.bf16.gmra.mxu0 %v583_v15  ;;  %v307_v15 = vld [vmem:[%s5011_s18 + $0x100] sm:$0xff] }
  0x8e   : > { %1349 = vmatmul.mubr.bf16.gmra.mxu1 %v585_v16  ;;  %1195 = vmatprep.mubr.bf16.mxu0 %v591_v17  ;;  %v314_v16 = vld [vmem:[%s5011_s18 + $0x138] sm:$0xff] }
  0x8f   : > { %1356 = vmatprep.mubr.bf16.mxu1 %v593_v18  ;;  %v322_v17 = vld [vmem:[%s5011_s18 + $0x178] sm:$0xff]  ;;  %v329_v18 = vld [vmem:[%s5011_s18 + $0x1b0] sm:$0xff]  ;;  %v517_v23 = vpack.c.bf16 %v314_v16, %v307_v15  ;;  %v596_v15 = vpack.c.bf16 %v470_v10, %v463_v9 }
  0x90   : > { %v525_v24 = vpack.c.bf16 %v329_v18, %v322_v17  ;;  %v377_v17 = vld [vmem:[%s5011_s18 + $0x330] sm:$0xff]  ;;  %v384_v18 = vld [vmem:[%s5011_s18 + $0x368] sm:$0xff] }
  0x95   : > { %1196 = vmatmul.mubr.bf16.gmra.mxu0 %v590_v27  ;;  %v321_v27 = vld [vmem:[%s5011_s18 + $0x170] sm:$0xff] }
  0x96   : > { %1357 = vmatmul.mubr.bf16.gmra.mxu1 %v592_v28  ;;  %1203 = vmatprep.mubr.bf16.mxu0 %v598_v29  ;;  %v328_v28 = vld [vmem:[%s5011_s18 + $0x1a8] sm:$0xff] }
  0x97   : > { %1364 = vmatprep.mubr.bf16.mxu1 %v600_v30  ;;  %v336_v29 = vld [vmem:[%s5011_s18 + $0x1e8] sm:$0xff]  ;;  %v343_v30 = vld [vmem:[%s5011_s18 + $0x220] sm:$0xff]  ;;  %v524_v38 = vpack.c.bf16 %v328_v28, %v321_v27  ;;  %v4835_v27 = vld [vmem:[%s6243_s3 + $0x7c] ss:$28 sps:$4 sm:$0xff]   ;;  %v560_v28 = vpack.c.bf16 %v399_v20, %v392_v19 }
  0x9d   : > { %1204 = vmatmul.mubr.bf16.gmra.mxu0 %v597_v39  ;;  %v4826_v39 = vld [vmem:[%s6243_s3 + $0xb4] ss:$28 sps:$4 sm:$0xff]  }
  0x9e   : > { %1365 = vmatmul.mubr.bf16.gmra.mxu1 %v599_v40  ;;  %1211 = vmatprep.mubr.bf16.mxu0 %v605_v41  ;;  %v532_v40 = vpack.c.bf16 %v343_v30, %v336_v29  ;;  %v554_v41 = vpack.c.bf16 %v386_v32, %v379_v31  ;;  %v610_v29 = vpack.c.bf16 %v498_v22, %v491_v21  ;;  %v391_v30 = vld [vmem:[%s5011_s18 + $0x3a0] sm:$0xff]  ;;  %v398_v31 = vld [vmem:[%s5011_s18 + $0x3d8] sm:$0xff] }
  0x9f   : > { %1372 = vmatprep.mubr.bf16.mxu1 %v607_v42  ;;  %v561_v42 = vpack.c.bf16 %v400_v34, %v393_v33  ;;  %2359 = vmatprep.subr.bf16.mxu0 %v4826_v39  ;;  %v406_v32 = vld [vmem:[%s5011_s18 + $0x418] sm:$0xff]  ;;  %v413_v33 = vld [vmem:[%s5011_s18 + $0x450] sm:$0xff]  ;;  %v559_v34 = vpack.c.bf16 %v398_v31, %v391_v30  ;;  %v412_v39 = vld [vmem:[%s5011_s18 + $0x448] sm:$0xff] }
  0xa5   : > { %1212 = vmatmul.mubr.bf16.gmra.mxu0 %v604_v51  ;;  %v531_v51 = vpack.c.bf16 %v342_v44, %v335_v43  ;;  %v427_v43 = vld [vmem:[%s5011_s18 + $0x4c0] sm:$0xff] }
  0xa6   : > { %1373 = vmatmul.mubr.bf16.gmra.mxu1 %v606_v52  ;;  %1413 = vmatprep.mubr.bf16.mxu0 %v504_v53  ;;  %v539_v52 = vpack.c.bf16 %v357_v46, %v350_v45  ;;  %v568_v53 = vpack.c.bf16 %v414_v48, %v407_v47  ;;  %v4836_v46 = vld [vmem:[%s6243_s3] ss:$28 sps:$4 sm:$0xff]  }
  0xa7   : > { %4689 = vmatprep.mubr.msk.bf16.mxu1 %vm1010_vm0, %v505_v54  ;;  %v575_v54 = vpack.c.bf16 %v428_v50, %v421_v49  ;;  %v4838_v47 = vld [vmem:[%s6243_s3 + $0x4] ss:$28 sps:$4 sm:$0xff]  }
  0xad   : > { %1414 = vmatmul.mubr.bf16.vlgmr.msra.gmra.mxu0 %v503_v63  ;;  %v4827_v63 = vld [vmem:[%s6243_s3 + $0x70] ss:$28 sps:$4 sm:$0xff]  }
  0xae   : > { %4690 = vmatmul.mubr.msk.bf16.vlgmr.msra.gmra.mxu1 %vm1010_vm0, %v512_v0  ;;  %1421 = vmatprep.mubr.bf16.mxu0 %v511_v1  ;;  %v4829_v0 = vld [vmem:[%s6243_s3 + $0x74] ss:$28 sps:$4 sm:$0xff]   ;;  %v538_v1 = vpack.c.bf16 %v356_v56, %v349_v55 }
  0xaf   : > { %4693 = vmatprep.mubr.msk.bf16.mxu1 %vm1010_vm0, %v519_v2  ;;  %2167 = vmatpush1.bf16.msra.mxu1 %v4821_v35  ;;  %v546_v2 = vpack.c.bf16 %v371_v58, %v364_v57  ;;  %v567_v35 = vpack.c.bf16 %v413_v33, %v406_v32 }
  0xb0   : > { %2360 = vmatpush1.bf16.msra.mxu0 %v4824_v37  ;;  %2168 = vmatprep.subr.bf16.mxu1 %v4829_v0  ;;  %v426_v0 = vld [vmem:[%s5011_s18 + $0x4b8] sm:$0xff] }
  0xb1   : > { %2361 = vmatprep.subr.bf16.mxu0 %v4835_v27 }
  0xb3   : > { %2169 = vmatpush1.bf16.msra.mxu1 %v4827_v63  ;;  %v419_v63 = vld [vmem:[%s5011_s18 + $0x480] sm:$0xff] }
  0xb4   : > { %v573_v10 = vpack.c.bf16 %v426_v0, %v419_v63 }
  0xb5   : > { %1422 = vmatmul.mubr.bf16.gmra.mxu0 %v510_v11  ;;  %v477_v11 = vld [vmem:[%s5011_s18 + $0x650] sm:$0xff] }
  0xb6   : > { %1429 = vmatprep.mubr.bf16.mxu0 %v518_v12  ;;  %4694 = vmatmul.mubr.msk.bf16.gmra.mxu1 %vm1010_vm0, %v526_v13  ;;  %v484_v12 = vld [vmem:[%s5011_s18 + $0x688] sm:$0xff]  ;;  %v545_v13 = vpack.c.bf16 %v370_v6, %v363_v5 }
  0xb7   : > { %4697 = vmatprep.mubr.msk.bf16.mxu1 %vm1010_vm0, %v533_v14  ;;  %v553_v14 = vpack.c.bf16 %v385_v8, %v378_v7  ;;  %v603_v16 = vpack.c.bf16 %v484_v12, %v477_v11  ;;  %v4844_v11 = vld [vmem:[%s6243_s3 + $0xc] ss:$28 sps:$4 sm:$0xff]  }
  0xbd   : > { %1430 = vmatmul.mubr.bf16.gmra.mxu0 %v517_v23  ;;  %v4830_v23 = vld [vmem:[%s6243_s3 + $0x38] ss:$28 sps:$4 sm:$0xff]  }
  0xbe   : > { %1437 = vmatprep.mubr.bf16.mxu0 %v525_v24  ;;  %4698 = vmatmul.mubr.msk.bf16.gmra.mxu1 %vm1010_vm0, %v540_v25  ;;  %v4832_v24 = vld [vmem:[%s6243_s3 + $0x3c] ss:$28 sps:$4 sm:$0xff]  }
  0xbf   : > { %4701 = vmatprep.mubr.msk.bf16.mxu1 %vm1010_vm0, %v547_v26  ;;  %v4833_v25 = vld [vmem:[%s6243_s3 + $0x78] ss:$28 sps:$4 sm:$0xff]   ;;  %v552_v26 = vpack.c.bf16 %v384_v18, %v377_v17  ;;  %2170 = vmatprep.subr.bf16.mxu1 %v4832_v24 }
  0xc0   : > { %2171 = vmatpush1.bf16.msra.mxu1 %v4830_v23  ;;  %2362 = vmatpush1.bf16.msra.mxu0 %v4833_v25  ;;  %v433_v24 = vld [vmem:[%s5011_s18 + $0x4f0] sm:$0xff]  ;;  %v440_v25 = vld [vmem:[%s5011_s18 + $0x528] sm:$0xff] }
  0xc1   : > { %2172 = vmatprep.subr.bf16.mxu1 %v4838_v47  ;;  %2363 = vmatprep.subr.bf16.mxu0 %v4841_v59 }
  0xc4   : > { %2173 = vmatpush1.bf16.msra.mxu1 %v4836_v46 }
  0xc5   : > { %1438 = vmatmul.mubr.bf16.gmra.mxu0 %v524_v38  ;;  %v405_v38 = vld [vmem:[%s5011_s18 + $0x410] sm:$0xff] }
  0xc6   : > { %1445 = vmatprep.mubr.bf16.mxu0 %v532_v40  ;;  %4702 = vmatmul.mubr.msk.bf16.gmra.mxu1 %vm1010_vm0, %v554_v41  ;;  %v5319_v40 = vld [vmem:[%s6242_s2] ss:$0 sm:$0xff]  ;;  %v566_v50 = vpack.c.bf16 %v412_v39, %v405_v38 }
  0xc7   : > { %4705 = vmatprep.mubr.msk.bf16.mxu1 %vm1010_vm0, %v561_v42  ;;  %v420_v42 = vld [vmem:[%s5011_s18 + $0x488] sm:$0xff] }
  0xcd   : > { %1446 = vmatmul.mubr.bf16.gmra.mxu0 %v531_v51 }
  0xce   : > { %1453 = vmatprep.mubr.bf16.mxu0 %v539_v52  ;;  %4706 = vmatmul.mubr.msk.bf16.gmra.mxu1 %vm1010_vm0, %v568_v53  ;;  %v574_v53 = vpack.c.bf16 %v427_v43, %v420_v42 }
  0xcf   : > { %4709 = vmatprep.mubr.msk.bf16.mxu1 %vm1010_vm0, %v575_v54 }
  0xd5   : > { %1454 = vmatmul.mubr.bf16.gmra.mxu0 %v538_v1  ;;  %v4839_v1 = vld [vmem:[%s6243_s3 + $0x40] ss:$28 sps:$4 sm:$0xff]  }
  0xd6   : > { %1461 = vmatprep.mubr.bf16.mxu0 %v546_v2  ;;  %4710 = vmatmul.mubr.msk.bf16.gmra.mxu1 %vm1010_vm0, %v582_v3  ;;  %v434_v3 = vld [vmem:[%s5011_s18 + $0x4f8] sm:$0xff] }
  0xd7   : > { %4713 = vmatprep.mubr.msk.bf16.mxu1 %vm1010_vm0, %v589_v4  ;;  %v441_v4 = vld [vmem:[%s5011_s18 + $0x530] sm:$0xff]  ;;  %2364 = vmatpush1.bf16.msra.mxu0 %v4839_v1 }
  0xd8   : > { %2365 = vmatprep.subr.bf16.mxu0 %v4844_v11 }
  0xdd   : > { %1462 = vmatmul.mubr.bf16.gmra.mxu0 %v545_v13 }
  0xde   : > { %1469 = vmatprep.mubr.bf16.mxu0 %v553_v14  ;;  %4714 = vmatmul.mubr.msk.bf16.gmra.mxu1 %vm1010_vm0, %v596_v15  ;;  %v581_v14 = vpack.c.bf16 %v441_v4, %v434_v3  ;;  %v4842_v15 = vld [vmem:[%s6243_s3 + $0x8] ss:$28 sps:$4 sm:$0xff]  }
  0xdf   : > { %4717 = vmatprep.mubr.msk.bf16.mxu1 %vm1010_vm0, %v603_v16  ;;  %2366 = vmatpush1.bf16.msra.mxu0 %v4842_v15 }
  0xe5   : > { %1470 = vmatmul.mubr.bf16.gmra.mxu0 %v552_v26  ;;  %v4869_v26 = vmov 0  }
  0xe6   : > { %1477 = vmatprep.mubr.bf16.mxu0 %v560_v28  ;;  %4718 = vmatmul.mubr.msk.bf16.gmra.mxu1 %vm1010_vm0, %v610_v29  ;;  %v448_v28 = vld [vmem:[%s5011_s18 + $0x568] sm:$0xff]  ;;  %v455_v29 = vld [vmem:[%s5011_s18 + $0x5a0] sm:$0xff] }
  0xe7   : > { %2190 = vmatprep.mubr.bf16.mxu1 %v4869_v26  ;;  %v588_v38 = vpack.c.bf16 %v455_v29, %v448_v28 }
  0xed   : > { %v4330_v36 = vpop.f32.mrf.mxu0  ;;  %1478 = vmatmul.mubr.bf16.gmra.mxu0 %v559_v34 }
  0xee   : > { %v4442_v37 = vpop.f32.mrf.mxu1  ;;  %1485 = vmatprep.mubr.bf16.mxu0 %v567_v35  ;;  %v580_v35 = vpack.c.bf16 %v440_v25, %v433_v24 }
  0xef   : > { %v4331_v41 = vpop.f32.mrf.mxu0 }
  0xf0   : > { %v4332_v44 = vadd.f32 %v4331_v41, %v4330_v36  ;;  %v4443_v45 = vpop.f32.mrf.mxu1 }
  0xf1   : > { %v4444_v48 = vadd.f32 %v4443_v45, %v4442_v37  ;;  %v4333_v49 = vpop.f32.mrf.mxu0 }
  0xf2   : > { %v1094_v51 = vadd.f32 %v4332_v44, %v5319_v40  ;;  %v4445_v52 = vpop.f32.mrf.mxu1 }
  0xf3   : > { %v4334_v54 = vpop.f32.mrf.mxu0 }
  0xf4   : > { %v5330_v55 = vadd.f32 %v4444_v48, %v1094_v51  ;;  %v4335_v56 = vadd.f32 %v4334_v54, %v4333_v49  ;;  %v4446_v57 = vpop.f32.mrf.mxu1  ;;  %v447_v48 = vld [vmem:[%s5011_s18 + $0x560] sm:$0xff]  ;;  %v454_v49 = vld [vmem:[%s5011_s18 + $0x598] sm:$0xff] }
  0xf5   : > { %v4336_v58 = vpop.f32.mrf.mxu0  ;;  %1486 = vmatmul.mubr.bf16.gmra.mxu0 %v566_v50  ;;  %v4447_v61 = vadd.f32 %v4446_v57, %v4445_v52  ;;  %v4847_v50 = vld [vmem:[%s6243_s3 + $0xbc] ss:$28 sps:$4 sm:$0xff]  }
  0xf6   : > { %v1097_v60 = vadd.f32 %v4335_v56, %v5319_v40  ;;  %v4448_v62 = vpop.f32.mrf.mxu1  ;;  %1493 = vmatprep.mubr.bf16.mxu0 %v574_v53  ;;  %v462_v52 = vld [vmem:[%s5011_s18 + $0x5d8] sm:$0xff]  ;;  %v469_v53 = vld [vmem:[%s5011_s18 + $0x610] sm:$0xff]  ;;  %2552 = vmatprep.subr.bf16.mxu1 %v4847_v50 }
  0xf7   : > { %v4337_v2 = vpop.f32.mrf.mxu0  ;;  %v595_v63 = vpack.c.bf16 %v469_v53, %v462_v52 }
  0xf8   : > { %v5343_v5 = vadd.f32 %v4447_v61, %v1097_v60  ;;  %v4338_v6 = vadd.f32 %v4337_v2, %v4336_v58  ;;  %v4449_v7 = vpop.f32.mrf.mxu1  ;;  %v587_v60 = vpack.c.bf16 %v454_v49, %v447_v48 }
  0xf9   : > { %v4450_v8 = vadd.f32 %v4449_v7, %v4448_v62  ;;  %v4339_v9 = vpop.f32.mrf.mxu0 }
  0xfa   : > { %v1102_v12 = vadd.f32 %v4338_v6, %v5319_v40  ;;  %v4451_v13 = vpop.f32.mrf.mxu1 }
  0xfb   : > { %v4340_v16 = vpop.f32.mrf.mxu0 }
  0xfc   : > { %v5352_v17 = vadd.f32 %v4450_v8, %v1102_v12  ;;  %v4341_v18 = vadd.f32 %v4340_v16, %v4339_v9  ;;  %v4452_v19 = vpop.f32.mrf.mxu1  ;;  %v461_v9 = vld [vmem:[%s5011_s18 + $0x5d0] sm:$0xff]  ;;  %v476_v12 = vld [vmem:[%s5011_s18 + $0x648] sm:$0xff] }
  0xfd   : > { %v4342_v20 = vpop.f32.mrf.mxu0  ;;  %1494 = vmatmul.mubr.bf16.gmra.mxu0 %v573_v10  ;;  %v4453_v22 = vadd.f32 %v4452_v19, %v4451_v13  ;;  %v468_v10 = vld [vmem:[%s5011_s18 + $0x608] sm:$0xff]  ;;  %v483_v13 = vld [vmem:[%s5011_s18 + $0x680] sm:$0xff] }
  0xfe   : > { %v1105_v21 = vadd.f32 %v4341_v18, %v5319_v40  ;;  %v4454_v23 = vpop.f32.mrf.mxu1  ;;  %1501 = vmatprep.mubr.bf16.mxu0 %v581_v14 }
  0xff   : > { %v4343_v27 = vpop.f32.mrf.mxu0 }
 0x100   : > { %v5360_v30 = vadd.f32 %v4453_v22, %v1105_v21  ;;  %v4344_v31 = vadd.f32 %v4343_v27, %v4342_v20  ;;  %v4455_v32 = vpop.f32.mrf.mxu1  ;;  %v594_v20 = vpack.c.bf16 %v468_v10, %v461_v9 }
 0x101   : > { %v4456_v33 = vadd.f32 %v4455_v32, %v4454_v23  ;;  %v4345_v34 = vpop.f32.mrf.mxu0  ;;  %v602_v23 = vpack.c.bf16 %v483_v13, %v476_v12 }
 0x102   : > { %v1110_v36 = vadd.f32 %v4344_v31, %v5319_v40  ;;  %v4457_v37 = vpop.f32.mrf.mxu1 }
 0x103   : > { %v4346_v39 = vpop.f32.mrf.mxu0 }
 0x104   : > { %v5363_v41 = vadd.f32 %v4456_v33, %v1110_v36  ;;  %v4347_v42 = vadd.f32 %v4346_v39, %v4345_v34  ;;  %v4458_v43 = vpop.f32.mrf.mxu1  ;;  %v475_v34 = vld [vmem:[%s5011_s18 + $0x640] sm:$0xff] }
 0x105   : > { %v4348_v44 = vpop.f32.mrf.mxu0  ;;  %1502 = vmatmul.mubr.bf16.gmra.mxu0 %v580_v35  ;;  %v4459_v46 = vadd.f32 %v4458_v43, %v4457_v37  ;;  %v482_v35 = vld [vmem:[%s5011_s18 + $0x678] sm:$0xff] }
 0x106   : > { %v1113_v45 = vadd.f32 %v4347_v42, %v5319_v40  ;;  %v4460_v47 = vpop.f32.mrf.mxu1  ;;  %1509 = vmatprep.mubr.bf16.mxu0 %v588_v38  ;;  %v490_v37 = vld [vmem:[%s5011_s18 + $0x6b8] sm:$0xff]  ;;  %v497_v38 = vld [vmem:[%s5011_s18 + $0x6f0] sm:$0xff] }
 0x107   : > { %v4349_v51 = vpop.f32.mrf.mxu0  ;;  %v609_v49 = vpack.c.bf16 %v497_v38, %v490_v37 }
 0x108   : > { %v5373_v54 = vadd.f32 %v4459_v46, %v1113_v45  ;;  %v4350_v56 = vadd.f32 %v4349_v51, %v4348_v44  ;;  %v4461_v57 = vpop.f32.mrf.mxu1  ;;  %v601_v46 = vpack.c.bf16 %v482_v35, %v475_v34 }
 0x109   : > { %v4462_v58 = vadd.f32 %v4461_v57, %v4460_v47  ;;  %v4351_v59 = vpop.f32.mrf.mxu0 }
 0x10a   : > { %v1118_v61 = vadd.f32 %v4350_v56, %v5319_v40  ;;  %v4463_v62 = vpop.f32.mrf.mxu1 }
 0x10b   : > { %v4352_v0 = vpop.f32.mrf.mxu0 }
 0x10c   : > { %v5376_v1 = vadd.f32 %v4462_v58, %v1118_v61  ;;  %v4353_v2 = vadd.f32 %v4352_v0, %v4351_v59  ;;  %v4464_v3 = vpop.f32.mrf.mxu1  ;;  %v496_v61 = vld [vmem:[%s5011_s18 + $0x6e8] sm:$0xff] }
 0x10d   : > { %v4354_v4 = vpop.f32.mrf.mxu0  ;;  %1510 = vmatmul.mubr.bf16.gmra.mxu0 %v587_v60  ;;  %v4465_v7 = vadd.f32 %v4464_v3, %v4463_v62  ;;  %v489_v60 = vld [vmem:[%s5011_s18 + $0x6b0] sm:$0xff] }
 0x10e   : > { %v1121_v6 = vadd.f32 %v4353_v2, %v5319_v40  ;;  %v4466_v8 = vpop.f32.mrf.mxu1  ;;  %1517 = vmatprep.mubr.bf16.mxu0 %v595_v63 }
 0x10f   : > { %v4355_v11 = vpop.f32.mrf.mxu0 }
 0x110   : > { %v5383_v14 = vadd.f32 %v4465_v7, %v1121_v6  ;;  %v4356_v15 = vadd.f32 %v4355_v11, %v4354_v4  ;;  %v4467_v16 = vpop.f32.mrf.mxu1  ;;  %v608_v6 = vpack.c.bf16 %v496_v61, %v489_v60 }
 0x111   : > { %v4468_v18 = vadd.f32 %v4467_v16, %v4466_v8  ;;  %v4357_v19 = vpop.f32.mrf.mxu0 }
 0x112   : > { %v1126_v21 = vadd.f32 %v4356_v15, %v5319_v40  ;;  %v4469_v22 = vpop.f32.mrf.mxu1 }
 0x113   : > { %v4358_v24 = vpop.f32.mrf.mxu0 }
 0x114   : > { %v5386_v25 = vadd.f32 %v4468_v18, %v1126_v21  ;;  %v4359_v27 = vadd.f32 %v4358_v24, %v4357_v19  ;;  %v4470_v28 = vpop.f32.mrf.mxu1 }
 0x115   : > { %v4360_v29 = vpop.f32.mrf.mxu0  ;;  %1518 = vmatmul.mubr.bf16.gmra.mxu0 %v594_v20  ;;  %v4471_v32 = vadd.f32 %v4470_v28, %v4469_v22 }
 0x116   : > { %v1129_v31 = vadd.f32 %v4359_v27, %v5319_v40  ;;  %v4472_v33 = vpop.f32.mrf.mxu1  ;;  %1525 = vmatprep.mubr.bf16.mxu0 %v602_v23 }
 0x117   : > { %v4361_v36 = vpop.f32.mrf.mxu0 }
 0x118   : > { %v5393_v39 = vadd.f32 %v4471_v32, %v1129_v31  ;;  %v4362_v42 = vadd.f32 %v4361_v36, %v4360_v29  ;;  %v4473_v43 = vpop.f32.mrf.mxu1 }
 0x119   : > { %v4474_v44 = vadd.f32 %v4473_v43, %v4472_v33  ;;  %v4363_v45 = vpop.f32.mrf.mxu0 }
 0x11a   : > { %v1134_v47 = vadd.f32 %v4362_v42, %v5319_v40  ;;  %v4475_v48 = vpop.f32.mrf.mxu1 }
 0x11b   : > { %v4364_v50 = vpop.f32.mrf.mxu0 }
 0x11c   : > { %v5396_v51 = vadd.f32 %v4474_v44, %v1134_v47  ;;  %v4365_v52 = vadd.f32 %v4364_v50, %v4363_v45  ;;  %v4476_v53 = vpop.f32.mrf.mxu1 }
 0x11d   : > { %v4366_v56 = vpop.f32.mrf.mxu0  ;;  %1526 = vmatmul.mubr.bf16.gmra.mxu0 %v601_v46  ;;  %v4477_v58 = vadd.f32 %v4476_v53, %v4475_v48 }
 0x11e   : > { %v1137_v57 = vadd.f32 %v4365_v52, %v5319_v40  ;;  %v4478_v59 = vpop.f32.mrf.mxu1  ;;  %1533 = vmatprep.mubr.bf16.mxu0 %v609_v49 }
 0x11f   : > { %v4367_v62 = vpop.f32.mrf.mxu0 }
 0x120   : > { %v5401_v63 = vadd.f32 %v4477_v58, %v1137_v57  ;;  %v4368_v0 = vadd.f32 %v4367_v62, %v4366_v56  ;;  %v4479_v2 = vpop.f32.mrf.mxu1 }
 0x121   : > { %v4480_v3 = vadd.f32 %v4479_v2, %v4478_v59  ;;  %v4369_v4 = vpop.f32.mrf.mxu0 }
 0x122   : > { %v1142_v7 = vadd.f32 %v4368_v0, %v5319_v40  ;;  %v4481_v8 = vpop.f32.mrf.mxu1 }
 0x123   : > { %v4370_v9 = vpop.f32.mrf.mxu0 }
 0x124   : > { %v5404_v10 = vadd.f32 %v4480_v3, %v1142_v7  ;;  %v4371_v11 = vadd.f32 %v4370_v9, %v4369_v4  ;;  %v4482_v12 = vpop.f32.mrf.mxu1 }
 0x125   : > { %v4372_v13 = vpop.f32.mrf.mxu0  ;;  %1534 = vmatmul.mubr.bf16.gmra.mxu0 %v608_v6  ;;  %v4483_v16 = vadd.f32 %v4482_v12, %v4481_v8 }
 0x126   : > { %v1145_v15 = vadd.f32 %v4371_v11, %v5319_v40  ;;  %v4484_v18 = vpop.f32.mrf.mxu1  ;;  %2383 = vmatprep.mubr.bf16.mxu0 %v4869_v26 }
 0x127   : > { %v4373_v19 = vpop.f32.mrf.mxu0 }
 0x128   : > { %v5408_v20 = vadd.f32 %v4483_v16, %v1145_v15  ;;  %v4374_v21 = vadd.f32 %v4373_v19, %v4372_v13  ;;  %v4485_v22 = vpop.f32.mrf.mxu1 }
 0x129   : > { %v4486_v23 = vadd.f32 %v4485_v22, %v4484_v18  ;;  %v4375_v24 = vpop.f32.mrf.mxu0 }
 0x12a   : > { %v1150_v27 = vadd.f32 %v4374_v21, %v5319_v40  ;;  %v4487_v28 = vpop.f32.mrf.mxu1 }
 0x12b   : > { %v4376_v29 = vpop.f32.mrf.mxu0 }
 0x12c   : > { %v5411_v31 = vadd.f32 %v4486_v23, %v1150_v27  ;;  %v4377_v32 = vadd.f32 %v4376_v29, %v4375_v24  ;;  %v4488_v33 = vpop.f32.mrf.mxu1 }
 0x12d   : > { %v4378_v34 = vpop.f32.mrf.mxu0  ;;  %v4489_v36 = vadd.f32 %v4488_v33, %v4487_v28 }
 0x12e   : > { %v1153_v35 = vadd.f32 %v4377_v32, %v5319_v40  ;;  %v4490_v37 = vpop.f32.mrf.mxu1 }
 0x12f   : > { %v4379_v38 = vpop.f32.mrf.mxu0 }
 0x130   : > { %v5414_v42 = vadd.f32 %v4489_v36, %v1153_v35  ;;  %v4380_v43 = vadd.f32 %v4379_v38, %v4378_v34  ;;  %v4491_v44 = vpop.f32.mrf.mxu1 }
 0x131   : > { %v4492_v45 = vadd.f32 %v4491_v44, %v4490_v37  ;;  %v4381_v46 = vpop.f32.mrf.mxu0 }
 0x132   : > { %v1158_v47 = vadd.f32 %v4380_v43, %v5319_v40  ;;  %v4493_v48 = vpop.f32.mrf.mxu1  ;;  %v5435_v43 = vld [vmem:[%s6243_s3 + $0xc0] ss:$28 sps:$4 sm:$0xff]  }
 0x133   : > { %v4382_v49 = vpop.f32.mrf.mxu0  ;;  %4721 = vmatprep.subr.bf16.mxu0 %v5435_v43 }
 0x134   : > { %v5417_v50 = vadd.f32 %v4492_v45, %v1158_v47  ;;  %v4383_v52 = vadd.f32 %v4382_v49, %v4381_v46  ;;  %v4494_v53 = vpop.f32.mrf.mxu1 }
 0x135   : > { %v4384_v56 = vpop.f32.mrf.mxu0  ;;  %v4495_v58 = vadd.f32 %v4494_v53, %v4493_v48 }
 0x136   : > { %v1161_v57 = vadd.f32 %v4383_v52, %v5319_v40  ;;  %v4496_v59 = vpop.f32.mrf.mxu1 }
 0x137   : > { %v4385_v60 = vpop.f32.mrf.mxu0 }
 0x138   : > { %v5420_v61 = vadd.f32 %v4495_v58, %v1161_v57  ;;  %v4386_v62 = vadd.f32 %v4385_v60, %v4384_v56  ;;  %v4497_v0 = vpop.f32.mrf.mxu1 }
 0x139   : > { %v4498_v2 = vadd.f32 %v4497_v0, %v4496_v59  ;;  %v4387_v3 = vpop.f32.mrf.mxu0 }
 0x13a   : > { %v1166_v4 = vadd.f32 %v4386_v62, %v5319_v40  ;;  %v4499_v6 = vpop.f32.mrf.mxu1 }
 0x13b   : > { %v4388_v7 = vpop.f32.mrf.mxu0 }
 0x13c   : > { %v5423_v8 = vadd.f32 %v4498_v2, %v1166_v4  ;;  %v4389_v9 = vadd.f32 %v4388_v7, %v4387_v3  ;;  %v4500_v11 = vpop.f32.mrf.mxu1 }
 0x13d   : > { %v4390_v12 = vpop.f32.mrf.mxu0  ;;  %v4501_v15 = vadd.f32 %v4500_v11, %v4499_v6 }
 0x13e   : > { %v1169_v13 = vadd.f32 %v4389_v9, %v5319_v40  ;;  %v4502_v16 = vpop.f32.mrf.mxu1 }
 0x13f   : > { %v4391_v18 = vpop.f32.mrf.mxu0 }
 0x140   : > { %v5426_v19 = vadd.f32 %v4501_v15, %v1169_v13  ;;  %v4392_v21 = vadd.f32 %v4391_v18, %v4390_v12  ;;  %v4503_v22 = vpop.f32.mrf.mxu1 }
 0x141   : > { %v4504_v23 = vadd.f32 %v4503_v22, %v4502_v16  ;;  %v4393_v24 = vpop.f32.mrf.mxu0 }
 0x142   : > { %v1174_v27 = vadd.f32 %v4392_v21, %v5319_v40  ;;  %v4505_v28 = vpop.f32.mrf.mxu1 }
 0x143   : > { %v4394_v29 = vpop.f32.mrf.mxu0 }
 0x144   : > { %v5429_v32 = vadd.f32 %v4504_v23, %v1174_v27  ;;  %v4395_v33 = vadd.f32 %v4394_v29, %v4393_v24  ;;  %v4506_v34 = vpop.f32.mrf.mxu1 }
 0x145   : > { %v4396_v35 = vpop.f32.mrf.mxu0  ;;  %v4507_v37 = vadd.f32 %v4506_v34, %v4505_v28 }
 0x146   : > { %v1177_v36 = vadd.f32 %v4395_v33, %v5319_v40  ;;  %v4508_v38 = vpop.f32.mrf.mxu1 }
 0x147   : > { %v4397_v44 = vpop.f32.mrf.mxu0 }
 0x148   : > { %v5437_v45 = vadd.f32 %v4507_v37, %v1177_v36  ;;  %v4398_v46 = vadd.f32 %v4397_v44, %v4396_v35  ;;  %v4509_v47 = vpop.f32.mrf.mxu1 }
 0x149   : > { %v4510_v48 = vadd.f32 %v4509_v47, %v4508_v38  ;;  %v4399_v49 = vpop.f32.mrf.mxu0 }
 0x14a   : > { %v1182_v52 = vadd.f32 %v4398_v46, %v5319_v40  ;;  %v4511_v53 = vpop.f32.mrf.mxu1 }
 0x14b   : > { %v4400_v56 = vpop.f32.mrf.mxu0 }
 0x14c   : > { %v5441_v57 = vadd.f32 %v4510_v48, %v1182_v52  ;;  %v4401_v58 = vadd.f32 %v4400_v56, %v4399_v49  ;;  %v4512_v59 = vpop.f32.mrf.mxu1 }
 0x14d   : > { %v4402_v60 = vpop.f32.mrf.mxu0  ;;  %v4513_v0 = vadd.f32 %v4512_v59, %v4511_v53 }
 0x14e   : > { %v1185_v62 = vadd.f32 %v4401_v58, %v5319_v40  ;;  %v4514_v2 = vpop.f32.mrf.mxu1 }
 0x14f   : > { %v4403_v3 = vpop.f32.mrf.mxu0 }
 0x150   : > { %v5444_v4 = vadd.f32 %v4513_v0, %v1185_v62  ;;  %v4404_v6 = vadd.f32 %v4403_v3, %v4402_v60  ;;  %v4515_v7 = vpop.f32.mrf.mxu1 }
 0x151   : > { %v4516_v9 = vadd.f32 %v4515_v7, %v4514_v2  ;;  %v4405_v11 = vpop.f32.mrf.mxu0 }
 0x152   : > { %v1190_v12 = vadd.f32 %v4404_v6, %v5319_v40  ;;  %v4517_v13 = vpop.f32.mrf.mxu1 }
 0x153   : > { %v4406_v15 = vpop.f32.mrf.mxu0 }
 0x154   : > { %v5447_v16 = vadd.f32 %v4516_v9, %v1190_v12  ;;  %v4407_v18 = vadd.f32 %v4406_v15, %v4405_v11  ;;  %v4518_v21 = vpop.f32.mrf.mxu1 }
 0x155   : > { %v4408_v22 = vpop.f32.mrf.mxu0  ;;  %v4519_v24 = vadd.f32 %v4518_v21, %v4517_v13 }
 0x156   : > { %v1193_v23 = vadd.f32 %v4407_v18, %v5319_v40  ;;  %v4520_v27 = vpop.f32.mrf.mxu1 }
 0x157   : > { %v4409_v28 = vpop.f32.mrf.mxu0 }
 0x158   : > { %v5450_v29 = vadd.f32 %v4519_v24, %v1193_v23  ;;  %v4410_v33 = vadd.f32 %v4409_v28, %v4408_v22  ;;  %v4521_v34 = vpop.f32.mrf.mxu1 }
 0x159   : > { %v4522_v35 = vadd.f32 %v4521_v34, %v4520_v27  ;;  %v4411_v36 = vpop.f32.mrf.mxu0 }
 0x15a   : > { %v1198_v37 = vadd.f32 %v4410_v33, %v5319_v40  ;;  %v4523_v38 = vpop.f32.mrf.mxu1 }
 0x15b   : > { %v4412_v44 = vpop.f32.mrf.mxu0 }
 0x15c   : > { %v5453_v46 = vadd.f32 %v4522_v35, %v1198_v37  ;;  %v4413_v47 = vadd.f32 %v4412_v44, %v4411_v36  ;;  %v4524_v48 = vpop.f32.mrf.mxu1 }
 0x15d   : > { %v4414_v49 = vpop.f32.mrf.mxu0  ;;  %v4525_v53 = vadd.f32 %v4524_v48, %v4523_v38 }
 0x15e   : > { %v1201_v52 = vadd.f32 %v4413_v47, %v5319_v40  ;;  %v4526_v56 = vpop.f32.mrf.mxu1 }
 0x15f   : > { %v4415_v58 = vpop.f32.mrf.mxu0 }
 0x160   : > { %v5456_v59 = vadd.f32 %v4525_v53, %v1201_v52  ;;  %v4416_v60 = vadd.f32 %v4415_v58, %v4414_v49  ;;  %v4527_v62 = vpop.f32.mrf.mxu1 }
 0x161   : > { %v4528_v0 = vadd.f32 %v4527_v62, %v4526_v56  ;;  %v4417_v2 = vpop.f32.mrf.mxu0 }
 0x162   : > { %v1206_v3 = vadd.f32 %v4416_v60, %v5319_v40  ;;  %v4529_v6 = vpop.f32.mrf.mxu1 }
 0x163   : > { %v4418_v7 = vpop.f32.mrf.mxu0 }
 0x164   : > { %v5459_v9 = vadd.f32 %v4528_v0, %v1206_v3  ;;  %v4419_v11 = vadd.f32 %v4418_v7, %v4417_v2  ;;  %v4530_v12 = vpop.f32.mrf.mxu1 }
 0x165   : > { %v4420_v13 = vpop.f32.mrf.mxu0  ;;  %v4531_v18 = vadd.f32 %v4530_v12, %v4529_v6 }
 0x166   : > { %v1209_v15 = vadd.f32 %v4419_v11, %v5319_v40  ;;  %v4532_v21 = vpop.f32.mrf.mxu1 }
 0x167   : > { %v4421_v22 = vpop.f32.mrf.mxu0 }
 0x168   : > { %v5462_v23 = vadd.f32 %v4531_v18, %v1209_v15  ;;  %v4422_v24 = vadd.f32 %v4421_v22, %v4420_v13  ;;  %v4533_v27 = vpop.f32.mrf.mxu1 }
 0x169   : > { %v4534_v28 = vadd.f32 %v4533_v27, %v4532_v21  ;;  %v4423_v33 = vpop.f32.mrf.mxu0 }
 0x16a   : > { %v1214_v34 = vadd.f32 %v4422_v24, %v5319_v40  ;;  %v4535_v35 = vpop.f32.mrf.mxu1 }
 0x16b   : > { %v4424_v36 = vpop.f32.mrf.mxu0 }
 0x16c   : > { %v5465_v37 = vadd.f32 %v4534_v28, %v1214_v34  ;;  %v4425_v38 = vadd.f32 %v4424_v36, %v4423_v33  ;;  %v4536_v44 = vpop.f32.mrf.mxu1  ;;  %v4845_v33 = vld [vmem:[%s6243_s3 + $0xb8] ss:$28 sps:$4 sm:$0xff]  }
 0x16d   : > { %v4554_v47 = vpop.f32.mrf.mxu0  ;;  %v4537_v49 = vadd.f32 %v4536_v44, %v4535_v35  ;;  %v4850_v44 = vld [vmem:[%s6243_s3 + $0x84] ss:$28 sps:$4 sm:$0xff]  }
 0x16e   : > { %v1217_v48 = vadd.f32 %v4425_v38, %v5319_v40  ;;  %v4691_v52 = vpop.f32.mrf.mxu1 }
 0x16f   : > { %v4555_v53 = vpop.f32.mrf.mxu0 }
 0x170   : > { %v5468_v56 = vadd.f32 %v4537_v49, %v1217_v48  ;;  %v4556_v58 = vadd.f32 %v4555_v53, %v4554_v47  ;;  %v1576_v60 = vpop.f32.mrf.mxu1  ;;  %v4858_v49 = vld [vmem:[%s6243_s3 + $0x88] ss:$28 sps:$4 sm:$0xff]  }
 0x171   : > { %v4557_v62 = vpop.f32.mrf.mxu0 }
 0x172   : > { %v1416_v0 = vadd.f32 %v4556_v58, %v5330_v55  ;;  %v4692_v2 = vpop.f32.mrf.mxu1 }
 0x173   : > { %v4558_v3 = vpop.f32.mrf.mxu0 }
 0x174   : > { %v1577_v6 = vadd.f32 %v1576_v60, %v1416_v0  ;;  %v4559_v7 = vadd.f32 %v4558_v3, %v4557_v62  ;;  %v1579_v40 = vpop.f32.mrf.mxu1  ;;  %v4853_v0 = vld [vmem:[%s6243_s3 + $0x4c] ss:$28 sps:$4 sm:$0xff]  }
 0x175   : > { %v4560_v11 = vpop.f32.mrf.mxu0 }
 0x176   : > { %v1703_v12 = vmax.f32 %v1577_v6, 0.0  ;;  %v1419_v13 = vadd.f32 %v4559_v7, %v5343_v5  ;;  %v5481_v28 = vpop.f32.mrf.mxu1 }
 0x177   : > { %v4561_v15 = vpop.f32.mrf.mxu0 }
 0x178   : > { %v4154_v18 = vpack.c.bf16 %v1703_v12, %v1703_v12  ;;  %v1580_v55 = vadd.f32 %v1579_v40, %v1419_v13  ;;  %v4562_v21 = vadd.f32 %v4561_v15, %v4560_v11 }
 0x179   : > { %v4563_v22 = vpop.f32.mrf.mxu0 }
 0x17a   : > { %1864 = vst.msk [vmem:[%s5476_s13] sm:$0xf] %vm1863_vm1, %v4154_v18  ;;  %v1704_v24 = vmax.f32 %v1580_v55, 0.0  ;;  %v1424_v27 = vadd.f32 %v4562_v21, %v5352_v17  ;;  %v4851_v18 = vld [vmem:[%s6243_s3 + $0x48] ss:$28 sps:$4 sm:$0xff]  }
 0x17b   : > { %v4564_v5 = vpop.f32.mrf.mxu0 }
 0x17c   : > { %v5486_v34 = vpack.c.bf16 %v1704_v24, %v1703_v12  ;;  %v4155_v35 = vpack.c.bf16 %v1704_v24, %v1704_v24  ;;  %v1585_v36 = vadd.f32 %v4691_v52, %v1424_v27  ;;  %v4565_v38 = vadd.f32 %v4564_v5, %v4563_v22  ;;  %v1592_v52 = vpop.f32.mrf.mxu1  ;;  %v4860_v24 = vld [vmem:[%s6243_s3 + $0x18] ss:$28 sps:$4 sm:$0xff]  }
 0x17d   : > { %v4566_v47 = vpop.f32.mrf.mxu0 }
 0x17e   : > { %1865 = vst.msk [vmem:[%s5476_s13 + $0x4] sm:$0xf] %vm1863_vm1, %v4155_v35  ;;  %v1705_v17 = vmax.f32 %v1585_v36, 0.0  ;;  %v1427_v48 = vadd.f32 %v4565_v38, %v5360_v30  ;;  %3960 = vmatmul.mubr.msk.bf16.vlgmr.msra.gmra.mxu1 %vm2109_vm2, %v5486_v34  ;;  %3976 = vmatmul.mubr.msk.bf16.vlgmr.msra.gmra.mxu0 %vm2109_vm2, %v5486_v34  ;;  %v4848_v30 = vld [vmem:[%s6243_s3 + $0x80] ss:$28 sps:$4 sm:$0xff]   ;;  %v4696_v11 = vpop.f32.mrf.mxu1 }
 0x17f   : > { %v4567_v53 = vpop.f32.mrf.mxu0  ;;  %2553 = vmatpush1.bf16.msra.mxu1 %v4845_v33  ;;  %2200 = vmatprep.mubr.bf16.mxu1 %v4869_v26  ;;  %v4855_v36 = vld [vmem:[%s6243_s3 + $0x10] ss:$28 sps:$4 sm:$0xff]  }
 0x180   : > { %v4156_v58 = vpack.c.bf16 %v1705_v17, %v1705_v17  ;;  %v1588_v60 = vadd.f32 %v4692_v2, %v1427_v48  ;;  %v4568_v62 = vadd.f32 %v4567_v53, %v4566_v47  ;;  %2393 = vmatprep.mubr.bf16.mxu0 %v4869_v26  ;;  %2554 = vmatprep.subr.bf16.mxu1 %v4850_v44  ;;  %v1595_v27 = vpop.f32.mrf.mxu1 }
 0x181   : > { %v4569_v3 = vpop.f32.mrf.mxu0  ;;  %4722 = vmatpush3.bf16.msra.mxu0 %v5435_v43  ;;  %v4859_v43 = vld [vmem:[%s6243_s3 + $0x50] ss:$28 sps:$4 sm:$0xff]  }
 0x182   : > { %1866 = vst.msk [vmem:[%s5476_s13 + $0x8] sm:$0xf] %vm1863_vm1, %v4156_v58  ;;  %v1706_v6 = vmax.f32 %v1588_v60, 0.0  ;;  %v1432_v7 = vadd.f32 %v4568_v62, %v5363_v41  ;;  %4723 = vmatprep.subr.bf16.mxu0 %v4858_v49  ;;  %v4857_v41 = vld [vmem:[%s6243_s3 + $0x14] ss:$28 sps:$4 sm:$0xff]   ;;  %v4699_v48 = vpop.f32.mrf.mxu1 }
 0x183   : > { %v4570_v2 = vpop.f32.mrf.mxu0  ;;  %2555 = vmatpush1.bf16.msra.mxu1 %v4848_v30 }
 0x184   : > { %v4157_v12 = vpack.c.bf16 %v1706_v6, %v1706_v6  ;;  %v1593_v13 = vadd.f32 %v1592_v52, %v1432_v7  ;;  %v4571_v40 = vadd.f32 %v4570_v2, %v4569_v3  ;;  %v5513_v15 = vpack.c.bf16 %v1706_v6, %v1705_v17  ;;  %2556 = vmatprep.subr.bf16.mxu1 %v4853_v0 }
 0x185   : > { %v4572_v55 = vpop.f32.mrf.mxu0  ;;  %4724 = vmatpush3.bf16.msra.mxu0 %v4858_v49 }
 0x186   : > { %1867 = vst.msk [vmem:[%s5476_s13 + $0xc] sm:$0xf] %vm1863_vm1, %v4157_v12  ;;  %v1707_v21 = vmax.f32 %v1593_v13, 0.0  ;;  %v1435_v22 = vadd.f32 %v4571_v40, %v5373_v54  ;;  %3961 = vmatmul.mubr.msk.bf16.gmra.mxu1 %vm2109_vm2, %v5513_v15  ;;  %3977 = vmatmul.mubr.msk.bf16.gmra.mxu0 %vm2109_vm2, %v5513_v15 }
 0x187   : > { %v4573_v5 = vpop.f32.mrf.mxu0  ;;  %2210 = vmatprep.mubr.bf16.mxu1 %v4869_v26  ;;  %2403 = vmatprep.mubr.bf16.mxu0 %v4869_v26 }
 0x188   : > { %v4158_v33 = vpack.c.bf16 %v1707_v21, %v1707_v21  ;;  %v1596_v35 = vadd.f32 %v1595_v27, %v1435_v22  ;;  %v4574_v54 = vadd.f32 %v4573_v5, %v4572_v55  ;;  %2557 = vmatpush1.bf16.msra.mxu1 %v4851_v18  ;;  %4725 = vmatprep.subr.bf16.mxu0 %v4859_v43 }
 0x189   : > { %v4575_v38 = vpop.f32.mrf.mxu0  ;;  %2558 = vmatprep.subr.bf16.mxu1 %v4857_v41  ;;  %4726 = vmatpush3.bf16.msra.mxu0 %v4859_v43 }
 0x18a   : > { %1868 = vst.msk [vmem:[%s5476_s13 + $0x10] sm:$0xf] %vm1863_vm1, %v4158_v33  ;;  %v1708_v44 = vmax.f32 %v1596_v35, 0.0  ;;  %v1440_v47 = vadd.f32 %v4574_v54, %v5376_v1  ;;  %4727 = vmatprep.subr.bf16.mxu0 %v4860_v24  ;;  %v1608_v1 = vpop.f32.mrf.mxu1 }
 0x18b   : > { %v4576_v17 = vpop.f32.mrf.mxu0 }
 0x18c   : > { %v4159_v49 = vpack.c.bf16 %v1708_v44, %v1708_v44  ;;  %v1601_v52 = vadd.f32 %v5481_v28, %v1440_v47  ;;  %v4577_v53 = vadd.f32 %v4576_v17, %v4575_v38  ;;  %v5543_v30 = vpack.c.bf16 %v1708_v44, %v1707_v21  ;;  %2559 = vmatpush1.bf16.msra.mxu1 %v4855_v36  ;;  %v4700_v12 = vpop.f32.mrf.mxu1 }
 0x18d   : > { %v4578_v58 = vpop.f32.mrf.mxu0  ;;  %4728 = vmatpush3.bf16.msra.mxu0 %v4860_v24 }
 0x18e   : > { %1869 = vst.msk [vmem:[%s5476_s13 + $0x14] sm:$0xf] %vm1863_vm1, %v4159_v49  ;;  %v1709_v60 = vmax.f32 %v1601_v52, 0.0  ;;  %v1443_v62 = vadd.f32 %v4577_v53, %v5383_v14  ;;  %3962 = vmatmul.mubr.msk.bf16.gmra.mxu1 %vm2109_vm2, %v5543_v30  ;;  %3978 = vmatmul.mubr.msk.bf16.gmra.mxu0 %vm2109_vm2, %v5543_v30 }
 0x18f   : > { %v4579_v28 = vpop.f32.mrf.mxu0  ;;  %2220 = vmatprep.mubr.bf16.mxu1 %v4869_v26  ;;  %2413 = vmatprep.mubr.bf16.mxu0 %v4869_v26 }
 0x190   : > { %v4160_v0 = vpack.c.bf16 %v1709_v60, %v1709_v60  ;;  %v1604_v3 = vadd.f32 %v4696_v11, %v1443_v62  ;;  %v4580_v6 = vadd.f32 %v4579_v28, %v4578_v58 }
 0x191   : > { %v4581_v7 = vpop.f32.mrf.mxu0 }
 0x192   : > { %1870 = vst.msk [vmem:[%s5476_s13 + $0x18] sm:$0xf] %vm1863_vm1, %v4160_v0  ;;  %v1710_v14 = vmax.f32 %v1604_v3, 0.0  ;;  %v1448_v2 = vadd.f32 %v4580_v6, %v5386_v25  ;;  %v1611_v25 = vpop.f32.mrf.mxu1 }
 0x193   : > { %v4582_v13 = vpop.f32.mrf.mxu0 }
 0x194   : > { %v4161_v40 = vpack.c.bf16 %v1710_v14, %v1710_v14  ;;  %v1609_v18 = vadd.f32 %v1608_v1, %v1448_v2  ;;  %v4583_v43 = vadd.f32 %v4582_v13, %v4581_v7  ;;  %v5557_v55 = vpack.c.bf16 %v1710_v14, %v1709_v60  ;;  %v4703_v36 = vpop.f32.mrf.mxu1 }
 0x195   : > { %v4584_v41 = vpop.f32.mrf.mxu0 }
 0x196   : > { %1871 = vst.msk [vmem:[%s5476_s13 + $0x1c] sm:$0xf] %vm1863_vm1, %v4161_v40  ;;  %v1711_v21 = vmax.f32 %v1609_v18, 0.0  ;;  %v1451_v11 = vadd.f32 %v4583_v43, %v5393_v39  ;;  %3963 = vmatmul.mubr.msk.bf16.gmra.mxu1 %vm2109_vm2, %v5557_v55  ;;  %3979 = vmatmul.mubr.msk.bf16.gmra.mxu0 %vm2109_vm2, %v5557_v55 }
 0x197   : > { %v4585_v22 = vpop.f32.mrf.mxu0  ;;  %2230 = vmatprep.mubr.bf16.mxu1 %v4869_v26  ;;  %2423 = vmatprep.mubr.bf16.mxu0 %v4869_v26 }
 0x198   : > { %v4162_v24 = vpack.c.bf16 %v1711_v21, %v1711_v21  ;;  %v1612_v27 = vadd.f32 %v1611_v25, %v1451_v11  ;;  %v4586_v5 = vadd.f32 %v4585_v22, %v4584_v41 }
 0x199   : > { %v4587_v33 = vpop.f32.mrf.mxu0 }
 0x19a   : > { %1872 = vst.msk [vmem:[%s5476_s13 + $0x20] sm:$0xf] %vm1863_vm1, %v4162_v24  ;;  %v1712_v39 = vmax.f32 %v1612_v27, 0.0  ;;  %v1456_v35 = vadd.f32 %v4586_v5, %v5396_v51  ;;  %v1624_v51 = vpop.f32.mrf.mxu1 }
 0x19b   : > { %v4588_v54 = vpop.f32.mrf.mxu0 }
 0x19c   : > { %v5571_v38 = vpack.c.bf16 %v1712_v39, %v1711_v21  ;;  %v4163_v44 = vpack.c.bf16 %v1712_v39, %v1712_v39  ;;  %v1617_v47 = vadd.f32 %v4699_v48, %v1456_v35  ;;  %v4589_v17 = vadd.f32 %v4588_v54, %v4587_v33  ;;  %v4704_v0 = vpop.f32.mrf.mxu1 }
 0x19d   : > { %v4590_v49 = vpop.f32.mrf.mxu0 }
 0x19e   : > { %1873 = vst.msk [vmem:[%s5476_s13 + $0x24] sm:$0xf] %vm1863_vm1, %v4163_v44  ;;  %v1713_v52 = vmax.f32 %v1617_v47, 0.0  ;;  %v1459_v53 = vadd.f32 %v4589_v17, %v5401_v63  ;;  %3964 = vmatmul.mubr.msk.bf16.gmra.mxu1 %vm2109_vm2, %v5571_v38  ;;  %3980 = vmatmul.mubr.msk.bf16.gmra.mxu0 %vm2109_vm2, %v5571_v38 }
 0x19f   : > { %v4591_v58 = vpop.f32.mrf.mxu0  ;;  %2240 = vmatprep.mubr.bf16.mxu1 %v4869_v26  ;;  %2433 = vmatprep.mubr.bf16.mxu0 %v4869_v26 }
 0x1a0   : > { %v4164_v48 = vpack.c.bf16 %v1713_v52, %v1713_v52  ;;  %v1620_v60 = vadd.f32 %v4700_v12, %v1459_v53  ;;  %v4592_v62 = vadd.f32 %v4591_v58, %v4590_v49 }
 0x1a1   : > { %v4593_v1 = vpop.f32.mrf.mxu0 }
 0x1a2   : > { %1874 = vst.msk [vmem:[%s5476_s13 + $0x28] sm:$0xf] %vm1863_vm1, %v4164_v48  ;;  %v1714_v63 = vmax.f32 %v1620_v60, 0.0  ;;  %v1464_v28 = vadd.f32 %v4592_v62, %v5404_v10  ;;  %v1627_v10 = vpop.f32.mrf.mxu1 }
 0x1a3   : > { %v4594_v3 = vpop.f32.mrf.mxu0 }
 0x1a4   : > { %v5585_v6 = vpack.c.bf16 %v1714_v63, %v1713_v52  ;;  %v4165_v7 = vpack.c.bf16 %v1714_v63, %v1714_v63  ;;  %v1625_v14 = vadd.f32 %v1624_v51, %v1464_v28  ;;  %v4595_v2 = vadd.f32 %v4594_v3, %v4593_v1  ;;  %v4707_v24 = vpop.f32.mrf.mxu1 }
 0x1a5   : > { %v4596_v13 = vpop.f32.mrf.mxu0 }
 0x1a6   : > { %1875 = vst.msk [vmem:[%s5476_s13 + $0x2c] sm:$0xf] %vm1863_vm1, %v4165_v7  ;;  %v1715_v40 = vmax.f32 %v1625_v14, 0.0  ;;  %v1467_v12 = vadd.f32 %v4595_v2, %v5408_v20  ;;  %3965 = vmatmul.mubr.msk.bf16.gmra.mxu1 %vm2109_vm2, %v5585_v6  ;;  %3981 = vmatmul.mubr.msk.bf16.gmra.mxu0 %vm2109_vm2, %v5585_v6 }
 0x1a7   : > { %v4597_v18 = vpop.f32.mrf.mxu0  ;;  %2250 = vmatprep.mubr.bf16.mxu1 %v4869_v26  ;;  %2443 = vmatprep.mubr.bf16.mxu0 %v4869_v26 }
 0x1a8   : > { %v4166_v43 = vpack.c.bf16 %v1715_v40, %v1715_v40  ;;  %v1628_v41 = vadd.f32 %v1627_v10, %v1467_v12  ;;  %v4598_v21 = vadd.f32 %v4597_v18, %v4596_v13 }
 0x1a9   : > { %v4599_v11 = vpop.f32.mrf.mxu0 }
 0x1aa   : > { %1876 = vst.msk [vmem:[%s5476_s13 + $0x30] sm:$0xf] %vm1863_vm1, %v4166_v43  ;;  %v1716_v20 = vmax.f32 %v1628_v41, 0.0  ;;  %v1472_v25 = vadd.f32 %v4598_v21, %v5411_v31  ;;  %v1640_v31 = vpop.f32.mrf.mxu1 }
 0x1ab   : > { %v4600_v22 = vpop.f32.mrf.mxu0 }
 0x1ac   : > { %v5599_v27 = vpack.c.bf16 %v1716_v20, %v1715_v40  ;;  %v4167_v5 = vpack.c.bf16 %v1716_v20, %v1716_v20  ;;  %v1633_v33 = vadd.f32 %v4703_v36, %v1472_v25  ;;  %v4601_v39 = vadd.f32 %v4600_v22, %v4599_v11  ;;  %v4708_v51 = vpop.f32.mrf.mxu1 }
 0x1ad   : > { %v4602_v35 = vpop.f32.mrf.mxu0 }
 0x1ae   : > { %1877 = vst.msk [vmem:[%s5476_s13 + $0x34] sm:$0xf] %vm1863_vm1, %v4167_v5  ;;  %v1717_v54 = vmax.f32 %v1633_v33, 0.0  ;;  %v1475_v44 = vadd.f32 %v4601_v39, %v5414_v42  ;;  %3966 = vmatmul.mubr.msk.bf16.gmra.mxu1 %vm2109_vm2, %v5599_v27  ;;  %3982 = vmatmul.mubr.msk.bf16.gmra.mxu0 %vm2109_vm2, %v5599_v27 }
 0x1af   : > { %v4603_v47 = vpop.f32.mrf.mxu0  ;;  %2260 = vmatprep.mubr.bf16.mxu1 %v4869_v26  ;;  %2453 = vmatprep.mubr.bf16.mxu0 %v4869_v26 }
 0x1b0   : > { %v4168_v36 = vpack.c.bf16 %v1717_v54, %v1717_v54  ;;  %v1636_v17 = vadd.f32 %v4704_v0, %v1475_v44  ;;  %v4604_v49 = vadd.f32 %v4603_v47, %v4602_v35 }
 0x1b1   : > { %v4605_v52 = vpop.f32.mrf.mxu0 }
 0x1b2   : > { %1878 = vst.msk [vmem:[%s5476_s13 + $0x38] sm:$0xf] %vm1863_vm1, %v4168_v36  ;;  %v1718_v42 = vmax.f32 %v1636_v17, 0.0  ;;  %v1480_v53 = vadd.f32 %v4604_v49, %v5417_v50  ;;  %v1643_v50 = vpop.f32.mrf.mxu1 }
 0x1b3   : > { %v4606_v58 = vpop.f32.mrf.mxu0 }
 0x1b4   : > { %v5613_v48 = vpack.c.bf16 %v1718_v42, %v1717_v54  ;;  %v4169_v60 = vpack.c.bf16 %v1718_v42, %v1718_v42  ;;  %v1641_v62 = vadd.f32 %v1640_v31, %v1480_v53  ;;  %v4607_v1 = vadd.f32 %v4606_v58, %v4605_v52  ;;  %v4711_v10 = vpop.f32.mrf.mxu1 }
 0x1b5   : > { %v4608_v63 = vpop.f32.mrf.mxu0 }
 0x1b6   : > { %1879 = vst.msk [vmem:[%s5476_s13 + $0x3c] sm:$0xf] %vm1863_vm1, %v4169_v60  ;;  %v1719_v28 = vmax.f32 %v1641_v62, 0.0  ;;  %v1483_v0 = vadd.f32 %v4607_v1, %v5420_v61  ;;  %3967 = vmatmul.mubr.msk.bf16.gmra.mxu1 %vm2109_vm2, %v5613_v48  ;;  %3983 = vmatmul.mubr.msk.bf16.gmra.mxu0 %vm2109_vm2, %v5613_v48 }
 0x1b7   : > { %v4609_v3 = vpop.f32.mrf.mxu0  ;;  %2270 = vmatprep.mubr.bf16.mxu1 %v4869_v26  ;;  %2463 = vmatprep.mubr.bf16.mxu0 %v4869_v26 }
 0x1b8   : > { %v4170_v7 = vpack.c.bf16 %v1719_v28, %v1719_v28  ;;  %v1644_v14 = vadd.f32 %v1643_v50, %v1483_v0  ;;  %v4610_v2 = vadd.f32 %v4609_v3, %v4608_v63 }
 0x1b9   : > { %v4611_v13 = vpop.f32.mrf.mxu0 }
 0x1ba   : > { %1880 = vst.msk [vmem:[%s5476_s13 + $0x40] sm:$0xf] %vm1863_vm1, %v4170_v7  ;;  %v1720_v61 = vmax.f32 %v1644_v14, 0.0  ;;  %v1488_v40 = vadd.f32 %v4610_v2, %v5423_v8  ;;  %v1656_v8 = vpop.f32.mrf.mxu1 }
 0x1bb   : > { %v4612_v12 = vpop.f32.mrf.mxu0 }
 0x1bc   : > { %v5627_v18 = vpack.c.bf16 %v1720_v61, %v1719_v28  ;;  %v4171_v43 = vpack.c.bf16 %v1720_v61, %v1720_v61  ;;  %v1649_v41 = vadd.f32 %v4707_v24, %v1488_v40  ;;  %v4613_v21 = vadd.f32 %v4612_v12, %v4611_v13  ;;  %v4712_v54 = vpop.f32.mrf.mxu1 }
 0x1bd   : > { %v4614_v11 = vpop.f32.mrf.mxu0 }
 0x1be   : > { %1881 = vst.msk [vmem:[%s5476_s13 + $0x44] sm:$0xf] %vm1863_vm1, %v4171_v43  ;;  %v1721_v20 = vmax.f32 %v1649_v41, 0.0  ;;  %v1491_v25 = vadd.f32 %v4613_v21, %v5426_v19  ;;  %3968 = vmatmul.mubr.msk.bf16.gmra.mxu1 %vm2109_vm2, %v5627_v18  ;;  %3984 = vmatmul.mubr.msk.bf16.gmra.mxu0 %vm2109_vm2, %v5627_v18 }
 0x1bf   : > { %v4615_v22 = vpop.f32.mrf.mxu0  ;;  %2280 = vmatprep.mubr.bf16.mxu1 %v4869_v26  ;;  %2473 = vmatprep.mubr.bf16.mxu0 %v4869_v26 }
 0x1c0   : > { %v4172_v24 = vpack.c.bf16 %v1721_v20, %v1721_v20  ;;  %v1652_v5 = vadd.f32 %v4708_v51, %v1491_v25  ;;  %v4616_v33 = vadd.f32 %v4615_v22, %v4614_v11 }
 0x1c1   : > { %v4617_v39 = vpop.f32.mrf.mxu0 }
 0x1c2   : > { %1882 = vst.msk [vmem:[%s5476_s13 + $0x48] sm:$0xf] %vm1863_vm1, %v4172_v24  ;;  %v1722_v19 = vmax.f32 %v1652_v5, 0.0  ;;  %v1496_v35 = vadd.f32 %v4616_v33, %v5429_v32  ;;  %v1659_v32 = vpop.f32.mrf.mxu1 }
 0x1c3   : > { %v4618_v44 = vpop.f32.mrf.mxu0 }
 0x1c4   : > { %v5641_v31 = vpack.c.bf16 %v1722_v19, %v1721_v20  ;;  %v4173_v47 = vpack.c.bf16 %v1722_v19, %v1722_v19  ;;  %v1657_v36 = vadd.f32 %v1656_v8, %v1496_v35  ;;  %v4619_v17 = vadd.f32 %v4618_v44, %v4617_v39  ;;  %v4715_v28 = vpop.f32.mrf.mxu1 }
 0x1c5   : > { %v4620_v49 = vpop.f32.mrf.mxu0 }
 0x1c6   : > { %1883 = vst.msk [vmem:[%s5476_s13 + $0x4c] sm:$0xf] %vm1863_vm1, %v4173_v47  ;;  %v1723_v52 = vmax.f32 %v1657_v36, 0.0  ;;  %v1499_v42 = vadd.f32 %v4619_v17, %v5437_v45  ;;  %3969 = vmatmul.mubr.msk.bf16.gmra.mxu1 %vm2109_vm2, %v5641_v31  ;;  %3985 = vmatmul.mubr.msk.bf16.gmra.mxu0 %vm2109_vm2, %v5641_v31 }
 0x1c7   : > { %v4621_v53 = vpop.f32.mrf.mxu0  ;;  %2290 = vmatprep.mubr.bf16.mxu1 %v4869_v26  ;;  %2483 = vmatprep.mubr.bf16.mxu0 %v4869_v26 }
 0x1c8   : > { %v4174_v51 = vpack.c.bf16 %v1723_v52, %v1723_v52  ;;  %v1660_v58 = vadd.f32 %v1659_v32, %v1499_v42  ;;  %v4622_v60 = vadd.f32 %v4621_v53, %v4620_v49 }
 0x1c9   : > { %v4623_v62 = vpop.f32.mrf.mxu0 }
 0x1ca   : > { %1884 = vst.msk [vmem:[%s5476_s13 + $0x50] sm:$0xf] %vm1863_vm1, %v4174_v51  ;;  %v1724_v45 = vmax.f32 %v1660_v58, 0.0  ;;  %v1504_v1 = vadd.f32 %v4622_v60, %v5441_v57  ;;  %v1672_v57 = vpop.f32.mrf.mxu1 }
 0x1cb   : > { %v4624_v63 = vpop.f32.mrf.mxu0 }
 0x1cc   : > { %v5655_v0 = vpack.c.bf16 %v1724_v45, %v1723_v52  ;;  %v4175_v50 = vpack.c.bf16 %v1724_v45, %v1724_v45  ;;  %v1665_v3 = vadd.f32 %v4711_v10, %v1504_v1  ;;  %v4625_v7 = vadd.f32 %v4624_v63, %v4623_v62  ;;  %v4716_v21 = vpop.f32.mrf.mxu1 }
 0x1cd   : > { %v4626_v14 = vpop.f32.mrf.mxu0 }
 0x1ce   : > { %1885 = vst.msk [vmem:[%s5476_s13 + $0x54] sm:$0xf] %vm1863_vm1, %v4175_v50  ;;  %v1725_v2 = vmax.f32 %v1665_v3, 0.0  ;;  %v1507_v13 = vadd.f32 %v4625_v7, %v5444_v4  ;;  %3970 = vmatmul.mubr.msk.bf16.gmra.mxu1 %vm2109_vm2, %v5655_v0  ;;  %3986 = vmatmul.mubr.msk.bf16.gmra.mxu0 %vm2109_vm2, %v5655_v0 }
 0x1cf   : > { %v4627_v61 = vpop.f32.mrf.mxu0  ;;  %2300 = vmatprep.mubr.bf16.mxu1 %v4869_v26  ;;  %2493 = vmatprep.mubr.bf16.mxu0 %v4869_v26 }
 0x1d0   : > { %v4176_v40 = vpack.c.bf16 %v1725_v2, %v1725_v2  ;;  %v1668_v12 = vadd.f32 %v4712_v54, %v1507_v13  ;;  %v4628_v10 = vadd.f32 %v4627_v61, %v4626_v14 }
 0x1d1   : > { %v4629_v43 = vpop.f32.mrf.mxu0 }
 0x1d2   : > { %1886 = vst.msk [vmem:[%s5476_s13 + $0x58] sm:$0xf] %vm1863_vm1, %v4176_v40  ;;  %v1726_v4 = vmax.f32 %v1668_v12, 0.0  ;;  %v1512_v41 = vadd.f32 %v4628_v10, %v5447_v16  ;;  %v1675_v16 = vpop.f32.mrf.mxu1 }
 0x1d3   : > { %v4630_v11 = vpop.f32.mrf.mxu0 }
 0x1d4   : > { %v5669_v20 = vpack.c.bf16 %v1726_v4, %v1725_v2  ;;  %v4177_v25 = vpack.c.bf16 %v1726_v4, %v1726_v4  ;;  %v1673_v8 = vadd.f32 %v1672_v57, %v1512_v41  ;;  %v4631_v22 = vadd.f32 %v4630_v11, %v4629_v43  ;;  %v4719_v17 = vpop.f32.mrf.mxu1 }
 0x1d5   : > { %v4632_v24 = vpop.f32.mrf.mxu0 }
 0x1d6   : > { %1887 = vst.msk [vmem:[%s5476_s13 + $0x5c] sm:$0xf] %vm1863_vm1, %v4177_v25  ;;  %v1727_v5 = vmax.f32 %v1673_v8, 0.0  ;;  %v1515_v33 = vadd.f32 %v4631_v22, %v5450_v29  ;;  %3971 = vmatmul.mubr.msk.bf16.gmra.mxu1 %vm2109_vm2, %v5669_v20  ;;  %3987 = vmatmul.mubr.msk.bf16.gmra.mxu0 %vm2109_vm2, %v5669_v20 }
 0x1d7   : > { %v4633_v39 = vpop.f32.mrf.mxu0  ;;  %2310 = vmatprep.mubr.bf16.mxu1 %v4869_v26  ;;  %2503 = vmatprep.mubr.bf16.mxu0 %v4869_v26 }
 0x1d8   : > { %v4178_v19 = vpack.c.bf16 %v1727_v5, %v1727_v5  ;;  %v1676_v35 = vadd.f32 %v1675_v16, %v1515_v33  ;;  %v4634_v54 = vadd.f32 %v4633_v39, %v4632_v24 }
 0x1d9   : > { %v4635_v44 = vpop.f32.mrf.mxu0 }
 0x1da   : > { %1888 = vst.msk [vmem:[%s5476_s13 + $0x60] sm:$0xf] %vm1863_vm1, %v4178_v19  ;;  %v1728_v29 = vmax.f32 %v1676_v35, 0.0  ;;  %v1520_v47 = vadd.f32 %v4634_v54, %v5453_v46  ;;  %v1688_v46 = vpop.f32.mrf.mxu1 }
 0x1db   : > { %v4636_v36 = vpop.f32.mrf.mxu0 }
 0x1dc   : > { %v5683_v49 = vpack.c.bf16 %v1728_v29, %v1727_v5  ;;  %v4179_v52 = vpack.c.bf16 %v1728_v29, %v1728_v29  ;;  %v1681_v42 = vadd.f32 %v4715_v28, %v1520_v47  ;;  %v4637_v32 = vadd.f32 %v4636_v36, %v4635_v44  ;;  %v4720_v50 = vpop.f32.mrf.mxu1 }
 0x1dd   : > { %v4638_v53 = vpop.f32.mrf.mxu0 }
 0x1de   : > { %1889 = vst.msk [vmem:[%s5476_s13 + $0x64] sm:$0xf] %vm1863_vm1, %v4179_v52  ;;  %v1729_v51 = vmax.f32 %v1681_v42, 0.0  ;;  %v1523_v58 = vadd.f32 %v4637_v32, %v5456_v59  ;;  %3972 = vmatmul.mubr.msk.bf16.gmra.mxu1 %vm2109_vm2, %v5683_v49  ;;  %3988 = vmatmul.mubr.msk.bf16.gmra.mxu0 %vm2109_vm2, %v5683_v49 }
 0x1df   : > { %v4639_v60 = vpop.f32.mrf.mxu0  ;;  %2320 = vmatprep.mubr.bf16.mxu1 %v4869_v26  ;;  %2513 = vmatprep.mubr.bf16.mxu0 %v4869_v26 }
 0x1e0   : > { %v4180_v62 = vpack.c.bf16 %v1729_v51, %v1729_v51  ;;  %v1684_v45 = vadd.f32 %v4716_v21, %v1523_v58  ;;  %v4640_v1 = vadd.f32 %v4639_v60, %v4638_v53 }
 0x1e1   : > { %v4641_v63 = vpop.f32.mrf.mxu0 }
 0x1e2   : > { %1890 = vst.msk [vmem:[%s5476_s13 + $0x68] sm:$0xf] %vm1863_vm1, %v4180_v62  ;;  %v1730_v59 = vmax.f32 %v1684_v45, 0.0  ;;  %v1528_v28 = vadd.f32 %v4640_v1, %v5459_v9  ;;  %v1691_v9 = vpop.f32.mrf.mxu1 }
 0x1e3   : > { %v4642_v3 = vpop.f32.mrf.mxu0 }
 0x1e4   : > { %v5697_v7 = vpack.c.bf16 %v1730_v59, %v1729_v51  ;;  %v4181_v14 = vpack.c.bf16 %v1730_v59, %v1730_v59  ;;  %v1689_v2 = vadd.f32 %v1688_v46, %v1528_v28  ;;  %v4643_v13 = vadd.f32 %v4642_v3, %v4641_v63 }
 0x1e5   : > { %v4644_v57 = vpop.f32.mrf.mxu0 }
 0x1e6   : > { %1891 = vst.msk [vmem:[%s5476_s13 + $0x6c] sm:$0xf] %vm1863_vm1, %v4181_v14  ;;  %v1731_v61 = vmax.f32 %v1689_v2, 0.0  ;;  %v1531_v40 = vadd.f32 %v4643_v13, %v5462_v23  ;;  %3973 = vmatmul.mubr.msk.bf16.gmra.mxu1 %vm2109_vm2, %v5697_v7  ;;  %3989 = vmatmul.mubr.msk.bf16.gmra.mxu0 %vm2109_vm2, %v5697_v7 }
 0x1e7   : > { %v4645_v12 = vpop.f32.mrf.mxu0  ;;  %2330 = vmatprep.mubr.bf16.mxu1 %v4869_v26  ;;  %2523 = vmatprep.mubr.bf16.mxu0 %v4869_v26 }
 0x1e8   : > { %v4182_v10 = vpack.c.bf16 %v1731_v61, %v1731_v61  ;;  %v1692_v43 = vadd.f32 %v1691_v9, %v1531_v40  ;;  %v4646_v4 = vadd.f32 %v4645_v12, %v4644_v57 }
 0x1e9   : > { %v4647_v41 = vpop.f32.mrf.mxu0 }
 0x1ea   : > { %1892 = vst.msk [vmem:[%s5476_s13 + $0x70] sm:$0xf] %vm1863_vm1, %v4182_v10  ;;  %v1732_v23 = vmax.f32 %v1692_v43, 0.0  ;;  %v1536_v21 = vadd.f32 %v4646_v4, %v5465_v37 }
 0x1eb   : > { %v4648_v11 = vpop.f32.mrf.mxu0 }
 0x1ec   : > { %v5711_v25 = vpack.c.bf16 %v1732_v23, %v1731_v61  ;;  %v4183_v8 = vpack.c.bf16 %v1732_v23, %v1732_v23  ;;  %v1697_v22 = vadd.f32 %v4719_v17, %v1536_v21  ;;  %v4649_v24 = vadd.f32 %v4648_v11, %v4647_v41 }
 0x1ee   : > { %1893 = vst.msk [vmem:[%s5476_s13 + $0x74] sm:$0xf] %vm1863_vm1, %v4183_v8  ;;  %v1733_v5 = vmax.f32 %v1697_v22, 0.0  ;;  %v1539_v33 = vadd.f32 %v4649_v24, %v5468_v56  ;;  %3974 = vmatmul.mubr.msk.bf16.gmra.mxu1 %vm2109_vm2, %v5711_v25  ;;  %3990 = vmatmul.mubr.msk.bf16.gmra.mxu0 %vm2109_vm2, %v5711_v25  ;;  %v1930_v56 = vlaneseq }
 0x1ef   : > { %2340 = vmatprep.mubr.bf16.mxu1 %v4869_v26  ;;  %2533 = vmatprep.mubr.bf16.mxu0 %v4869_v26 }
 0x1f0   : > { %v4184_v37 = vpack.c.bf16 %v1733_v5, %v1733_v5  ;;  %v1700_v16 = vadd.f32 %v4720_v50, %v1539_v33 }
 0x1f2   : > { %1894 = vst.msk [vmem:[%s5476_s13 + $0x78] sm:$0xf] %vm1863_vm1, %v4184_v37  ;;  %v1734_v39 = vmax.f32 %v1700_v16, 0.0 }
 0x1f4   : > { %v5724_v19 = vpack.c.bf16 %v1734_v39, %v1733_v5  ;;  %v4185_v35 = vpack.c.bf16 %v1734_v39, %v1734_v39 }
 0x1f6   : > { %1895 = vst.msk [vmem:[%s5476_s13 + $0x7c] sm:$0xf] %vm1863_vm1, %v4185_v35  ;;  %3975 = vmatmul.mubr.msk.bf16.gmra.mxu1 %vm2109_vm2, %v5724_v19  ;;  %3991 = vmatmul.mubr.msk.bf16.gmra.mxu0 %vm2109_vm2, %v5724_v19 }
 0x1f7   : > { %4729 = vmatprep.mubr.msk.bf16.mxu0 %vm2109_vm2, %v5486_v34  ;;  %2576 = vmatprep.mubr.bf16.mxu1 %v4869_v26 }
 0x1fe   : > { %3992 = vmatmul.mubr.msk.bf16.vlgmr.msra.gmra.mxu1 %vm2109_vm2, %v5486_v34  ;;  %4730 = vmatmul.mubr.msk.bf16.vlgmr.msra.gmra.mxu0 %vm2109_vm2, %v5513_v15  ;;  %v5784_v34 = vshrl.u32 %v1930_v56, 7 }
 0x1ff   : > { %4733 = vmatprep.mubr.msk.bf16.mxu0 %vm2109_vm2, %v5543_v30  ;;  %2586 = vmatprep.mubr.bf16.mxu1 %v4869_v26 }
 0x206   : > { %3993 = vmatmul.mubr.msk.bf16.gmra.mxu1 %vm2109_vm2, %v5513_v15  ;;  %4734 = vmatmul.mubr.msk.bf16.gmra.mxu0 %vm2109_vm2, %v5557_v55  ;;  %v1932_v15 = vsub.s32 0, %v5784_v34 }
 0x207   : > { %4737 = vmatprep.mubr.msk.bf16.mxu0 %vm2109_vm2, %v5571_v38  ;;  %2596 = vmatprep.mubr.bf16.mxu1 %v4869_v26 }
 0x20e   : > { %3994 = vmatmul.mubr.msk.bf16.gmra.mxu1 %vm2109_vm2, %v5543_v30  ;;  %4738 = vmatmul.mubr.msk.bf16.gmra.mxu0 %vm2109_vm2, %v5585_v6  ;;  %v1940_v30 = vsub.s32 2, %v5784_v34 }
 0x20f   : > { %4741 = vmatprep.mubr.msk.bf16.mxu0 %vm2109_vm2, %v5599_v27  ;;  %2606 = vmatprep.mubr.bf16.mxu1 %v4869_v26 }
 0x216   : > { %3995 = vmatmul.mubr.msk.bf16.gmra.mxu1 %vm2109_vm2, %v5557_v55  ;;  %4742 = vmatmul.mubr.msk.bf16.gmra.mxu0 %vm2109_vm2, %v5613_v48  ;;  %v1936_v55 = vsub.s32 1, %v5784_v34 }
 0x217   : > { %4745 = vmatprep.mubr.msk.bf16.mxu0 %vm2109_vm2, %v5627_v18  ;;  %2616 = vmatprep.mubr.bf16.mxu1 %v4869_v26 }
 0x21e   : > { %3996 = vmatmul.mubr.msk.bf16.gmra.mxu1 %vm2109_vm2, %v5571_v38  ;;  %4746 = vmatmul.mubr.msk.bf16.gmra.mxu0 %vm2109_vm2, %v5641_v31  ;;  %v1944_v38 = vsub.s32 3, %v5784_v34 }
 0x21f   : > { %4749 = vmatprep.mubr.msk.bf16.mxu0 %vm2109_vm2, %v5655_v0  ;;  %2626 = vmatprep.mubr.bf16.mxu1 %v4869_v26 }
 0x226   : > { %3997 = vmatmul.mubr.msk.bf16.gmra.mxu1 %vm2109_vm2, %v5585_v6  ;;  %4750 = vmatmul.mubr.msk.bf16.gmra.mxu0 %vm2109_vm2, %v5669_v20  ;;  %v5798_v6 = vld [vmem:[%s6244_s4] sm:$0x7f] }
 0x227   : > { %4753 = vmatprep.mubr.msk.bf16.mxu0 %vm2109_vm2, %v5683_v49  ;;  %2636 = vmatprep.mubr.bf16.mxu1 %v4869_v26  ;;  %v5807_v54 = vrot.slane %v5798_v6, %v1936_v55  ;;  %v5810_v44 = vrot.slane %v5798_v6, %v1944_v38 }
 0x22e   : > { %3998 = vmatmul.mubr.msk.bf16.gmra.mxu1 %vm2109_vm2, %v5599_v27  ;;  %4754 = vmatmul.mubr.msk.bf16.gmra.mxu0 %vm2109_vm2, %v5697_v7  ;;  %v5801_v27 = vrot.slane %v5798_v6, %v1932_v15 }
 0x22f   : > { %4757 = vmatprep.mubr.msk.bf16.mxu0 %vm2109_vm2, %v5711_v25  ;;  %2646 = vmatprep.mubr.bf16.mxu1 %v4869_v26 }
 0x236   : > { %3999 = vmatmul.mubr.msk.bf16.gmra.mxu1 %vm2109_vm2, %v5613_v48  ;;  %4758 = vmatmul.mubr.msk.bf16.gmra.mxu0 %vm2109_vm2, %v5724_v19  ;;  %v5804_v48 = vrot.slane %v5798_v6, %v1940_v30 }
 0x237   : > { %2656 = vmatprep.mubr.bf16.mxu1 %v4869_v26 }
 0x23e   : > { %v2192_v29 = vpop.f32.mrf.mxu1  ;;  %v2385_v47 = vpop.f32.mrf.mxu0  ;;  %4000 = vmatmul.mubr.msk.bf16.gmra.mxu1 %vm2109_vm2, %v5627_v18 }
 0x23f   : > { %2666 = vmatprep.mubr.bf16.mxu1 %v4869_v26  ;;  %v2193_v52 = vadd.f32 %v2192_v29, %v5801_v27  ;;  %v2386_v42 = vadd.f32 %v2385_v47, %v5804_v48 }
 0x240   : > { %v2194_v36 = vpop.f32.mrf.mxu1  ;;  %v2387_v17 = vpop.f32.mrf.mxu0 }
 0x241   : > { %v2195_v32 = vadd.f32 %v2194_v36, %v5807_v54  ;;  %v2388_v53 = vadd.f32 %v2387_v17, %v5810_v44 }
 0x242   : > { %v2196_v18 = vpop.f32.mrf.mxu1  ;;  %v2389_v51 = vpop.f32.mrf.mxu0 }
 0x243   : > { %v4186_v58 = vpack.c.bf16 %v2195_v32, %v2193_v52  ;;  %v4187_v46 = vpack.c.bf16 %v2388_v53, %v2386_v42  ;;  %v2197_v45 = vadd.f32 %v2196_v18, %v5801_v27  ;;  %v2390_v1 = vadd.f32 %v2389_v51, %v5804_v48 }
 0x244   : > { %v2198_v60 = vpop.f32.mrf.mxu1  ;;  %v2391_v62 = vpop.f32.mrf.mxu0 }
 0x245   : > { %3602 = vst [vmem:[%s5823_s16] sm:$0xff] %v4186_v58  ;;  %3603 = vst [vmem:[%s5823_s16 + $0x8] sm:$0xff] %v4187_v46  ;;  %v2199_v63 = vadd.f32 %v2198_v60, %v5807_v54  ;;  %v2392_v59 = vadd.f32 %v2391_v62, %v5810_v44 }
 0x246   : > { %v2202_v28 = vpop.f32.mrf.mxu1  ;;  %v2395_v50 = vpop.f32.mrf.mxu0  ;;  %4001 = vmatmul.mubr.msk.bf16.gmra.mxu1 %vm2109_vm2, %v5641_v31 }
 0x247   : > { %v4190_v3 = vpack.c.bf16 %v2199_v63, %v2197_v45  ;;  %v4191_v14 = vpack.c.bf16 %v2392_v59, %v2390_v1  ;;  %2676 = vmatprep.mubr.bf16.mxu1 %v4869_v26  ;;  %v2203_v57 = vadd.f32 %v2202_v28, %v5801_v27  ;;  %v2396_v61 = vadd.f32 %v2395_v50, %v5804_v48 }
 0x248   : > { %v2204_v2 = vpop.f32.mrf.mxu1  ;;  %v2397_v13 = vpop.f32.mrf.mxu0 }
 0x249   : > { %3607 = vst [vmem:[%s5823_s16 + $0x1c] sm:$0xff] %v4190_v3  ;;  %3608 = vst [vmem:[%s5823_s16 + $0x24] sm:$0xff] %v4191_v14  ;;  %v2205_v40 = vadd.f32 %v2204_v2, %v5807_v54  ;;  %v2398_v9 = vadd.f32 %v2397_v13, %v5810_v44 }
 0x24a   : > { %v2206_v12 = vpop.f32.mrf.mxu1  ;;  %v2399_v31 = vpop.f32.mrf.mxu0 }
 0x24b   : > { %v4194_v10 = vpack.c.bf16 %v2205_v40, %v2203_v57  ;;  %v4195_v43 = vpack.c.bf16 %v2398_v9, %v2396_v61  ;;  %v2207_v23 = vadd.f32 %v2206_v12, %v5801_v27  ;;  %v2400_v21 = vadd.f32 %v2399_v31, %v5804_v48 }
 0x24c   : > { %v2208_v4 = vpop.f32.mrf.mxu1  ;;  %v2401_v41 = vpop.f32.mrf.mxu0 }
 0x24d   : > { %3611 = vst [vmem:[%s5823_s16 + $0x38] sm:$0xff] %v4194_v10  ;;  %3612 = vst [vmem:[%s5823_s16 + $0x40] sm:$0xff] %v4195_v43  ;;  %v2209_v11 = vadd.f32 %v2208_v4, %v5807_v54  ;;  %v2402_v8 = vadd.f32 %v2401_v41, %v5810_v44 }
 0x24e   : > { %v2212_v22 = vpop.f32.mrf.mxu1  ;;  %v2405_v24 = vpop.f32.mrf.mxu0  ;;  %4002 = vmatmul.mubr.msk.bf16.gmra.mxu1 %vm2109_vm2, %v5655_v0 }
 0x24f   : > { %v4198_v5 = vpack.c.bf16 %v2209_v11, %v2207_v23  ;;  %v4199_v33 = vpack.c.bf16 %v2402_v8, %v2400_v21  ;;  %2686 = vmatprep.mubr.bf16.mxu1 %v4869_v26  ;;  %v2213_v39 = vadd.f32 %v2212_v22, %v5801_v27  ;;  %v2406_v35 = vadd.f32 %v2405_v24, %v5804_v48 }
 0x250   : > { %v2214_v37 = vpop.f32.mrf.mxu1  ;;  %v2407_v16 = vpop.f32.mrf.mxu0 }
 0x251   : > { %3615 = vst [vmem:[%s5823_s16 + $0x54] sm:$0xff] %v4198_v5  ;;  %3616 = vst [vmem:[%s5823_s16 + $0x5c] sm:$0xff] %v4199_v33  ;;  %v2215_v56 = vadd.f32 %v2214_v37, %v5807_v54  ;;  %v2408_v15 = vadd.f32 %v2407_v16, %v5810_v44 }
 0x252   : > { %v2216_v30 = vpop.f32.mrf.mxu1  ;;  %v2409_v0 = vpop.f32.mrf.mxu0 }
 0x253   : > { %v4202_v55 = vpack.c.bf16 %v2215_v56, %v2213_v39  ;;  %v4203_v38 = vpack.c.bf16 %v2408_v15, %v2406_v35  ;;  %v2217_v36 = vadd.f32 %v2216_v30, %v5801_v27  ;;  %v2410_v17 = vadd.f32 %v2409_v0, %v5804_v48 }
 0x254   : > { %v2218_v29 = vpop.f32.mrf.mxu1  ;;  %v2411_v47 = vpop.f32.mrf.mxu0 }
 0x255   : > { %3619 = vst [vmem:[%s5823_s16 + $0x70] sm:$0xff] %v4202_v55  ;;  %3620 = vst [vmem:[%s5823_s16 + $0x78] sm:$0xff] %v4203_v38  ;;  %v2219_v52 = vadd.f32 %v2218_v29, %v5807_v54  ;;  %v2412_v42 = vadd.f32 %v2411_v47, %v5810_v44 }
 0x256   : > { %v2222_v32 = vpop.f32.mrf.mxu1  ;;  %v2415_v53 = vpop.f32.mrf.mxu0  ;;  %4003 = vmatmul.mubr.msk.bf16.gmra.mxu1 %vm2109_vm2, %v5669_v20 }
 0x257   : > { %v4206_v18 = vpack.c.bf16 %v2219_v52, %v2217_v36  ;;  %v4207_v51 = vpack.c.bf16 %v2412_v42, %v2410_v17  ;;  %2696 = vmatprep.mubr.bf16.mxu1 %v4869_v26  ;;  %v2223_v60 = vadd.f32 %v2222_v32, %v5801_v27  ;;  %v2416_v62 = vadd.f32 %v2415_v53, %v5804_v48 }
 0x258   : > { %v2224_v58 = vpop.f32.mrf.mxu1  ;;  %v2417_v46 = vpop.f32.mrf.mxu0 }
 0x259   : > { %3623 = vst [vmem:[%s5823_s16 + $0x8c] sm:$0xff] %v4206_v18  ;;  %3624 = vst [vmem:[%s5823_s16 + $0x94] sm:$0xff] %v4207_v51  ;;  %v2225_v45 = vadd.f32 %v2224_v58, %v5807_v54  ;;  %v2418_v1 = vadd.f32 %v2417_v46, %v5810_v44 }
 0x25a   : > { %v2226_v63 = vpop.f32.mrf.mxu1  ;;  %v2419_v20 = vpop.f32.mrf.mxu0 }
 0x25b   : > { %v4210_v59 = vpack.c.bf16 %v2225_v45, %v2223_v60  ;;  %v4211_v28 = vpack.c.bf16 %v2418_v1, %v2416_v62  ;;  %v2227_v14 = vadd.f32 %v2226_v63, %v5801_v27  ;;  %v2420_v2 = vadd.f32 %v2419_v20, %v5804_v48 }
 0x25c   : > { %v2228_v50 = vpop.f32.mrf.mxu1  ;;  %v2421_v3 = vpop.f32.mrf.mxu0 }
 0x25d   : > { %3627 = vst [vmem:[%s5823_s16 + $0xa8] sm:$0xff] %v4210_v59  ;;  %3628 = vst [vmem:[%s5823_s16 + $0xb0] sm:$0xff] %v4211_v28  ;;  %v2229_v13 = vadd.f32 %v2228_v50, %v5807_v54  ;;  %v2422_v57 = vadd.f32 %v2421_v3, %v5810_v44 }
 0x25e   : > { %v2232_v61 = vpop.f32.mrf.mxu1  ;;  %v2425_v40 = vpop.f32.mrf.mxu0  ;;  %4004 = vmatmul.mubr.msk.bf16.gmra.mxu1 %vm2109_vm2, %v5683_v49 }
 0x25f   : > { %v4214_v9 = vpack.c.bf16 %v2229_v13, %v2227_v14  ;;  %v4215_v12 = vpack.c.bf16 %v2422_v57, %v2420_v2  ;;  %2706 = vmatprep.mubr.bf16.mxu1 %v4869_v26  ;;  %v2233_v43 = vadd.f32 %v2232_v61, %v5801_v27  ;;  %v2426_v4 = vadd.f32 %v2425_v40, %v5804_v48 }
 0x260   : > { %v2234_v31 = vpop.f32.mrf.mxu1  ;;  %v2427_v10 = vpop.f32.mrf.mxu0 }
 0x261   : > { %3631 = vst [vmem:[%s5823_s16 + $0xc4] sm:$0xff] %v4214_v9  ;;  %3632 = vst [vmem:[%s5823_s16 + $0xcc] sm:$0xff] %v4215_v12  ;;  %v2235_v41 = vadd.f32 %v2234_v31, %v5807_v54  ;;  %v2428_v23 = vadd.f32 %v2427_v10, %v5810_v44 }
 0x262   : > { %v2236_v21 = vpop.f32.mrf.mxu1  ;;  %v2429_v49 = vpop.f32.mrf.mxu0 }
 0x263   : > { %v4218_v11 = vpack.c.bf16 %v2235_v41, %v2233_v43  ;;  %v4219_v8 = vpack.c.bf16 %v2428_v23, %v2426_v4  ;;  %v2237_v5 = vadd.f32 %v2236_v21, %v5801_v27  ;;  %v2430_v33 = vadd.f32 %v2429_v49, %v5804_v48 }
 0x264   : > { %v2238_v22 = vpop.f32.mrf.mxu1  ;;  %v2431_v24 = vpop.f32.mrf.mxu0 }
 0x265   : > { %3635 = vst [vmem:[%s5823_s16 + $0xe0] sm:$0xff] %v4218_v11  ;;  %3636 = vst [vmem:[%s5823_s16 + $0xe8] sm:$0xff] %v4219_v8  ;;  %v2239_v37 = vadd.f32 %v2238_v22, %v5807_v54  ;;  %v2432_v16 = vadd.f32 %v2431_v24, %v5810_v44 }
 0x266   : > { %v2242_v39 = vpop.f32.mrf.mxu1  ;;  %v2435_v35 = vpop.f32.mrf.mxu0  ;;  %4005 = vmatmul.mubr.msk.bf16.gmra.mxu1 %vm2109_vm2, %v5697_v7 }
 0x267   : > { %v4222_v56 = vpack.c.bf16 %v2239_v37, %v2237_v5  ;;  %v4223_v15 = vpack.c.bf16 %v2432_v16, %v2430_v33  ;;  %2716 = vmatprep.mubr.bf16.mxu1 %v4869_v26  ;;  %v2243_v55 = vadd.f32 %v2242_v39, %v5801_v27  ;;  %v2436_v38 = vadd.f32 %v2435_v35, %v5804_v48 }
 0x268   : > { %v2244_v30 = vpop.f32.mrf.mxu1  ;;  %v2437_v0 = vpop.f32.mrf.mxu0 }
 0x269   : > { %3639 = vst [vmem:[%s5823_s16 + $0xfc] sm:$0xff] %v4222_v56  ;;  %3640 = vst [vmem:[%s5823_s16 + $0x104] sm:$0xff] %v4223_v15  ;;  %v2245_v29 = vadd.f32 %v2244_v30, %v5807_v54  ;;  %v2438_v47 = vadd.f32 %v2437_v0, %v5810_v44 }
 0x26a   : > { %v2246_v36 = vpop.f32.mrf.mxu1  ;;  %v2439_v7 = vpop.f32.mrf.mxu0 }
 0x26b   : > { %v4226_v17 = vpack.c.bf16 %v2245_v29, %v2243_v55  ;;  %v4227_v52 = vpack.c.bf16 %v2438_v47, %v2436_v38  ;;  %v2247_v53 = vadd.f32 %v2246_v36, %v5801_v27  ;;  %v2440_v18 = vadd.f32 %v2439_v7, %v5804_v48 }
 0x26c   : > { %v2248_v42 = vpop.f32.mrf.mxu1  ;;  %v2441_v32 = vpop.f32.mrf.mxu0 }
 0x26d   : > { %3643 = vst [vmem:[%s5823_s16 + $0x118] sm:$0xff] %v4226_v17  ;;  %3644 = vst [vmem:[%s5823_s16 + $0x120] sm:$0xff] %v4227_v52  ;;  %v2249_v51 = vadd.f32 %v2248_v42, %v5807_v54  ;;  %v2442_v58 = vadd.f32 %v2441_v32, %v5810_v44 }
 0x26e   : > { %v2252_v46 = vpop.f32.mrf.mxu1  ;;  %v2445_v60 = vpop.f32.mrf.mxu0  ;;  %4006 = vmatmul.mubr.msk.bf16.gmra.mxu1 %vm2109_vm2, %v5711_v25 }
 0x26f   : > { %v4230_v62 = vpack.c.bf16 %v2249_v51, %v2247_v53  ;;  %v4231_v45 = vpack.c.bf16 %v2442_v58, %v2440_v18  ;;  %2726 = vmatprep.mubr.bf16.mxu1 %v4869_v26  ;;  %v2253_v20 = vadd.f32 %v2252_v46, %v5801_v27  ;;  %v2446_v59 = vadd.f32 %v2445_v60, %v5804_v48 }
 0x270   : > { %v2254_v1 = vpop.f32.mrf.mxu1  ;;  %v2447_v63 = vpop.f32.mrf.mxu0 }
 0x271   : > { %3647 = vst [vmem:[%s5823_s16 + $0x134] sm:$0xff] %v4230_v62  ;;  %3648 = vst [vmem:[%s5823_s16 + $0x13c] sm:$0xff] %v4231_v45  ;;  %v2255_v28 = vadd.f32 %v2254_v1, %v5807_v54  ;;  %v2448_v50 = vadd.f32 %v2447_v63, %v5810_v44 }
 0x272   : > { %v2256_v3 = vpop.f32.mrf.mxu1  ;;  %v2449_v25 = vpop.f32.mrf.mxu0 }
 0x273   : > { %v4234_v14 = vpack.c.bf16 %v2255_v28, %v2253_v20  ;;  %v4235_v2 = vpack.c.bf16 %v2448_v50, %v2446_v59  ;;  %v2257_v57 = vadd.f32 %v2256_v3, %v5801_v27  ;;  %v2450_v61 = vadd.f32 %v2449_v25, %v5804_v48 }
 0x274   : > { %v2258_v13 = vpop.f32.mrf.mxu1  ;;  %v2451_v26 = vpop.f32.mrf.mxu0 }
 0x275   : > { %3651 = vst [vmem:[%s5823_s16 + $0x150] sm:$0xff] %v4234_v14  ;;  %3652 = vst [vmem:[%s5823_s16 + $0x158] sm:$0xff] %v4235_v2  ;;  %v2259_v40 = vadd.f32 %v2258_v13, %v5807_v54  ;;  %v2452_v9 = vadd.f32 %v2451_v26, %v5810_v44 }
 0x276   : > { %v2262_v12 = vpop.f32.mrf.mxu1  ;;  %v2455_v31 = vpop.f32.mrf.mxu0  ;;  %4007 = vmatmul.mubr.msk.bf16.gmra.mxu1 %vm2109_vm2, %v5724_v19 }
 0x277   : > { %v4238_v10 = vpack.c.bf16 %v2259_v40, %v2257_v57  ;;  %v4239_v43 = vpack.c.bf16 %v2452_v9, %v2450_v61  ;;  %v2263_v23 = vadd.f32 %v2262_v12, %v5801_v27  ;;  %v2456_v21 = vadd.f32 %v2455_v31, %v5804_v48 }
 0x278   : > { %v2264_v4 = vpop.f32.mrf.mxu1  ;;  %v2457_v41 = vpop.f32.mrf.mxu0 }
 0x279   : > { %3655 = vst [vmem:[%s5823_s16 + $0x16c] sm:$0xff] %v4238_v10  ;;  %3656 = vst [vmem:[%s5823_s16 + $0x174] sm:$0xff] %v4239_v43  ;;  %v2265_v49 = vadd.f32 %v2264_v4, %v5807_v54  ;;  %v2458_v11 = vadd.f32 %v2457_v41, %v5810_v44 }
 0x27a   : > { %v2266_v8 = vpop.f32.mrf.mxu1  ;;  %v2459_v22 = vpop.f32.mrf.mxu0 }
 0x27b   : > { %v4242_v24 = vpack.c.bf16 %v2265_v49, %v2263_v23  ;;  %v4243_v19 = vpack.c.bf16 %v2458_v11, %v2456_v21  ;;  %v2267_v37 = vadd.f32 %v2266_v8, %v5801_v27  ;;  %v2460_v16 = vadd.f32 %v2459_v22, %v5804_v48 }
 0x27c   : > { %v2268_v5 = vpop.f32.mrf.mxu1  ;;  %v2461_v33 = vpop.f32.mrf.mxu0 }
 0x27d   : > { %3659 = vst [vmem:[%s5823_s16 + $0x188] sm:$0xff] %v4242_v24  ;;  %3660 = vst [vmem:[%s5823_s16 + $0x190] sm:$0xff] %v4243_v19  ;;  %v2269_v39 = vadd.f32 %v2268_v5, %v5807_v54  ;;  %v2462_v35 = vadd.f32 %v2461_v33, %v5810_v44 }
 0x27e   : > { %v2272_v56 = vpop.f32.mrf.mxu1  ;;  %v2465_v15 = vpop.f32.mrf.mxu0 }
 0x27f   : > { %v4246_v30 = vpack.c.bf16 %v2269_v39, %v2267_v37  ;;  %v4247_v0 = vpack.c.bf16 %v2462_v35, %v2460_v16  ;;  %v2273_v29 = vadd.f32 %v2272_v56, %v5801_v27  ;;  %v2466_v47 = vadd.f32 %v2465_v15, %v5804_v48 }
 0x280   : > { %v2274_v55 = vpop.f32.mrf.mxu1  ;;  %v2467_v38 = vpop.f32.mrf.mxu0 }
 0x281   : > { %3663 = vst [vmem:[%s5823_s16 + $0x1a4] sm:$0xff] %v4246_v30  ;;  %3664 = vst [vmem:[%s5823_s16 + $0x1ac] sm:$0xff] %v4247_v0  ;;  %v2275_v36 = vadd.f32 %v2274_v55, %v5807_v54  ;;  %v2468_v7 = vadd.f32 %v2467_v38, %v5810_v44 }
 0x282   : > { %v2276_v17 = vpop.f32.mrf.mxu1  ;;  %v2469_v52 = vpop.f32.mrf.mxu0 }
 0x283   : > { %v4250_v42 = vpack.c.bf16 %v2275_v36, %v2273_v29  ;;  %v4251_v32 = vpack.c.bf16 %v2468_v7, %v2466_v47  ;;  %v2277_v51 = vadd.f32 %v2276_v17, %v5801_v27  ;;  %v2470_v58 = vadd.f32 %v2469_v52, %v5804_v48 }
 0x284   : > { %v2278_v53 = vpop.f32.mrf.mxu1  ;;  %v2471_v18 = vpop.f32.mrf.mxu0 }
 0x285   : > { %3667 = vst [vmem:[%s5823_s16 + $0x1c0] sm:$0xff] %v4250_v42  ;;  %3668 = vst [vmem:[%s5823_s16 + $0x1c8] sm:$0xff] %v4251_v32  ;;  %v2279_v46 = vadd.f32 %v2278_v53, %v5807_v54  ;;  %v2472_v60 = vadd.f32 %v2471_v18, %v5810_v44 }
 0x286   : > { %v2282_v62 = vpop.f32.mrf.mxu1  ;;  %v2475_v45 = vpop.f32.mrf.mxu0 }
 0x287   : > { %v4254_v1 = vpack.c.bf16 %v2279_v46, %v2277_v51  ;;  %v4255_v63 = vpack.c.bf16 %v2472_v60, %v2470_v58  ;;  %v2283_v28 = vadd.f32 %v2282_v62, %v5801_v27  ;;  %v2476_v50 = vadd.f32 %v2475_v45, %v5804_v48 }
 0x288   : > { %v2284_v20 = vpop.f32.mrf.mxu1  ;;  %v2477_v59 = vpop.f32.mrf.mxu0 }
 0x289   : > { %3671 = vst [vmem:[%s5823_s16 + $0x1dc] sm:$0xff] %v4254_v1  ;;  %3672 = vst [vmem:[%s5823_s16 + $0x1e4] sm:$0xff] %v4255_v63  ;;  %v2285_v3 = vadd.f32 %v2284_v20, %v5807_v54  ;;  %v2478_v25 = vadd.f32 %v2477_v59, %v5810_v44 }
 0x28a   : > { %v2286_v14 = vpop.f32.mrf.mxu1  ;;  %v2479_v2 = vpop.f32.mrf.mxu0 }
 0x28b   : > { %v4258_v13 = vpack.c.bf16 %v2285_v3, %v2283_v28  ;;  %v4259_v26 = vpack.c.bf16 %v2478_v25, %v2476_v50  ;;  %v2287_v40 = vadd.f32 %v2286_v14, %v5801_v27  ;;  %v2480_v9 = vadd.f32 %v2479_v2, %v5804_v48 }
 0x28c   : > { %v2288_v57 = vpop.f32.mrf.mxu1  ;;  %v2481_v61 = vpop.f32.mrf.mxu0 }
 0x28d   : > { %3675 = vst [vmem:[%s5823_s16 + $0x1f8] sm:$0xff] %v4258_v13  ;;  %3676 = vst [vmem:[%s5823_s16 + $0x200] sm:$0xff] %v4259_v26  ;;  %v2289_v12 = vadd.f32 %v2288_v57, %v5807_v54  ;;  %v2482_v31 = vadd.f32 %v2481_v61, %v5810_v44 }
 0x28e   : > { %v2292_v10 = vpop.f32.mrf.mxu1  ;;  %v2485_v43 = vpop.f32.mrf.mxu0 }
 0x28f   : > { %v4262_v4 = vpack.c.bf16 %v2289_v12, %v2287_v40  ;;  %v4263_v41 = vpack.c.bf16 %v2482_v31, %v2480_v9  ;;  %v2293_v49 = vadd.f32 %v2292_v10, %v5801_v27  ;;  %v2486_v11 = vadd.f32 %v2485_v43, %v5804_v48 }
 0x290   : > { %v2294_v23 = vpop.f32.mrf.mxu1  ;;  %v2487_v21 = vpop.f32.mrf.mxu0 }
 0x291   : > { %3679 = vst [vmem:[%s5823_s16 + $0x214] sm:$0xff] %v4262_v4  ;;  %3680 = vst [vmem:[%s5823_s16 + $0x21c] sm:$0xff] %v4263_v41  ;;  %v2295_v8 = vadd.f32 %v2294_v23, %v5807_v54  ;;  %v2488_v22 = vadd.f32 %v2487_v21, %v5810_v44 }
 0x292   : > { %v2296_v24 = vpop.f32.mrf.mxu1  ;;  %v2489_v19 = vpop.f32.mrf.mxu0 }
 0x293   : > { %v4266_v5 = vpack.c.bf16 %v2295_v8, %v2293_v49  ;;  %v4267_v33 = vpack.c.bf16 %v2488_v22, %v2486_v11  ;;  %v2297_v39 = vadd.f32 %v2296_v24, %v5801_v27  ;;  %v2490_v35 = vadd.f32 %v2489_v19, %v5804_v48 }
 0x294   : > { %v2298_v37 = vpop.f32.mrf.mxu1  ;;  %v2491_v16 = vpop.f32.mrf.mxu0 }
 0x295   : > { %3683 = vst [vmem:[%s5823_s16 + $0x230] sm:$0xff] %v4266_v5  ;;  %3684 = vst [vmem:[%s5823_s16 + $0x238] sm:$0xff] %v4267_v33  ;;  %v2299_v56 = vadd.f32 %v2298_v37, %v5807_v54  ;;  %v2492_v15 = vadd.f32 %v2491_v16, %v5810_v44 }
 0x296   : > { %v2302_v30 = vpop.f32.mrf.mxu1  ;;  %v2495_v0 = vpop.f32.mrf.mxu0 }
 0x297   : > { %v4270_v55 = vpack.c.bf16 %v2299_v56, %v2297_v39  ;;  %v4271_v38 = vpack.c.bf16 %v2492_v15, %v2490_v35  ;;  %v2303_v36 = vadd.f32 %v2302_v30, %v5801_v27  ;;  %v2496_v7 = vadd.f32 %v2495_v0, %v5804_v48 }
 0x298   : > { %v2304_v29 = vpop.f32.mrf.mxu1  ;;  %v2497_v47 = vpop.f32.mrf.mxu0 }
 0x299   : > { %3687 = vst [vmem:[%s5823_s16 + $0x24c] sm:$0xff] %v4270_v55  ;;  %3688 = vst [vmem:[%s5823_s16 + $0x254] sm:$0xff] %v4271_v38  ;;  %v2305_v17 = vadd.f32 %v2304_v29, %v5807_v54  ;;  %v2498_v52 = vadd.f32 %v2497_v47, %v5810_v44 }
 0x29a   : > { %v2306_v42 = vpop.f32.mrf.mxu1  ;;  %v2499_v32 = vpop.f32.mrf.mxu0 }
 0x29b   : > { %v4274_v53 = vpack.c.bf16 %v2305_v17, %v2303_v36  ;;  %v4275_v18 = vpack.c.bf16 %v2498_v52, %v2496_v7  ;;  %v2307_v46 = vadd.f32 %v2306_v42, %v5801_v27  ;;  %v2500_v60 = vadd.f32 %v2499_v32, %v5804_v48 }
 0x29c   : > { %v2308_v51 = vpop.f32.mrf.mxu1  ;;  %v2501_v58 = vpop.f32.mrf.mxu0 }
 0x29d   : > { %3691 = vst [vmem:[%s5823_s16 + $0x268] sm:$0xff] %v4274_v53  ;;  %3692 = vst [vmem:[%s5823_s16 + $0x270] sm:$0xff] %v4275_v18  ;;  %v2309_v62 = vadd.f32 %v2308_v51, %v5807_v54  ;;  %v2502_v45 = vadd.f32 %v2501_v58, %v5810_v44 }
 0x29e   : > { %v2312_v1 = vpop.f32.mrf.mxu1  ;;  %v2505_v63 = vpop.f32.mrf.mxu0 }
 0x29f   : > { %v4278_v20 = vpack.c.bf16 %v2309_v62, %v2307_v46  ;;  %v4279_v59 = vpack.c.bf16 %v2502_v45, %v2500_v60  ;;  %v2313_v3 = vadd.f32 %v2312_v1, %v5801_v27  ;;  %v2506_v25 = vadd.f32 %v2505_v63, %v5804_v48 }
 0x2a0   : > { %v2314_v28 = vpop.f32.mrf.mxu1  ;;  %v2507_v50 = vpop.f32.mrf.mxu0 }
 0x2a1   : > { %3695 = vst [vmem:[%s5823_s16 + $0x284] sm:$0xff] %v4278_v20  ;;  %3696 = vst [vmem:[%s5823_s16 + $0x28c] sm:$0xff] %v4279_v59  ;;  %v2315_v14 = vadd.f32 %v2314_v28, %v5807_v54  ;;  %v2508_v2 = vadd.f32 %v2507_v50, %v5810_v44 }
 0x2a2   : > { %v2316_v13 = vpop.f32.mrf.mxu1  ;;  %v2509_v26 = vpop.f32.mrf.mxu0 }
 0x2a3   : > { %v4282_v57 = vpack.c.bf16 %v2315_v14, %v2313_v3  ;;  %v4283_v61 = vpack.c.bf16 %v2508_v2, %v2506_v25  ;;  %v2317_v12 = vadd.f32 %v2316_v13, %v5801_v27  ;;  %v2510_v31 = vadd.f32 %v2509_v26, %v5804_v48 }
 0x2a4   : > { %v2318_v40 = vpop.f32.mrf.mxu1  ;;  %v2511_v9 = vpop.f32.mrf.mxu0  ;;  %v1956_v3 = vsub.s32 6, %v5784_v34  ;;  %v1948_v2 = vsub.s32 4, %v5784_v34  ;;  %v1952_v13 = vsub.s32 5, %v5784_v34 }
 0x2a5   : > { %3699 = vst [vmem:[%s5823_s16 + $0x2a0] sm:$0xff] %v4282_v57  ;;  %3700 = vst [vmem:[%s5823_s16 + $0x2a8] sm:$0xff] %v4283_v61  ;;  %v2319_v10 = vadd.f32 %v2318_v40, %v5807_v54  ;;  %v2512_v43 = vadd.f32 %v2511_v9, %v5810_v44 }
 0x2a6   : > { %v2322_v4 = vpop.f32.mrf.mxu1  ;;  %v2515_v41 = vpop.f32.mrf.mxu0 }
 0x2a7   : > { %v4286_v23 = vpack.c.bf16 %v2319_v10, %v2317_v12  ;;  %v4287_v21 = vpack.c.bf16 %v2512_v43, %v2510_v31  ;;  %v2323_v8 = vadd.f32 %v2322_v4, %v5801_v27  ;;  %v2516_v22 = vadd.f32 %v2515_v41, %v5804_v48 }
 0x2a8   : > { %v2324_v49 = vpop.f32.mrf.mxu1  ;;  %v2517_v11 = vpop.f32.mrf.mxu0  ;;  %v6029_v43 = vrot.slane %v5798_v6, %v1956_v3  ;;  %v6032_v41 = vrot.slane %v5798_v6, %v1948_v2 }
 0x2a9   : > { %3703 = vst [vmem:[%s5823_s16 + $0x2bc] sm:$0xff] %v4286_v23  ;;  %3704 = vst [vmem:[%s5823_s16 + $0x2c4] sm:$0xff] %v4287_v21  ;;  %v2325_v24 = vadd.f32 %v2324_v49, %v5807_v54  ;;  %v2518_v19 = vadd.f32 %v2517_v11, %v5810_v44  ;;  %v6035_v23 = vrot.slane %v5798_v6, %v1952_v13 }
 0x2aa   : > { %v2326_v5 = vpop.f32.mrf.mxu1  ;;  %v2519_v33 = vpop.f32.mrf.mxu0 }
 0x2ab   : > { %v4290_v37 = vpack.c.bf16 %v2325_v24, %v2323_v8  ;;  %v4291_v16 = vpack.c.bf16 %v2518_v19, %v2516_v22  ;;  %v2327_v56 = vadd.f32 %v2326_v5, %v5801_v27  ;;  %v2520_v15 = vadd.f32 %v2519_v33, %v5804_v48 }
 0x2ac   : > { %v2328_v39 = vpop.f32.mrf.mxu1  ;;  %v2521_v35 = vpop.f32.mrf.mxu0 }
 0x2ad   : > { %3707 = vst [vmem:[%s5823_s16 + $0x2d8] sm:$0xff] %v4290_v37  ;;  %3708 = vst [vmem:[%s5823_s16 + $0x2e0] sm:$0xff] %v4291_v16  ;;  %v2329_v30 = vadd.f32 %v2328_v39, %v5807_v54  ;;  %v2522_v0 = vadd.f32 %v2521_v35, %v5810_v44 }
 0x2ae   : > { %v2332_v55 = vpop.f32.mrf.mxu1  ;;  %v2525_v38 = vpop.f32.mrf.mxu0 }
 0x2af   : > { %v4294_v29 = vpack.c.bf16 %v2329_v30, %v2327_v56  ;;  %v4295_v47 = vpack.c.bf16 %v2522_v0, %v2520_v15  ;;  %v2333_v17 = vadd.f32 %v2332_v55, %v5801_v27  ;;  %v2526_v52 = vadd.f32 %v2525_v38, %v5804_v48 }
 0x2b0   : > { %v2334_v36 = vpop.f32.mrf.mxu1  ;;  %v2527_v7 = vpop.f32.mrf.mxu0 }
 0x2b1   : > { %3711 = vst [vmem:[%s5823_s16 + $0x2f4] sm:$0xff] %v4294_v29  ;;  %3712 = vst [vmem:[%s5823_s16 + $0x2fc] sm:$0xff] %v4295_v47  ;;  %v2335_v42 = vadd.f32 %v2334_v36, %v5807_v54  ;;  %v2528_v32 = vadd.f32 %v2527_v7, %v5810_v44 }
 0x2b2   : > { %v2336_v53 = vpop.f32.mrf.mxu1  ;;  %v2529_v18 = vpop.f32.mrf.mxu0 }
 0x2b3   : > { %v4298_v51 = vpack.c.bf16 %v2335_v42, %v2333_v17  ;;  %v4299_v58 = vpack.c.bf16 %v2528_v32, %v2526_v52  ;;  %v2337_v62 = vadd.f32 %v2336_v53, %v5801_v27  ;;  %v2530_v45 = vadd.f32 %v2529_v18, %v5804_v48 }
 0x2b4   : > { %v2338_v46 = vpop.f32.mrf.mxu1  ;;  %v2531_v60 = vpop.f32.mrf.mxu0 }
 0x2b5   : > { %3715 = vst [vmem:[%s5823_s16 + $0x310] sm:$0xff] %v4298_v51  ;;  %3716 = vst [vmem:[%s5823_s16 + $0x318] sm:$0xff] %v4299_v58  ;;  %v2339_v1 = vadd.f32 %v2338_v46, %v5807_v54  ;;  %v2532_v63 = vadd.f32 %v2531_v60, %v5810_v44 }
 0x2b6   : > { %v2342_v20 = vpop.f32.mrf.mxu1  ;;  %v2535_v59 = vpop.f32.mrf.mxu0 }
 0x2b7   : > { %v4302_v28 = vpack.c.bf16 %v2339_v1, %v2337_v62  ;;  %v4303_v50 = vpack.c.bf16 %v2532_v63, %v2530_v45  ;;  %v2343_v26 = vadd.f32 %v2342_v20, %v5801_v27  ;;  %v2536_v57 = vadd.f32 %v2535_v59, %v5804_v48 }
 0x2b8   : > { %v2344_v25 = vpop.f32.mrf.mxu1  ;;  %v2537_v14 = vpop.f32.mrf.mxu0 }
 0x2b9   : > { %3719 = vst [vmem:[%s5823_s16 + $0x32c] sm:$0xff] %v4302_v28  ;;  %3720 = vst [vmem:[%s5823_s16 + $0x334] sm:$0xff] %v4303_v50  ;;  %v2345_v61 = vadd.f32 %v2344_v25, %v5807_v54  ;;  %v2538_v40 = vadd.f32 %v2537_v14, %v5810_v44 }
 0x2ba   : > { %v2346_v9 = vpop.f32.mrf.mxu1  ;;  %v2539_v12 = vpop.f32.mrf.mxu0 }
 0x2bb   : > { %v4306_v31 = vpack.c.bf16 %v2345_v61, %v2343_v26  ;;  %v4307_v10 = vpack.c.bf16 %v2538_v40, %v2536_v57  ;;  %v2347_v21 = vadd.f32 %v2346_v9, %v5801_v27  ;;  %v2540_v49 = vadd.f32 %v2539_v12, %v5804_v48 }
 0x2bc   : > { %v2348_v34 = vpop.f32.mrf.mxu1  ;;  %v2541_v4 = vpop.f32.mrf.mxu0 }
 0x2bd   : > { %3723 = vst [vmem:[%s5823_s16 + $0x348] sm:$0xff] %v4306_v31  ;;  %3724 = vst [vmem:[%s5823_s16 + $0x350] sm:$0xff] %v4307_v10  ;;  %v2349_v11 = vadd.f32 %v2348_v34, %v5807_v54  ;;  %v2542_v8 = vadd.f32 %v2541_v4, %v5810_v44 }
 0x2be   : > { %v2578_v22 = vpop.f32.mrf.mxu1  ;;  %v4731_v24 = vpop.f32.mrf.mxu0 }
 0x2bf   : > { %v4310_v19 = vpack.c.bf16 %v2349_v11, %v2347_v21  ;;  %v4311_v5 = vpack.c.bf16 %v2542_v8, %v2540_v49  ;;  %v2780_v33 = vadd.f32 %v4731_v24, %v6029_v43  ;;  %v2579_v27 = vadd.f32 %v2578_v22, %v6032_v41 }
 0x2c0   : > { %v2580_v6 = vpop.f32.mrf.mxu1  ;;  %v2771_v37 = vpop.f32.mrf.mxu0 }
 0x2c1   : > { %3727 = vst [vmem:[%s5823_s16 + $0x364] sm:$0xff] %v4310_v19  ;;  %3728 = vst [vmem:[%s5823_s16 + $0x36c] sm:$0xff] %v4311_v5  ;;  %v4197_v48 = vpack.c.bf16 %v2780_v33, %v2780_v33  ;;  %v2581_v54 = vadd.f32 %v2580_v6, %v6035_v23  ;;  %v2772_v44 = vadd.f32 %v2771_v37, %v6029_v43 }
 0x2c2   : > { %v2582_v16 = vpop.f32.mrf.mxu1  ;;  %v4732_v39 = vpop.f32.mrf.mxu0 }
 0x2c3   : > { %3614 = vst.msk [vmem:[%s5823_s16 + $0x50] sm:$0xf] %vm3605_vm3, %v4197_v48  ;;  %v4188_v35 = vpack.c.bf16 %v2581_v54, %v2579_v27  ;;  %v4189_v56 = vpack.c.bf16 %v2772_v44, %v2772_v44  ;;  %v2783_v15 = vadd.f32 %v4732_v39, %v6029_v43  ;;  %v2583_v55 = vadd.f32 %v2582_v16, %v6032_v41 }
 0x2c4   : > { %v2584_v30 = vpop.f32.mrf.mxu1  ;;  %v2774_v0 = vpop.f32.mrf.mxu0 }
 0x2c5   : > { %3604 = vst [vmem:[%s5823_s16 + $0x10] sm:$0xff] %v4188_v35  ;;  %3606 = vst.msk [vmem:[%s5823_s16 + $0x18] sm:$0xf] %vm3605_vm3, %v4189_v56  ;;  %v4201_v38 = vpack.c.bf16 %v2783_v15, %v2783_v15  ;;  %v2585_v29 = vadd.f32 %v2584_v30, %v6035_v23  ;;  %v2775_v47 = vadd.f32 %v2774_v0, %v6029_v43 }
 0x2c6   : > { %v2588_v36 = vpop.f32.mrf.mxu1  ;;  %v4735_v7 = vpop.f32.mrf.mxu0 }
 0x2c7   : > { %3618 = vst.msk [vmem:[%s5823_s16 + $0x6c] sm:$0xf] %vm3605_vm3, %v4201_v38  ;;  %v4192_v17 = vpack.c.bf16 %v2585_v29, %v2583_v55  ;;  %v4193_v52 = vpack.c.bf16 %v2775_v47, %v2775_v47  ;;  %v2796_v42 = vadd.f32 %v4735_v7, %v6029_v43  ;;  %v2589_v18 = vadd.f32 %v2588_v36, %v6032_v41 }
 0x2c8   : > { %v2590_v32 = vpop.f32.mrf.mxu1  ;;  %v2787_v53 = vpop.f32.mrf.mxu0 }
 0x2c9   : > { %3609 = vst [vmem:[%s5823_s16 + $0x2c] sm:$0xff] %v4192_v17  ;;  %3610 = vst.msk [vmem:[%s5823_s16 + $0x34] sm:$0xf] %vm3605_vm3, %v4193_v52  ;;  %v4213_v51 = vpack.c.bf16 %v2796_v42, %v2796_v42  ;;  %v2591_v58 = vadd.f32 %v2590_v32, %v6035_v23  ;;  %v2788_v46 = vadd.f32 %v2787_v53, %v6029_v43 }
 0x2ca   : > { %v2592_v60 = vpop.f32.mrf.mxu1  ;;  %v4736_v62 = vpop.f32.mrf.mxu0 }
 0x2cb   : > { %3630 = vst.msk [vmem:[%s5823_s16 + $0xc0] sm:$0xf] %vm3605_vm3, %v4213_v51  ;;  %v4196_v45 = vpack.c.bf16 %v2591_v58, %v2589_v18  ;;  %v4205_v1 = vpack.c.bf16 %v2788_v46, %v2788_v46  ;;  %v2799_v63 = vadd.f32 %v4736_v62, %v6029_v43  ;;  %v2593_v28 = vadd.f32 %v2592_v60, %v6032_v41 }
 0x2cc   : > { %v2594_v20 = vpop.f32.mrf.mxu1  ;;  %v2790_v59 = vpop.f32.mrf.mxu0 }
 0x2cd   : > { %3613 = vst [vmem:[%s5823_s16 + $0x48] sm:$0xff] %v4196_v45  ;;  %3622 = vst.msk [vmem:[%s5823_s16 + $0x88] sm:$0xf] %vm3605_vm3, %v4205_v1  ;;  %v4217_v50 = vpack.c.bf16 %v2799_v63, %v2799_v63  ;;  %v2595_v3 = vadd.f32 %v2594_v20, %v6035_v23  ;;  %v2791_v25 = vadd.f32 %v2790_v59, %v6029_v43 }
 0x2ce   : > { %v2598_v14 = vpop.f32.mrf.mxu1  ;;  %v4739_v2 = vpop.f32.mrf.mxu0 }
 0x2cf   : > { %3634 = vst.msk [vmem:[%s5823_s16 + $0xdc] sm:$0xf] %vm3605_vm3, %v4217_v50  ;;  %v4200_v13 = vpack.c.bf16 %v2595_v3, %v2593_v28  ;;  %v4209_v26 = vpack.c.bf16 %v2791_v25, %v2791_v25  ;;  %v2812_v57 = vadd.f32 %v4739_v2, %v6029_v43  ;;  %v2599_v9 = vadd.f32 %v2598_v14, %v6032_v41 }
 0x2d0   : > { %v2600_v61 = vpop.f32.mrf.mxu1  ;;  %v2803_v40 = vpop.f32.mrf.mxu0 }
 0x2d1   : > { %3617 = vst [vmem:[%s5823_s16 + $0x64] sm:$0xff] %v4200_v13  ;;  %3626 = vst.msk [vmem:[%s5823_s16 + $0xa4] sm:$0xf] %vm3605_vm3, %v4209_v26  ;;  %v4229_v12 = vpack.c.bf16 %v2812_v57, %v2812_v57  ;;  %v2601_v31 = vadd.f32 %v2600_v61, %v6035_v23  ;;  %v2804_v10 = vadd.f32 %v2803_v40, %v6029_v43 }
 0x2d2   : > { %v2602_v34 = vpop.f32.mrf.mxu1  ;;  %v4740_v4 = vpop.f32.mrf.mxu0 }
 0x2d3   : > { %3646 = vst.msk [vmem:[%s5823_s16 + $0x130] sm:$0xf] %vm3605_vm3, %v4229_v12  ;;  %v4204_v21 = vpack.c.bf16 %v2601_v31, %v2599_v9  ;;  %v4221_v49 = vpack.c.bf16 %v2804_v10, %v2804_v10  ;;  %v2815_v11 = vadd.f32 %v4740_v4, %v6029_v43  ;;  %v2603_v24 = vadd.f32 %v2602_v34, %v6032_v41 }
 0x2d4   : > { %v2604_v8 = vpop.f32.mrf.mxu1  ;;  %v2806_v22 = vpop.f32.mrf.mxu0 }
 0x2d5   : > { %3621 = vst [vmem:[%s5823_s16 + $0x80] sm:$0xff] %v4204_v21  ;;  %3638 = vst.msk [vmem:[%s5823_s16 + $0xf8] sm:$0xf] %vm3605_vm3, %v4221_v49  ;;  %v4233_v19 = vpack.c.bf16 %v2815_v11, %v2815_v11  ;;  %v2605_v5 = vadd.f32 %v2604_v8, %v6035_v23  ;;  %v2807_v33 = vadd.f32 %v2806_v22, %v6029_v43 }
 0x2d6   : > { %v2608_v6 = vpop.f32.mrf.mxu1  ;;  %v4743_v37 = vpop.f32.mrf.mxu0 }
 0x2d7   : > { %3650 = vst.msk [vmem:[%s5823_s16 + $0x14c] sm:$0xf] %vm3605_vm3, %v4233_v19  ;;  %v4208_v27 = vpack.c.bf16 %v2605_v5, %v2603_v24  ;;  %v4225_v48 = vpack.c.bf16 %v2807_v33, %v2807_v33  ;;  %v2828_v54 = vadd.f32 %v4743_v37, %v6029_v43  ;;  %v2609_v39 = vadd.f32 %v2608_v6, %v6032_v41 }
 0x2d8   : > { %v2610_v44 = vpop.f32.mrf.mxu1  ;;  %v2819_v16 = vpop.f32.mrf.mxu0 }
 0x2d9   : > { %3625 = vst [vmem:[%s5823_s16 + $0x9c] sm:$0xff] %v4208_v27  ;;  %3642 = vst.msk [vmem:[%s5823_s16 + $0x114] sm:$0xf] %vm3605_vm3, %v4225_v48  ;;  %v4245_v35 = vpack.c.bf16 %v2828_v54, %v2828_v54  ;;  %v2611_v56 = vadd.f32 %v2610_v44, %v6035_v23  ;;  %v2820_v15 = vadd.f32 %v2819_v16, %v6029_v43 }
 0x2da   : > { %v2612_v30 = vpop.f32.mrf.mxu1  ;;  %v4744_v0 = vpop.f32.mrf.mxu0 }
 0x2db   : > { %3662 = vst.msk [vmem:[%s5823_s16 + $0x1a0] sm:$0xf] %vm3605_vm3, %v4245_v35  ;;  %v4212_v55 = vpack.c.bf16 %v2611_v56, %v2609_v39  ;;  %v4237_v38 = vpack.c.bf16 %v2820_v15, %v2820_v15  ;;  %v2831_v29 = vadd.f32 %v4744_v0, %v6029_v43  ;;  %v2613_v7 = vadd.f32 %v2612_v30, %v6032_v41 }
 0x2dc   : > { %v2614_v47 = vpop.f32.mrf.mxu1  ;;  %v2822_v36 = vpop.f32.mrf.mxu0 }
 0x2dd   : > { %3629 = vst [vmem:[%s5823_s16 + $0xb8] sm:$0xff] %v4212_v55  ;;  %3654 = vst.msk [vmem:[%s5823_s16 + $0x168] sm:$0xf] %vm3605_vm3, %v4237_v38  ;;  %v4249_v17 = vpack.c.bf16 %v2831_v29, %v2831_v29  ;;  %v2615_v52 = vadd.f32 %v2614_v47, %v6035_v23  ;;  %v2823_v42 = vadd.f32 %v2822_v36, %v6029_v43 }
 0x2de   : > { %v2618_v32 = vpop.f32.mrf.mxu1  ;;  %v4747_v53 = vpop.f32.mrf.mxu0 }
 0x2df   : > { %3666 = vst.msk [vmem:[%s5823_s16 + $0x1bc] sm:$0xf] %vm3605_vm3, %v4249_v17  ;;  %v4216_v18 = vpack.c.bf16 %v2615_v52, %v2613_v7  ;;  %v4241_v51 = vpack.c.bf16 %v2823_v42, %v2823_v42  ;;  %v2844_v58 = vadd.f32 %v4747_v53, %v6029_v43  ;;  %v2619_v62 = vadd.f32 %v2618_v32, %v6032_v41 }
 0x2e0   : > { %v2620_v46 = vpop.f32.mrf.mxu1  ;;  %v2835_v60 = vpop.f32.mrf.mxu0 }
 0x2e1   : > { %3633 = vst [vmem:[%s5823_s16 + $0xd4] sm:$0xff] %v4216_v18  ;;  %3658 = vst.msk [vmem:[%s5823_s16 + $0x184] sm:$0xf] %vm3605_vm3, %v4241_v51  ;;  %v4261_v45 = vpack.c.bf16 %v2844_v58, %v2844_v58  ;;  %v2621_v1 = vadd.f32 %v2620_v46, %v6035_v23  ;;  %v2836_v63 = vadd.f32 %v2835_v60, %v6029_v43 }
 0x2e2   : > { %v2622_v20 = vpop.f32.mrf.mxu1  ;;  %v4748_v59 = vpop.f32.mrf.mxu0 }
 0x2e3   : > { %3678 = vst.msk [vmem:[%s5823_s16 + $0x210] sm:$0xf] %vm3605_vm3, %v4261_v45  ;;  %v4220_v28 = vpack.c.bf16 %v2621_v1, %v2619_v62  ;;  %v4253_v50 = vpack.c.bf16 %v2836_v63, %v2836_v63  ;;  %v2847_v3 = vadd.f32 %v4748_v59, %v6029_v43  ;;  %v2623_v2 = vadd.f32 %v2622_v20, %v6032_v41 }
 0x2e4   : > { %v2624_v25 = vpop.f32.mrf.mxu1  ;;  %v2838_v14 = vpop.f32.mrf.mxu0 }
 0x2e5   : > { %3637 = vst [vmem:[%s5823_s16 + $0xf0] sm:$0xff] %v4220_v28  ;;  %3670 = vst.msk [vmem:[%s5823_s16 + $0x1d8] sm:$0xf] %vm3605_vm3, %v4253_v50  ;;  %v4265_v13 = vpack.c.bf16 %v2847_v3, %v2847_v3  ;;  %v2625_v26 = vadd.f32 %v2624_v25, %v6035_v23  ;;  %v2839_v57 = vadd.f32 %v2838_v14, %v6029_v43 }
 0x2e6   : > { %v2628_v61 = vpop.f32.mrf.mxu1  ;;  %v4751_v40 = vpop.f32.mrf.mxu0 }
 0x2e7   : > { %3682 = vst.msk [vmem:[%s5823_s16 + $0x22c] sm:$0xf] %vm3605_vm3, %v4265_v13  ;;  %v4224_v9 = vpack.c.bf16 %v2625_v26, %v2623_v2  ;;  %v4257_v12 = vpack.c.bf16 %v2839_v57, %v2839_v57  ;;  %v2860_v31 = vadd.f32 %v4751_v40, %v6029_v43  ;;  %v2629_v4 = vadd.f32 %v2628_v61, %v6032_v41 }
 0x2e8   : > { %v2630_v10 = vpop.f32.mrf.mxu1  ;;  %v2851_v34 = vpop.f32.mrf.mxu0 }
 0x2e9   : > { %3641 = vst [vmem:[%s5823_s16 + $0x10c] sm:$0xff] %v4224_v9  ;;  %3674 = vst.msk [vmem:[%s5823_s16 + $0x1f4] sm:$0xf] %vm3605_vm3, %v4257_v12  ;;  %v4277_v21 = vpack.c.bf16 %v2860_v31, %v2860_v31  ;;  %v2631_v49 = vadd.f32 %v2630_v10, %v6035_v23  ;;  %v2852_v11 = vadd.f32 %v2851_v34, %v6029_v43 }
 0x2ea   : > { %v2632_v8 = vpop.f32.mrf.mxu1  ;;  %v4752_v22 = vpop.f32.mrf.mxu0 }
 0x2eb   : > { %3694 = vst.msk [vmem:[%s5823_s16 + $0x280] sm:$0xf] %vm3605_vm3, %v4277_v21  ;;  %v4228_v24 = vpack.c.bf16 %v2631_v49, %v2629_v4  ;;  %v4269_v19 = vpack.c.bf16 %v2852_v11, %v2852_v11  ;;  %v2863_v5 = vadd.f32 %v4752_v22, %v6029_v43  ;;  %v2633_v37 = vadd.f32 %v2632_v8, %v6032_v41 }
 0x2ec   : > { %v2634_v33 = vpop.f32.mrf.mxu1  ;;  %v2854_v6 = vpop.f32.mrf.mxu0 }
 0x2ed   : > { %3645 = vst [vmem:[%s5823_s16 + $0x128] sm:$0xff] %v4228_v24  ;;  %3686 = vst.msk [vmem:[%s5823_s16 + $0x248] sm:$0xf] %vm3605_vm3, %v4269_v19  ;;  %v4281_v27 = vpack.c.bf16 %v2863_v5, %v2863_v5  ;;  %v2635_v48 = vadd.f32 %v2634_v33, %v6035_v23  ;;  %v2855_v54 = vadd.f32 %v2854_v6, %v6029_v43 }
 0x2ee   : > { %v2638_v44 = vpop.f32.mrf.mxu1  ;;  %v4755_v16 = vpop.f32.mrf.mxu0 }
 0x2ef   : > { %3698 = vst.msk [vmem:[%s5823_s16 + $0x29c] sm:$0xf] %vm3605_vm3, %v4281_v27  ;;  %v4232_v39 = vpack.c.bf16 %v2635_v48, %v2633_v37  ;;  %v4273_v35 = vpack.c.bf16 %v2855_v54, %v2855_v54  ;;  %v2876_v56 = vadd.f32 %v4755_v16, %v6029_v43  ;;  %v2639_v0 = vadd.f32 %v2638_v44, %v6032_v41 }
 0x2f0   : > { %v2640_v15 = vpop.f32.mrf.mxu1  ;;  %v2867_v30 = vpop.f32.mrf.mxu0 }
 0x2f1   : > { %3649 = vst [vmem:[%s5823_s16 + $0x144] sm:$0xff] %v4232_v39  ;;  %3690 = vst.msk [vmem:[%s5823_s16 + $0x264] sm:$0xf] %vm3605_vm3, %v4273_v35  ;;  %v4293_v55 = vpack.c.bf16 %v2876_v56, %v2876_v56  ;;  %v2641_v38 = vadd.f32 %v2640_v15, %v6035_v23  ;;  %v2868_v29 = vadd.f32 %v2867_v30, %v6029_v43 }
 0x2f2   : > { %v2642_v47 = vpop.f32.mrf.mxu1  ;;  %v4756_v36 = vpop.f32.mrf.mxu0 }
 0x2f3   : > { %3710 = vst.msk [vmem:[%s5823_s16 + $0x2f0] sm:$0xf] %vm3605_vm3, %v4293_v55  ;;  %v4236_v7 = vpack.c.bf16 %v2641_v38, %v2639_v0  ;;  %v4285_v17 = vpack.c.bf16 %v2868_v29, %v2868_v29  ;;  %v2879_v52 = vadd.f32 %v4756_v36, %v6029_v43  ;;  %v2643_v53 = vadd.f32 %v2642_v47, %v6032_v41 }
 0x2f4   : > { %v2644_v42 = vpop.f32.mrf.mxu1  ;;  %v2870_v32 = vpop.f32.mrf.mxu0 }
 0x2f5   : > { %3653 = vst [vmem:[%s5823_s16 + $0x160] sm:$0xff] %v4236_v7  ;;  %3702 = vst.msk [vmem:[%s5823_s16 + $0x2b8] sm:$0xf] %vm3605_vm3, %v4285_v17  ;;  %v4297_v18 = vpack.c.bf16 %v2879_v52, %v2879_v52  ;;  %v2645_v51 = vadd.f32 %v2644_v42, %v6035_v23  ;;  %v2871_v58 = vadd.f32 %v2870_v32, %v6029_v43 }
 0x2f6   : > { %v2648_v46 = vpop.f32.mrf.mxu1  ;;  %v4759_v60 = vpop.f32.mrf.mxu0 }
 0x2f7   : > { %3714 = vst.msk [vmem:[%s5823_s16 + $0x30c] sm:$0xf] %vm3605_vm3, %v4297_v18  ;;  %v4240_v62 = vpack.c.bf16 %v2645_v51, %v2643_v53  ;;  %v4289_v45 = vpack.c.bf16 %v2871_v58, %v2871_v58  ;;  %v2892_v1 = vadd.f32 %v4759_v60, %v6029_v43  ;;  %v2649_v59 = vadd.f32 %v2648_v46, %v6032_v41 }
 0x2f8   : > { %v2650_v63 = vpop.f32.mrf.mxu1  ;;  %v2883_v20 = vpop.f32.mrf.mxu0 }
 0x2f9   : > { %3657 = vst [vmem:[%s5823_s16 + $0x17c] sm:$0xff] %v4240_v62  ;;  %3706 = vst.msk [vmem:[%s5823_s16 + $0x2d4] sm:$0xf] %vm3605_vm3, %v4289_v45  ;;  %v4309_v28 = vpack.c.bf16 %v2892_v1, %v2892_v1  ;;  %v2651_v50 = vadd.f32 %v2650_v63, %v6035_v23  ;;  %v2884_v3 = vadd.f32 %v2883_v20, %v6029_v43 }
 0x2fa   : > { %v2652_v25 = vpop.f32.mrf.mxu1  ;;  %v4760_v14 = vpop.f32.mrf.mxu0 }
 0x2fb   : > { %3726 = vst.msk [vmem:[%s5823_s16 + $0x360] sm:$0xf] %vm3605_vm3, %v4309_v28  ;;  %v4244_v2 = vpack.c.bf16 %v2651_v50, %v2649_v59  ;;  %v4301_v13 = vpack.c.bf16 %v2884_v3, %v2884_v3  ;;  %v2895_v26 = vadd.f32 %v4760_v14, %v6029_v43  ;;  %v2653_v40 = vadd.f32 %v2652_v25, %v6032_v41 }
 0x2fc   : > { %v2654_v57 = vpop.f32.mrf.mxu1  ;;  %v2886_v61 = vpop.f32.mrf.mxu0 }
 0x2fd   : > { %3661 = vst [vmem:[%s5823_s16 + $0x198] sm:$0xff] %v4244_v2  ;;  %3718 = vst.msk [vmem:[%s5823_s16 + $0x328] sm:$0xf] %vm3605_vm3, %v4301_v13  ;;  %v4313_v9 = vpack.c.bf16 %v2895_v26, %v2895_v26  ;;  %v2655_v12 = vadd.f32 %v2654_v57, %v6035_v23  ;;  %v2887_v31 = vadd.f32 %v2886_v61, %v6029_v43 }
 0x2fe   : > { %v2658_v10 = vpop.f32.mrf.mxu1 }
 0x2ff   : > { %3730 = vst.msk [vmem:[%s5823_s16 + $0x37c] sm:$0xf] %vm3605_vm3, %v4313_v9  ;;  %v4248_v34 = vpack.c.bf16 %v2655_v12, %v2653_v40  ;;  %v4305_v4 = vpack.c.bf16 %v2887_v31, %v2887_v31  ;;  %v2659_v49 = vadd.f32 %v2658_v10, %v6032_v41 }
 0x300   : > { %v2660_v21 = vpop.f32.mrf.mxu1 }
 0x301   : > { %3665 = vst [vmem:[%s5823_s16 + $0x1b4] sm:$0xff] %v4248_v34  ;;  %3722 = vst.msk [vmem:[%s5823_s16 + $0x344] sm:$0xf] %vm3605_vm3, %v4305_v4  ;;  %v2661_v11 = vadd.f32 %v2660_v21, %v6035_v23 }
 0x302   : > { %v2662_v8 = vpop.f32.mrf.mxu1 }
 0x303   : > { %v4252_v22 = vpack.c.bf16 %v2661_v11, %v2659_v49  ;;  %v2663_v43 = vadd.f32 %v2662_v8, %v6032_v41 }
 0x304   : > { %v2664_v24 = vpop.f32.mrf.mxu1 }
 0x305   : > { %3669 = vst [vmem:[%s5823_s16 + $0x1d0] sm:$0xff] %v4252_v22  ;;  %v2665_v19 = vadd.f32 %v2664_v24, %v6035_v23 }
 0x306   : > { %v2668_v5 = vpop.f32.mrf.mxu1 }
 0x307   : > { %v4256_v33 = vpack.c.bf16 %v2665_v19, %v2663_v43  ;;  %v2669_v37 = vadd.f32 %v2668_v5, %v6032_v41 }
 0x308   : > { %v2670_v6 = vpop.f32.mrf.mxu1 }
 0x309   : > { %3673 = vst [vmem:[%s5823_s16 + $0x1ec] sm:$0xff] %v4256_v33  ;;  %v2671_v27 = vadd.f32 %v2670_v6, %v6035_v23 }
 0x30a   : > { %v2672_v48 = vpop.f32.mrf.mxu1 }
 0x30b   : > { %v4260_v54 = vpack.c.bf16 %v2671_v27, %v2669_v37  ;;  %v2673_v16 = vadd.f32 %v2672_v48, %v6032_v41 }
 0x30c   : > { %v2674_v44 = vpop.f32.mrf.mxu1 }
 0x30d   : > { %3677 = vst [vmem:[%s5823_s16 + $0x208] sm:$0xff] %v4260_v54  ;;  %v2675_v39 = vadd.f32 %v2674_v44, %v6035_v23 }
 0x30e   : > { %v2678_v35 = vpop.f32.mrf.mxu1 }
 0x30f   : > { %v4264_v56 = vpack.c.bf16 %v2675_v39, %v2673_v16  ;;  %v2679_v30 = vadd.f32 %v2678_v35, %v6032_v41 }
 0x310   : > { %v2680_v15 = vpop.f32.mrf.mxu1 }
 0x311   : > { %3681 = vst [vmem:[%s5823_s16 + $0x224] sm:$0xff] %v4264_v56  ;;  %v2681_v0 = vadd.f32 %v2680_v15, %v6035_v23 }
 0x312   : > { %v2682_v55 = vpop.f32.mrf.mxu1 }
 0x313   : > { %v4268_v38 = vpack.c.bf16 %v2681_v0, %v2679_v30  ;;  %v2683_v47 = vadd.f32 %v2682_v55, %v6032_v41 }
 0x314   : > { %v2684_v29 = vpop.f32.mrf.mxu1 }
 0x315   : > { %3685 = vst [vmem:[%s5823_s16 + $0x240] sm:$0xff] %v4268_v38  ;;  %v2685_v36 = vadd.f32 %v2684_v29, %v6035_v23 }
 0x316   : > { %v2688_v7 = vpop.f32.mrf.mxu1 }
 0x317   : > { %v4272_v17 = vpack.c.bf16 %v2685_v36, %v2683_v47  ;;  %v2689_v42 = vadd.f32 %v2688_v7, %v6032_v41 }
 0x318   : > { %v2690_v52 = vpop.f32.mrf.mxu1 }
 0x319   : > { %3689 = vst [vmem:[%s5823_s16 + $0x25c] sm:$0xff] %v4272_v17  ;;  %v2691_v32 = vadd.f32 %v2690_v52, %v6035_v23 }
 0x31a   : > { %v2692_v53 = vpop.f32.mrf.mxu1 }
 0x31b   : > { %v4276_v18 = vpack.c.bf16 %v2691_v32, %v2689_v42  ;;  %v2693_v58 = vadd.f32 %v2692_v53, %v6032_v41 }
 0x31c   : > { %v2694_v51 = vpop.f32.mrf.mxu1 }
 0x31d   : > { %3693 = vst [vmem:[%s5823_s16 + $0x278] sm:$0xff] %v4276_v18  ;;  %v2695_v46 = vadd.f32 %v2694_v51, %v6035_v23 }
 0x31e   : > { %v2698_v60 = vpop.f32.mrf.mxu1 }
 0x31f   : > { %v4280_v62 = vpack.c.bf16 %v2695_v46, %v2693_v58  ;;  %v2699_v1 = vadd.f32 %v2698_v60, %v6032_v41 }
 0x320   : > { %v2700_v45 = vpop.f32.mrf.mxu1 }
 0x321   : > { %3697 = vst [vmem:[%s5823_s16 + $0x294] sm:$0xff] %v4280_v62  ;;  %v2701_v63 = vadd.f32 %v2700_v45, %v6035_v23 }
 0x322   : > { %v2702_v20 = vpop.f32.mrf.mxu1 }
 0x323   : > { %v4284_v59 = vpack.c.bf16 %v2701_v63, %v2699_v1  ;;  %v2703_v50 = vadd.f32 %v2702_v20, %v6032_v41 }
 0x324   : > { %v2704_v28 = vpop.f32.mrf.mxu1 }
 0x325   : > { %3701 = vst [vmem:[%s5823_s16 + $0x2b0] sm:$0xff] %v4284_v59  ;;  %v2705_v3 = vadd.f32 %v2704_v28, %v6035_v23 }
 0x326   : > { %v2708_v25 = vpop.f32.mrf.mxu1 }
 0x327   : > { %v4288_v14 = vpack.c.bf16 %v2705_v3, %v2703_v50  ;;  %v2709_v13 = vadd.f32 %v2708_v25, %v6032_v41 }
 0x328   : > { %v2710_v2 = vpop.f32.mrf.mxu1 }
 0x329   : > { %3705 = vst [vmem:[%s5823_s16 + $0x2cc] sm:$0xff] %v4288_v14  ;;  %v2711_v26 = vadd.f32 %v2710_v2, %v6035_v23 }
 0x32a   : > { %v2712_v57 = vpop.f32.mrf.mxu1 }
 0x32b   : > { %v4292_v61 = vpack.c.bf16 %v2711_v26, %v2709_v13  ;;  %v2713_v9 = vadd.f32 %v2712_v57, %v6032_v41 }
 0x32c   : > { %v2714_v40 = vpop.f32.mrf.mxu1 }
 0x32d   : > { %3709 = vst [vmem:[%s5823_s16 + $0x2e8] sm:$0xff] %v4292_v61  ;;  %v2715_v12 = vadd.f32 %v2714_v40, %v6035_v23 }
 0x32e   : > { %v2718_v31 = vpop.f32.mrf.mxu1 }
 0x32f   : > { %v4296_v10 = vpack.c.bf16 %v2715_v12, %v2713_v9  ;;  %v2719_v4 = vadd.f32 %v2718_v31, %v6032_v41 }
 0x330   : > { %v2720_v34 = vpop.f32.mrf.mxu1 }
 0x331   : > { %3713 = vst [vmem:[%s5823_s16 + $0x304] sm:$0xff] %v4296_v10  ;;  %v2721_v21 = vadd.f32 %v2720_v34, %v6035_v23 }
 0x332   : > { %v2722_v49 = vpop.f32.mrf.mxu1 }
 0x333   : > { %v4300_v11 = vpack.c.bf16 %v2721_v21, %v2719_v4  ;;  %v2723_v22 = vadd.f32 %v2722_v49, %v6032_v41 }
 0x334   : > { %v2724_v8 = vpop.f32.mrf.mxu1 }
 0x335   : > { %3717 = vst [vmem:[%s5823_s16 + $0x320] sm:$0xff] %v4300_v11  ;;  %v2725_v24 = vadd.f32 %v2724_v8, %v6035_v23 }
 0x336   : > { %v2728_v43 = vpop.f32.mrf.mxu1 }
 0x337   : > { %v4304_v19 = vpack.c.bf16 %v2725_v24, %v2723_v22  ;;  %v2729_v33 = vadd.f32 %v2728_v43, %v6032_v41 }
 0x338   : > { %v2730_v5 = vpop.f32.mrf.mxu1 }
 0x339   : > { %3721 = vst [vmem:[%s5823_s16 + $0x33c] sm:$0xff] %v4304_v19  ;;  %v2731_v6 = vadd.f32 %v2730_v5, %v6035_v23 }
 0x33a   : > { %v2732_v37 = vpop.f32.mrf.mxu1 }
 0x33b   : > { %v4308_v27 = vpack.c.bf16 %v2731_v6, %v2729_v33  ;;  %v2733_v54 = vadd.f32 %v2732_v37, %v6032_v41 }
 0x33c   : > { %v2734_v48 = vpop.f32.mrf.mxu1 }
 0x33d   : > { %3725 = vst [vmem:[%s5823_s16 + $0x358] sm:$0xff] %v4308_v27  ;;  %v2735_v44 = vadd.f32 %v2734_v48, %v6035_v23 }
 0x33f   : > { %v4312_v16 = vpack.c.bf16 %v2735_v44, %v2733_v54 }
 0x341   : > { %3729 = vst [vmem:[%s5823_s16 + $0x374] sm:$0xff] %v4312_v16 }
 0x342 PF: > { %s17_s21 = sadd.s32 1, %s4867_s21  }
 0x343   : > { %p14_p4 = scmp.ge.s32.totalorder %s17_s21, 10  }
 0x345   :  { %16 = sbr.rel (!%p14_p4) target bundleno = 1 (0x1), region = 82 }

</bundles_post_ra>
